<compile_context>
chip_gen: v7x
topology: tpu7x:2x2x1
jax: 0.10.0
libtpu: 0.0.40
codegen_flags: <defaults>
</compile_context>

<pallas_src>
import numpy as np
import jax
import jax.numpy as jnp
from jax import lax
from jax.experimental import pallas as pl
from jax.experimental.pallas import tpu as pltpu

ROI_FEAT_DIM = 4096   # roi_feat_dim from __init__ (RELPN_WITH_BBOX_INFO = False)
SUB_FEAT = 256        # self.sub_feat_size
HIDDEN = 64           # LSTM hidden size / nlp feature dim
PACK = 4 * HIDDEN + HIDDEN   # 320: per-ROI pack width (gates/hh 256 + 64)
EPS = 1e-6            # eps passed to F.cosine_similarity in the reference


def _round_up(x, m):
    return ((x + m - 1) // m) * m


# ---------------------------------------------------------------------------
# Kernel 1: per-ROI fused projection + per-ROI LSTM work (hoisted out of the
# per-pair kernel).  Gate columns are permuted at init to [i, f, o, g] so the
# three sigmoids fuse into one 192-lane sigmoid.
# ---------------------------------------------------------------------------
def _roi_pack_kernel(x_ref, wsub_ref, bsub_ref, wih_ref, bih_ref,
                     whh_ref, woutb_ref, subj_ref, obj_ref):
    H = HIDDEN
    xb = x_ref[...].astype(jnp.bfloat16)                    # cast tile in-kernel
    y = jnp.dot(xb, wsub_ref[...],
                preferred_element_type=jnp.float32) + bsub_ref[...]   # sub_feat
    gates = jnp.dot(y.astype(jnp.bfloat16), wih_ref[...],
                    preferred_element_type=jnp.float32) + bih_ref[...]
    gf = gates[:, :4 * H]        # x@W_ih_fwd + b_ih_f + b_hh_f   (gates [i,f,o,g])
    gb = gates[:, 4 * H:]        # x@W_ih_bwd + b_ih_b + b_hh_b

    def cell0(g):                # LSTM cell with zero initial state
        sig = jax.nn.sigmoid(g[:, :3 * H])
        i = sig[:, 0:H]
        o = sig[:, 2 * H:3 * H]
        gg = jnp.tanh(g[:, 3 * H:4 * H])
        c = i * gg               # f * c_prev == 0
        h = o * jnp.tanh(c)
        return h, c

    # forward direction, t = 0 (subject role)
    h1, c1 = cell0(gf)
    subj_hh = jnp.dot(h1, whh_ref[...], preferred_element_type=jnp.float32)  # (tm, 4H)
    # backward direction, first (and only needed) step (object role)
    h1b, _ = cell0(gb)
    obj_hb = jnp.dot(h1b, woutb_ref[...], preferred_element_type=jnp.float32)  # (tm, H)

    subj_ref[...] = jnp.concatenate([subj_hh, c1], axis=1)   # (tm, 320)
    obj_ref[...] = jnp.concatenate([gf, obj_hb], axis=1)     # (tm, 320)


def roi_pack(x_f32, wsub_bf16, bsub, wih_bf16, bih, whh_f, wout_bot, *, tm):
    """x: (M, 4096) f32 -> subj_pack (M, 320) f32, obj_pack (M, 320) f32."""
    M, K = x_f32.shape
    F = wsub_bf16.shape[1]          # 256
    G = wih_bf16.shape[1]           # 512
    H = HIDDEN
    assert M % tm == 0
    return pl.pallas_call(
        _roi_pack_kernel,
        out_shape=(jax.ShapeDtypeStruct((M, PACK), jnp.float32),
                   jax.ShapeDtypeStruct((M, PACK), jnp.float32)),
        grid_spec=pltpu.PrefetchScalarGridSpec(
            num_scalar_prefetch=0,
            grid=(M // tm,),                       # single M axis; weights resident
            in_specs=[
                pl.BlockSpec((tm, K), lambda i: (i, 0)),      # x (f32, full K)
                pl.BlockSpec((K, F), lambda i: (0, 0)),       # W_sub (bf16, resident)
                pl.BlockSpec((1, F), lambda i: (0, 0)),       # b_sub
                pl.BlockSpec((F, G), lambda i: (0, 0)),       # W_ih fwd|bwd (bf16)
                pl.BlockSpec((1, G), lambda i: (0, 0)),       # b_ih+b_hh fwd|bwd
                pl.BlockSpec((H, 4 * H), lambda i: (0, 0)),   # W_hh fwd (f32)
                pl.BlockSpec((H, H), lambda i: (0, 0)),       # lstm_out W (bwd half)
            ],
            out_specs=(pl.BlockSpec((tm, PACK), lambda i: (i, 0)),
                       pl.BlockSpec((tm, PACK), lambda i: (i, 0))),
        ),
        compiler_params=pltpu.CompilerParams(
            dimension_semantics=("parallel",)),
    )(x_f32, wsub_bf16, bsub, wih_bf16, bih, whh_f, wout_bot)


# ---------------------------------------------------------------------------
# Kernel 2: per-pair scoring.  Per-batch packs are VMEM resident; subject and
# object rows are gathered in-kernel (one-hot matmul driven by the static pair
# index table), then only the second LSTM cell + lstm_out top-half + cosine
# remain per pair.  Output is a lane-dense (1, tm) score row per grid step.
# ---------------------------------------------------------------------------
def _pair_score_kernel(idx_ref, subj_pack_ref, obj_pack_ref, nlp_ref,
                       wout_top_ref, bout_ref, score_ref):
    H = HIDDEN
    idx = idx_ref[...]                                  # (tm, 2) int32
    tm = idx.shape[0]
    spack = subj_pack_ref[0]                            # (N, 320) f32, resident
    opack = obj_pack_ref[0]
    n = spack.shape[0]

    # in-kernel gather via one-hot matmuls (no duplicated projections in HBM)
    iota = lax.broadcasted_iota(jnp.int32, (tm, n), 1)
    onehot_s = (iota == idx[:, 0:1]).astype(jnp.float32)      # (tm, N)
    onehot_o = (iota == idx[:, 1:2]).astype(jnp.float32)
    rows_s = jnp.dot(onehot_s, spack, preferred_element_type=jnp.float32)  # (tm, 320)
    rows_o = jnp.dot(onehot_o, opack, preferred_element_type=jnp.float32)

    subj_hh = rows_s[:, 0:4 * H]          # h1 @ W_hh           (subject)
    c1 = rows_s[:, 4 * H:4 * H + H]       # c1                  (subject)
    gf_obj = rows_o[:, 0:4 * H]           # x@W_ih_f + biases   (object)
    obj_hb = rows_o[:, 4 * H:4 * H + H]   # h1b @ W_out_bot     (object)

    # second forward LSTM cell (the only per-pair cell), gates [i, f, o, g]
    g1 = gf_obj + subj_hh
    sig = jax.nn.sigmoid(g1[:, :3 * H])
    i_g = sig[:, 0:H]
    f_g = sig[:, H:2 * H]
    o_g = sig[:, 2 * H:3 * H]
    g_g = jnp.tanh(g1[:, 3 * H:4 * H])
    c2 = f_g * c1 + i_g * g_g
    h2 = o_g * jnp.tanh(c2)

    # lstm_out(concat(h2, h1b)) == h2 @ W_top + (h1b @ W_bot) + b
    sel = (jnp.dot(h2, wout_top_ref[...], preferred_element_type=jnp.float32)
           + obj_hb + bout_ref[...])                           # (tm, H)

    # cosine tail, lane-dense: both reductions produced as (1, tm) rows (MXU).
    nlp = nlp_ref[...]                                         # (1, H) unit-norm
    dotp = lax.dot_general(nlp, sel, (((1,), (1,)), ((), ())),
                           preferred_element_type=jnp.float32)  # (1, tm)
    ones = jnp.ones((1, H), jnp.float32)
    nsq = lax.dot_general(ones, sel * sel, (((1,), (1,)), ((), ())),
                          preferred_element_type=jnp.float32)   # (1, tm)
    # clamp each norm at eps: max(sqrt(x), eps) == sqrt(max(x, eps^2))
    score_ref[...] = dotp * lax.rsqrt(jnp.maximum(nsq, EPS * EPS))


def pair_scores(pair_idx, subj_pack, obj_pack, nlp_unit, w_out_top, b_out,
                *, tm, tiles_per_batch):
    B, N, PK = subj_pack.shape
    H = HIDDEN
    n_tiles = B * tiles_per_batch
    return pl.pallas_call(
        _pair_score_kernel,
        out_shape=jax.ShapeDtypeStruct((n_tiles, tm), jnp.float32),
        grid_spec=pltpu.PrefetchScalarGridSpec(
            num_scalar_prefetch=0,
            grid=(n_tiles,),
            in_specs=[
                pl.BlockSpec((tm, 2), lambda i: (i % tiles_per_batch, 0)),       # pairs
                pl.BlockSpec((1, N, PK), lambda i: (i // tiles_per_batch, 0, 0)),  # subj pack
                pl.BlockSpec((1, N, PK), lambda i: (i // tiles_per_batch, 0, 0)),  # obj pack
                pl.BlockSpec((1, H), lambda i: (i // tiles_per_batch, 0)),       # nlp (unit)
                pl.BlockSpec((H, H), lambda i: (0, 0)),                          # W_out top
                pl.BlockSpec((1, H), lambda i: (0, 0)),                          # b_out
            ],
            out_specs=pl.BlockSpec((1, tm), lambda i: (i, 0)),                   # lane-dense
        ),
        compiler_params=pltpu.CompilerParams(
            dimension_semantics=("parallel",)),
    )(pair_idx, subj_pack, obj_pack, nlp_unit, w_out_top, b_out)


# ---------------------------------------------------------------------------
# Parameter initialization (PyTorch-default-like), then kernel-friendly layout.
# bf16 copies of the big matmul weights are stored once here (no per-call casts).
# ---------------------------------------------------------------------------
def init_params(key):
    H = HIDDEN
    ks = jax.random.split(key, 11)

    def u(k, shape, fan_in):
        bound = 1.0 / np.sqrt(fan_in)
        return jax.random.uniform(k, shape, jnp.float32, -bound, bound)

    # PyTorch-style parameters (stored transposed for x @ W), gate order [i,f,g,o]
    sub_w = u(ks[0], (ROI_FEAT_DIM, SUB_FEAT), ROI_FEAT_DIM)
    sub_b = u(ks[1], (1, SUB_FEAT), ROI_FEAT_DIM)
    w_ih_f = u(ks[2], (SUB_FEAT, 4 * H), H)
    w_hh_f = u(ks[3], (H, 4 * H), H)
    b_ih_f = u(ks[4], (1, 4 * H), H)          # b_ih and b_hh sampled separately
    b_hh_f = u(ks[5], (1, 4 * H), H)          # (matches PyTorch init variance)
    w_ih_b = u(ks[6], (SUB_FEAT, 4 * H), H)
    b_ih_b = u(ks[7], (1, 4 * H), H)
    b_hh_b = u(ks[8], (1, 4 * H), H)
    # weight_hh_reverse never influences outputs[-1] (its first step has h0=0) -> omitted.
    out_w = u(ks[9], (2 * H, H), 2 * H)
    out_b = u(ks[10], (1, H), 2 * H)
    # self.select_NN is defined in __init__ but never used in forward -> omitted.

    # Permute gate columns [i,f,g,o] -> [i,f,o,g] (fuses the 3 sigmoids in-kernel)
    perm = np.concatenate([np.arange(0, 2 * H),
                           np.arange(3 * H, 4 * H),
                           np.arange(2 * H, 3 * H)])
    b_f = (b_ih_f + b_hh_f)[:, perm]
    b_b = (b_ih_b + b_hh_b)[:, perm]
    return {
        'sub_feat_w_bf16': sub_w.astype(jnp.bfloat16),
        'sub_feat_b': sub_b,
        'w_ih_cat_bf16': jnp.concatenate([w_ih_f[:, perm], w_ih_b[:, perm]],
                                         axis=1).astype(jnp.bfloat16),
        'b_ih_cat': jnp.concatenate([b_f, b_b], axis=1),
        'w_hh_f': w_hh_f[:, perm],
        'w_out_top': out_w[0:H, :],          # multiplies the forward hidden
        'w_out_bot': out_w[H:2 * H, :],      # multiplies the backward hidden
        'lstm_out_b': out_b,
    }


# ---------------------------------------------------------------------------
# Forward pass (glue in plain JAX around the two Pallas kernels)
# ---------------------------------------------------------------------------
def proposal_layer_forward(rois, im_info, roi_feat, nlp_features, params,
                           *, tm_rows=128, tm_pairs=256):
    B, N, D = roi_feat.shape
    assert D == ROI_FEAT_DIM
    H = HIDDEN

    # ---- kernel 1: per-ROI fused projection + hoisted per-ROI LSTM work
    M = B * N
    tm = min(tm_rows, _round_up(M, 16))
    # prefer >= 2 grid steps on the parallel axis (v7x megacore) when M allows
    while tm > 16 and _round_up(M, tm) // tm < 2:
        tm = _round_up(tm // 2, 16)
    M_pad = _round_up(M, tm)
    x = roi_feat.reshape(M, D)
    if M_pad > M:
        x = jnp.pad(x, ((0, M_pad - M), (0, 0)))
    subj_pack, obj_pack = roi_pack(
        x, params['sub_feat_w_bf16'], params['sub_feat_b'],
        params['w_ih_cat_bf16'], params['b_ih_cat'],
        params['w_hh_f'], params['w_out_bot'], tm=tm)
    subj_pack = subj_pack[:M].reshape(B, N, PACK)
    obj_pack = obj_pack[:M].reshape(B, N, PACK)

    # ---- all ordered (subject, object) pairs with subject != object (same order
    #      as the meshgrid + _filter_diag path in the PyTorch module).  Static.
    ii, jj = np.meshgrid(np.arange(N), np.arange(N), indexing='ij')
    pairs_np = np.stack([ii.ravel(), jj.ravel()], axis=1)
    pairs_np = pairs_np[pairs_np[:, 0] != pairs_np[:, 1]].astype(np.int32)  # (P,2)
    P = pairs_np.shape[0]

    tm_p = min(tm_pairs, _round_up(P, 128))            # lane-dense, bounded tiles
    P_pad = _round_up(P, tm_p)
    pairs_pad_np = np.zeros((P_pad, 2), np.int32)      # padded pairs -> scores sliced off
    pairs_pad_np[:P] = pairs_np
    pair_idx = jnp.asarray(pairs_pad_np)               # (P_pad, 2), shared by all batches
    pairs = jnp.asarray(pairs_np)

    # per-batch unit nlp vector (its norm-clamp of the cosine folded in here)
    nlp_norm = jnp.sqrt(jnp.sum(nlp_features * nlp_features, axis=1, keepdims=True))
    nlp_unit = nlp_features / jnp.maximum(nlp_norm, EPS)

    # ---- kernel 2: per-pair second LSTM cell + lstm_out + cosine similarity
    scores = pair_scores(pair_idx, subj_pack, obj_pack, nlp_unit,
                         params['w_out_top'], params['lstm_out_b'],
                         tm=tm_p, tiles_per_batch=P_pad // tm_p)
    scores = scores.reshape(B, P_pad)[:, :P]

    # ---- torch.sort(scores, 1, True): descending order per batch
    order = jnp.argsort(-scores, axis=1)

    # pre_nms_topN (cfg default 12000) >= numel -> keep all; post_nms_topN is
    # overwritten to proposals.size(1) = P in the reference forward.
    # TODO(synk): nms() over 8-dim relation boxes is a data-dependent sequential
    # suppression with no clean Pallas equivalent; keep set left as identity.
    proposals_sorted = pairs[order]                                  # (B, P, 2)
    scores_sorted = jnp.take_along_axis(scores, order, axis=1)[..., None]

    batch_ar = jnp.arange(B)[:, None]
    subj_boxes = rois[batch_ar, proposals_sorted[:, :, 0], 1:5]      # (B, P, 4)
    obj_boxes = rois[batch_ar, proposals_sorted[:, :, 1], 1:5]       # (B, P, 4)

    batch_col = jnp.broadcast_to(
        jnp.arange(B, dtype=jnp.float32)[:, None, None], (B, P, 1))
    output = jnp.concatenate([batch_col, subj_boxes, obj_boxes], axis=2)  # (B,P,9)
    output_score = scores_sorted                                     # (B, P, 1)
    output_proposals = proposals_sorted                              # (B, P, 2)
    return output, output_proposals, output_score


# ---------------------------------------------------------------------------
if __name__ == "__main__":
    key = jax.random.PRNGKey(0)
    k_par, k_xy, k_wh, k_feat, k_nlp = jax.random.split(key, 5)

    B, N = 2, 8
    params = init_params(k_par)

    # rois: (B, N, 5) = (batch_idx, x1, y1, x2, y2)
    xy1 = jax.random.uniform(k_xy, (B, N, 2), jnp.float32, 0.0, 300.0)
    wh = jax.random.uniform(k_wh, (B, N, 2), jnp.float32, 16.0, 200.0)
    batch_col = jnp.broadcast_to(
        jnp.arange(B, dtype=jnp.float32)[:, None, None], (B, N, 1))
    rois = jnp.concatenate([batch_col, xy1, xy1 + wh], axis=2)

    im_info = jnp.array([[600.0, 800.0, 1.0]] * B, jnp.float32)      # (B, 3)
    roi_feat = jax.random.normal(k_feat, (B, N, ROI_FEAT_DIM), jnp.float32)
    nlp_features = jax.random.normal(k_nlp, (B, HIDDEN), jnp.float32)

    out, out_props, out_scores = proposal_layer_forward(
        rois, im_info, roi_feat, nlp_features, params)
    jax.block_until_ready((out, out_props, out_scores))
    print("KERNEL_OK")
</pallas_src>

<mosaic_0001>
module attributes {stable_mosaic.version = 11 : i64} {
  func.func @_roi_pack_kernel(%arg0: i32, %arg1: memref<16x4096xf32, #tpu.memory_space<vmem>>, %arg2: memref<4096x256xbf16, #tpu.memory_space<vmem>>, %arg3: memref<1x256xf32, #tpu.memory_space<vmem>>, %arg4: memref<256x512xbf16, #tpu.memory_space<vmem>>, %arg5: memref<1x512xf32, #tpu.memory_space<vmem>>, %arg6: memref<64x256xf32, #tpu.memory_space<vmem>>, %arg7: memref<64x64xf32, #tpu.memory_space<vmem>>, %arg8: memref<16x320xf32, #tpu.memory_space<vmem>>, %arg9: memref<16x320xf32, #tpu.memory_space<vmem>>) attributes {dimension_semantics = [#tpu.dimension_semantics<parallel>], iteration_bounds = array<i64: 1>, scalar_prefetch = 0 : i64, scratch_operands = 0 : i64, tpu.core_type = #tpu.core_type<tc>, window_params = [{transform_indices = @transform_0, window_bounds = array<i64: 16, 4096>}, {pipeline_mode = #tpu.pipeline_mode<synchronous>, transform_indices = @transform_1, window_bounds = array<i64: 4096, 256>}, {pipeline_mode = #tpu.pipeline_mode<synchronous>, transform_indices = @transform_2, window_bounds = array<i64: 1, 256>}, {pipeline_mode = #tpu.pipeline_mode<synchronous>, transform_indices = @transform_3, window_bounds = array<i64: 256, 512>}, {pipeline_mode = #tpu.pipeline_mode<synchronous>, transform_indices = @transform_4, window_bounds = array<i64: 1, 512>}, {pipeline_mode = #tpu.pipeline_mode<synchronous>, transform_indices = @transform_5, window_bounds = array<i64: 64, 256>}, {pipeline_mode = #tpu.pipeline_mode<synchronous>, transform_indices = @transform_6, window_bounds = array<i64: 64, 64>}, {transform_indices = @transform_7, window_bounds = array<i64: 16, 320>}, {transform_indices = @transform_8, window_bounds = array<i64: 16, 320>}]} {
    %c0 = arith.constant 0 : index
    %c0_0 = arith.constant 0 : index
    %0 = vector.load %arg1[%c0, %c0_0] : memref<16x4096xf32, #tpu.memory_space<vmem>>, vector<16x4096xf32>
    %1 = arith.truncf %0 : vector<16x4096xf32> to vector<16x4096xbf16>
    %c0_1 = arith.constant 0 : index
    %c0_2 = arith.constant 0 : index
    %2 = vector.load %arg2[%c0_1, %c0_2] : memref<4096x256xbf16, #tpu.memory_space<vmem>>, vector<4096x256xbf16>
    %cst = arith.constant dense<0.000000e+00> : vector<16x256xf32>
    %3 = tpu.matmul %1, %2, %cst {dimension_numbers = #tpu.dot_dimension_numbers<[1], [0], [0], [1], [0, 0, 1, 1], [], []>} : vector<16x4096xbf16>, vector<4096x256xbf16>, vector<16x256xf32> -> vector<16x256xf32>
    %c0_3 = arith.constant 0 : index
    %c0_4 = arith.constant 0 : index
    %4 = vector.load %arg3[%c0_3, %c0_4] : memref<1x256xf32, #tpu.memory_space<vmem>>, vector<1x256xf32>
    %5 = vector.broadcast %4 : vector<1x256xf32> to vector<16x256xf32>
    %6 = arith.addf %3, %5 : vector<16x256xf32>
    %7 = arith.truncf %6 : vector<16x256xf32> to vector<16x256xbf16>
    %c0_5 = arith.constant 0 : index
    %c0_6 = arith.constant 0 : index
    %8 = vector.load %arg4[%c0_5, %c0_6] : memref<256x512xbf16, #tpu.memory_space<vmem>>, vector<256x512xbf16>
    %cst_7 = arith.constant dense<0.000000e+00> : vector<16x512xf32>
    %9 = tpu.matmul %7, %8, %cst_7 {dimension_numbers = #tpu.dot_dimension_numbers<[1], [0], [0], [1], [0, 0, 1, 1], [], []>} : vector<16x256xbf16>, vector<256x512xbf16>, vector<16x512xf32> -> vector<16x512xf32>
    %c0_8 = arith.constant 0 : index
    %c0_9 = arith.constant 0 : index
    %10 = vector.load %arg5[%c0_8, %c0_9] : memref<1x512xf32, #tpu.memory_space<vmem>>, vector<1x512xf32>
    %11 = vector.broadcast %10 : vector<1x512xf32> to vector<16x512xf32>
    %12 = arith.addf %9, %11 : vector<16x512xf32>
    %13 = vector.extract_strided_slice %12 {offsets = [0, 0], sizes = [16, 256], strides = [1, 1]} : vector<16x512xf32> to vector<16x256xf32>
    %14 = vector.extract_strided_slice %12 {offsets = [0, 256], sizes = [16, 256], strides = [1, 1]} : vector<16x512xf32> to vector<16x256xf32>
    %15 = vector.extract_strided_slice %13 {offsets = [0, 0], sizes = [16, 192], strides = [1, 1]} : vector<16x256xf32> to vector<16x192xf32>
    %16 = arith.negf %15 : vector<16x192xf32>
    %17 = math.exp %16 : vector<16x192xf32>
    %cst_10 = arith.constant 1.000000e+00 : f32
    %18 = vector.broadcast %cst_10 : f32 to vector<16x192xf32>
    %19 = arith.addf %18, %17 : vector<16x192xf32>
    %20 = arith.divf %18, %19 : vector<16x192xf32>
    %21 = vector.extract_strided_slice %20 {offsets = [0, 0], sizes = [16, 64], strides = [1, 1]} : vector<16x192xf32> to vector<16x64xf32>
    %22 = vector.extract_strided_slice %20 {offsets = [0, 128], sizes = [16, 64], strides = [1, 1]} : vector<16x192xf32> to vector<16x64xf32>
    %23 = vector.extract_strided_slice %13 {offsets = [0, 192], sizes = [16, 64], strides = [1, 1]} : vector<16x256xf32> to vector<16x64xf32>
    %24 = math.tanh %23 : vector<16x64xf32>
    %25 = arith.mulf %21, %24 : vector<16x64xf32>
    %26 = math.tanh %25 : vector<16x64xf32>
    %27 = arith.mulf %22, %26 : vector<16x64xf32>
    %c0_11 = arith.constant 0 : index
    %c0_12 = arith.constant 0 : index
    %28 = vector.load %arg6[%c0_11, %c0_12] : memref<64x256xf32, #tpu.memory_space<vmem>>, vector<64x256xf32>
    %cst_13 = arith.constant dense<0.000000e+00> : vector<16x256xf32>
    %29 = tpu.matmul %27, %28, %cst_13 {dimension_numbers = #tpu.dot_dimension_numbers<[1], [0], [0], [1], [0, 0, 1, 1], [], []>} : vector<16x64xf32>, vector<64x256xf32>, vector<16x256xf32> -> vector<16x256xf32>
    %30 = vector.extract_strided_slice %14 {offsets = [0, 0], sizes = [16, 192], strides = [1, 1]} : vector<16x256xf32> to vector<16x192xf32>
    %31 = arith.negf %30 : vector<16x192xf32>
    %32 = math.exp %31 : vector<16x192xf32>
    %cst_14 = arith.constant 1.000000e+00 : f32
    %33 = vector.broadcast %cst_14 : f32 to vector<16x192xf32>
    %34 = arith.addf %33, %32 : vector<16x192xf32>
    %35 = arith.divf %33, %34 : vector<16x192xf32>
    %36 = vector.extract_strided_slice %35 {offsets = [0, 0], sizes = [16, 64], strides = [1, 1]} : vector<16x192xf32> to vector<16x64xf32>
    %37 = vector.extract_strided_slice %35 {offsets = [0, 128], sizes = [16, 64], strides = [1, 1]} : vector<16x192xf32> to vector<16x64xf32>
    %38 = vector.extract_strided_slice %14 {offsets = [0, 192], sizes = [16, 64], strides = [1, 1]} : vector<16x256xf32> to vector<16x64xf32>
    %39 = math.tanh %38 : vector<16x64xf32>
    %40 = arith.mulf %36, %39 : vector<16x64xf32>
    %41 = math.tanh %40 : vector<16x64xf32>
    %42 = arith.mulf %37, %41 : vector<16x64xf32>
    %c0_15 = arith.constant 0 : index
    %c0_16 = arith.constant 0 : index
    %43 = vector.load %arg7[%c0_15, %c0_16] : memref<64x64xf32, #tpu.memory_space<vmem>>, vector<64x64xf32>
    %cst_17 = arith.constant dense<0.000000e+00> : vector<16x64xf32>
    %44 = tpu.matmul %42, %43, %cst_17 {dimension_numbers = #tpu.dot_dimension_numbers<[1], [0], [0], [1], [0, 0, 1, 1], [], []>} : vector<16x64xf32>, vector<64x64xf32>, vector<16x64xf32> -> vector<16x64xf32>
    %45 = tpu.concatenate %29, %25 in 1 : vector<16x256xf32>, vector<16x64xf32> -> vector<16x320xf32>
    %c0_18 = arith.constant 0 : index
    %c0_19 = arith.constant 0 : index
    %46 = vector.load %arg8[%c0_18, %c0_19] : memref<16x320xf32, #tpu.memory_space<vmem>>, vector<16x320xf32>
    tpu.vector_store %arg8[%c0_18, %c0_19], %45 {strides = array<i32>} : memref<16x320xf32, #tpu.memory_space<vmem>>, vector<16x320xf32>,
    %47 = tpu.concatenate %13, %44 in 1 : vector<16x256xf32>, vector<16x64xf32> -> vector<16x320xf32>
    %c0_20 = arith.constant 0 : index
    %c0_21 = arith.constant 0 : index
    %48 = vector.load %arg9[%c0_20, %c0_21] : memref<16x320xf32, #tpu.memory_space<vmem>>, vector<16x320xf32>
    tpu.vector_store %arg9[%c0_20, %c0_21], %47 {strides = array<i32>} : memref<16x320xf32, #tpu.memory_space<vmem>>, vector<16x320xf32>,
    return
  }
  func.func @transform_0(%arg0: i32) -> (i32, i32) {
    %c0_i32 = arith.constant 0 : i32
    %c0_i32_0 = arith.constant 0 : i32
    return %arg0, %c0_i32 : i32, i32
  }
  func.func @transform_1(%arg0: i32) -> (i32, i32) {
    %c0_i32 = arith.constant 0 : i32
    %c0_i32_0 = arith.constant 0 : i32
    %c0_i32_1 = arith.constant 0 : i32
    return %c0_i32, %c0_i32_0 : i32, i32
  }
  func.func @transform_2(%arg0: i32) -> (i32, i32) {
    %c0_i32 = arith.constant 0 : i32
    %c0_i32_0 = arith.constant 0 : i32
    %c0_i32_1 = arith.constant 0 : i32
    return %c0_i32, %c0_i32_0 : i32, i32
  }
  func.func @transform_3(%arg0: i32) -> (i32, i32) {
    %c0_i32 = arith.constant 0 : i32
    %c0_i32_0 = arith.constant 0 : i32
    %c0_i32_1 = arith.constant 0 : i32
    return %c0_i32, %c0_i32_0 : i32, i32
  }
  func.func @transform_4(%arg0: i32) -> (i32, i32) {
    %c0_i32 = arith.constant 0 : i32
    %c0_i32_0 = arith.constant 0 : i32
    %c0_i32_1 = arith.constant 0 : i32
    return %c0_i32, %c0_i32_0 : i32, i32
  }
  func.func @transform_5(%arg0: i32) -> (i32, i32) {
    %c0_i32 = arith.constant 0 : i32
    %c0_i32_0 = arith.constant 0 : i32
    %c0_i32_1 = arith.constant 0 : i32
    return %c0_i32, %c0_i32_0 : i32, i32
  }
  func.func @transform_6(%arg0: i32) -> (i32, i32) {
    %c0_i32 = arith.constant 0 : i32
    %c0_i32_0 = arith.constant 0 : i32
    %c0_i32_1 = arith.constant 0 : i32
    return %c0_i32, %c0_i32_0 : i32, i32
  }
  func.func @transform_7(%arg0: i32) -> (i32, i32) {
    %c0_i32 = arith.constant 0 : i32
    %c0_i32_0 = arith.constant 0 : i32
    return %arg0, %c0_i32 : i32, i32
  }
  func.func @transform_8(%arg0: i32) -> (i32, i32) {
    %c0_i32 = arith.constant 0 : i32
    %c0_i32_0 = arith.constant 0 : i32
    return %arg0, %c0_i32 : i32, i32
  }
}

</mosaic_0001>

<bundles_post_ra>
// kernel: tpu_custom_call.1
= control target key start
LH: loop header
LB: loop body
LE: loop exit
PB: predicated region body
PF: predicated region fallthrough
CT: control target
= control target key end

     0   :  { %14 = vsyncpa [#allocation3], 0  ;;  %s6905_s0 = inlined_call_operand.hbm [shape: f32[16,4096], index: 0, kind: input, shape index: {}]   ;;  %s6906_s1 = inlined_call_operand.hbm [shape: bf16[4096,256], index: 1, kind: input, shape index: {}]   ;;  %s6907_s2 = inlined_call_operand.hbm [shape: f32[1,256], index: 2, kind: input, shape index: {}]   ;;  %s6908_s3 = inlined_call_operand.hbm [shape: bf16[256,512], index: 3, kind: input, shape index: {}]   ;;  %s6909_s4 = inlined_call_operand.hbm [shape: f32[1,512], index: 4, kind: input, shape index: {}]   ;;  %s6910_s5 = inlined_call_operand.hbm [shape: f32[64,256], index: 5, kind: input, shape index: {}]   ;;  %s6911_s6 = inlined_call_operand.hbm [shape: f32[64,64], index: 6, kind: input, shape index: {}]   ;;  %s6912_s7 = inlined_call_operand.hbm [shape: f32[16,320], index: 7, kind: output, shape index: {0}]   ;;  %s6913_s8 = inlined_call_operand.hbm [shape: f32[16,320], index: 8, kind: output, shape index: {1}]  }
   0x1   :  { %15 = vsyncpa [#allocation6], 0 }
   0x2   :  { %16 = vsyncpa [#allocation9], 0 }
   0x3   :  { %17 = vsyncpa [#allocation12], 0 }
   0x4   :  { %18 = vsyncpa [#allocation4], 0 }
   0x5   :  { %19 = vsyncpa [#allocation16], 0  ;;  %s6653_s27 = smov [#allocation5]   ;;  %s6443_s9 = scalar_lea.hbm %s6906_s1, 65536 }
   0x6   :  { %s37_s28 = sshll.u32 %s6653_s27, 4  ;;  %p6444_p0 = scmp.ne.s32.totalorder %s6906_s1, %s6443_s9  ;;  %s38_s28 = int_to_ptr.vmem [resolvable:$true] %s37_s28 }
   0x7   :  { %p6447_p1 = scmp.lt.u32.totalorder %s6443_s9, %s6906_s1 }
   0x9   :  { %p6449_p2 = pnand %p6447_p1, %p6444_p0 }
   0xb   :  { %6452 = shalt.err (!%p6449_p2)
}
   0xc   :  { %s6453_s14 = scalar_lea.vmem %s38_s28, 65536  ;;  %p6458_p4 = scmp.lt.s32.totalorder %s38_s28, %s38_s28 }
   0xd   :  { %p6454_p3 = scmp.ne.s32.totalorder %s38_s28, %s6453_s14  ;;  %p6459_p5 = scmp.lt.s32.totalorder %s6453_s14, %s6453_s14 }
   0xf   :  { %p6460_p6 = por %p6459_p5, %p6458_p4 }
  0x11   :  { %p6461_p7 = pnand %p6460_p6, %p6454_p3 }
  0x13   :  { %6464 = shalt.err (!%p6461_p7)
}
  0x14   :  { %s6654_s15 = smov 128   ;;  %s6655_s16 = smov 8  }
  0x15   :  { %43 = dma.hbm_to_vmem [thread:$0]  %s6906_s1, 65536, %s38_s28, [#allocation6], %s6654_s15, %s6654_s15, %s6655_s16  }
  0x16   :  { %s6656_s19 = smov [#allocation8]   ;;  %s6657_s21 = smov [#allocation11]  }
  0x17   :  { %s59_s20 = sshll.u32 %s6656_s19, 4  ;;  %s81_s22 = sshll.u32 %s6657_s21, 4  ;;  %s60_s20 = int_to_ptr.vmem [resolvable:$true] %s59_s20  ;;  %s82_s22 = int_to_ptr.vmem [resolvable:$true] %s81_s22 }
  0x18   :  { %s6465_s25 = scalar_lea.hbm %s6908_s3, 8192 }
  0x19   :  { %p6466_p8 = scmp.ne.s32.totalorder %s6908_s3, %s6465_s25  ;;  %p6469_p9 = scmp.lt.u32.totalorder %s6465_s25, %s6908_s3 }
  0x1b   :  { %p6471_p10 = pnand %p6469_p9, %p6466_p8 }
  0x1d   :  { %6474 = shalt.err (!%p6471_p10)
}
  0x1e   :  { %s6475_s1 = scalar_lea.vmem %s60_s20, 8192  ;;  %p6480_p12 = scmp.lt.s32.totalorder %s60_s20, %s60_s20 }
  0x1f   :  { %p6476_p11 = scmp.ne.s32.totalorder %s60_s20, %s6475_s1  ;;  %p6481_p13 = scmp.lt.s32.totalorder %s6475_s1, %s6475_s1 }
  0x21   :  { %p6482_p0 = por %p6481_p13, %p6480_p12 }
  0x23   :  { %p6483_p1 = pnand %p6482_p0, %p6476_p11 }
  0x25   :  { %6486 = shalt.err (!%p6483_p1)
}
  0x26   :  { %s6658_s28 = smov 256   ;;  %s6659_s9 = smov 16  }
  0x27   :  { %65 = dma.hbm_to_vmem [thread:$0]  %s6908_s3, 8192, %s60_s20, [#allocation9], %s6658_s28, %s6658_s28, %s6659_s9  }
  0x28   :  { %s6487_s14 = scalar_lea.hbm %s6910_s5, 2048 }
  0x29   :  { %p6488_p2 = scmp.ne.s32.totalorder %s6910_s5, %s6487_s14  ;;  %p6491_p3 = scmp.lt.u32.totalorder %s6487_s14, %s6910_s5 }
  0x2b   :  { %p6493_p4 = pnand %p6491_p3, %p6488_p2 }
  0x2d   :  { %6496 = shalt.err (!%p6493_p4)
}
  0x2e   :  { %s6497_s23 = scalar_lea.vmem %s82_s22, 2048  ;;  %p6502_p6 = scmp.lt.s32.totalorder %s82_s22, %s82_s22 }
  0x2f   :  { %p6498_p5 = scmp.ne.s32.totalorder %s82_s22, %s6497_s23  ;;  %p6503_p7 = scmp.lt.s32.totalorder %s6497_s23, %s6497_s23 }
  0x31   :  { %p6504_p8 = por %p6503_p7, %p6502_p6 }
  0x33   :  { %p6505_p9 = pnand %p6504_p8, %p6498_p5 }
  0x35   :  { %6508 = shalt.err (!%p6505_p9)
}
  0x36   :  { %87 = dma.hbm_to_vmem [thread:$0]  %s6910_s5, 2048, %s82_s22, [#allocation12], %s6658_s28, %s6658_s28, %s6659_s9  }
  0x37   :  { %s6660_s24 = smov [#allocation2]   ;;  %s6509_s29 = scalar_lea.hbm %s6905_s0, 8192 }
  0x38   :  { %s25_s25 = sshll.u32 %s6660_s24, 4  ;;  %p6510_p10 = scmp.ne.s32.totalorder %s6905_s0, %s6509_s29  ;;  %s26_s25 = int_to_ptr.vmem [resolvable:$true] %s25_s25 }
  0x39   :  { %p6513_p11 = scmp.lt.u32.totalorder %s6509_s29, %s6905_s0 }
  0x3b   :  { %p6515_p12 = pnand %p6513_p11, %p6510_p10 }
  0x3d   :  { %6518 = shalt.err (!%p6515_p12)
}
  0x3e   :  { %s6519_s12 = scalar_lea.vmem %s26_s25, 8192  ;;  %p6524_p0 = scmp.lt.s32.totalorder %s26_s25, %s26_s25 }
  0x3f   :  { %p6520_p13 = scmp.ne.s32.totalorder %s26_s25, %s6519_s12  ;;  %p6525_p1 = scmp.lt.s32.totalorder %s6519_s12, %s6519_s12 }
  0x41   :  { %p6526_p2 = por %p6525_p1, %p6524_p0 }
  0x43   :  { %p6527_p3 = pnand %p6526_p2, %p6520_p13 }
  0x45   :  { %6530 = shalt.err (!%p6527_p3)
}
  0x46   :  { %s6661_s5 = smov 4096   ;;  %s6662_s13 = smov [#allocation7]  }
  0x47   :  { %31 = dma.hbm_to_vmem [thread:$0]  %s6905_s0, 8192, %s26_s25, [#allocation3], %s6661_s5, %s6661_s5, %s6658_s28  }
  0x48   :  { %s50_s14 = sshll.u32 %s6662_s13, 4  ;;  %s6663_s17 = smov [#allocation10]   ;;  %s51_s14 = int_to_ptr.vmem [resolvable:$true] %s50_s14 }
  0x49   :  { %s72_s18 = sshll.u32 %s6663_s17, 4  ;;  %s6531_s23 = scalar_lea.hbm %s6907_s2, 32  ;;  %s73_s18 = int_to_ptr.vmem [resolvable:$true] %s72_s18 }
  0x4a   :  { %p6532_p4 = scmp.ne.s32.totalorder %s6907_s2, %s6531_s23  ;;  %p6535_p5 = scmp.lt.u32.totalorder %s6531_s23, %s6907_s2 }
  0x4c   :  { %p6537_p6 = pnand %p6535_p5, %p6532_p4 }
  0x4e   :  { %6540 = shalt.err (!%p6537_p6)
}
  0x4f   :  { %s6541_s0 = scalar_lea.vmem %s51_s14, 32  ;;  %p6546_p8 = scmp.lt.s32.totalorder %s51_s14, %s51_s14 }
  0x50   :  { %p6542_p7 = scmp.ne.s32.totalorder %s51_s14, %s6541_s0  ;;  %p6547_p9 = scmp.lt.s32.totalorder %s6541_s0, %s6541_s0 }
  0x52   :  { %p6548_p10 = por %p6547_p9, %p6546_p8 }
  0x54   :  { %p6549_p11 = pnand %p6548_p10, %p6542_p7 }
  0x56   :  { %6552 = shalt.err (!%p6549_p11)
}
  0x57   :  { %53 = dma.hbm_to_vmem [thread:$0]  %s6907_s2, 32, %s51_s14, [#allocation6]  }
  0x58   :  { %s6553_s30 = scalar_lea.hbm %s6909_s4, 64 }
  0x59   :  { %p6554_p12 = scmp.ne.s32.totalorder %s6909_s4, %s6553_s30  ;;  %p6557_p13 = scmp.lt.u32.totalorder %s6553_s30, %s6909_s4 }
  0x5b   :  { %p6559_p0 = pnand %p6557_p13, %p6554_p12 }
  0x5d   :  { %6562 = shalt.err (!%p6559_p0)
}
  0x5e   :  { %s6563_s5 = scalar_lea.vmem %s73_s18, 64  ;;  %p6568_p2 = scmp.lt.s32.totalorder %s73_s18, %s73_s18 }
  0x5f   :  { %p6564_p1 = scmp.ne.s32.totalorder %s73_s18, %s6563_s5  ;;  %p6569_p3 = scmp.lt.s32.totalorder %s6563_s5, %s6563_s5 }
  0x61   :  { %p6570_p4 = por %p6569_p3, %p6568_p2 }
  0x63   :  { %p6571_p5 = pnand %p6570_p4, %p6564_p1 }
  0x65   :  { %6574 = shalt.err (!%p6571_p5)
}
  0x66   :  { %75 = dma.hbm_to_vmem [thread:$0]  %s6909_s4, 64, %s73_s18, [#allocation9]  }
  0x67   :  { %s6664_s9 = smov [#allocation13]   ;;  %s6575_s19 = scalar_lea.hbm %s6911_s6, 1024 }
  0x68   :  { %s93_s13 = sshll.u32 %s6664_s9, 4  ;;  %p6576_p6 = scmp.ne.s32.totalorder %s6911_s6, %s6575_s19  ;;  %s94_s13 = int_to_ptr.vmem [resolvable:$true] %s93_s13 }
  0x69   :  { %p6579_p7 = scmp.lt.u32.totalorder %s6575_s19, %s6911_s6 }
  0x6b   :  { %p6581_p8 = pnand %p6579_p7, %p6576_p6 }
  0x6d   :  { %6584 = shalt.err (!%p6581_p8)
}
  0x6e   :  { %s6585_s24 = scalar_lea.vmem %s94_s13, 1024  ;;  %p6590_p10 = scmp.lt.s32.totalorder %s94_s13, %s94_s13 }
  0x6f   :  { %p6586_p9 = scmp.ne.s32.totalorder %s94_s13, %s6585_s24  ;;  %p6591_p11 = scmp.lt.s32.totalorder %s6585_s24, %s6585_s24 }
  0x71   :  { %p6592_p12 = por %p6591_p11, %p6590_p10 }
  0x73   :  { %p6593_p13 = pnand %p6592_p12, %p6586_p9 }
  0x75   :  { %6596 = shalt.err (!%p6593_p13)
}
  0x76   :  { %99 = dma.hbm_to_vmem [thread:$0]  %s6911_s6, 1024, %s94_s13, [#allocation12], %s6654_s15, %s6654_s15, %s6655_s16  }
  0x77   :  { %6641 = dma.done.wait [#allocation3], 8192  }
  0x78   :  { %6642 = vsyncadd [#allocation3], 4294959104 }
  0x79   :  { %6643 = dma.done.wait [#allocation6], 65568  }
  0x7a   :  { %6644 = vsyncadd [#allocation6], 4294901728 }
  0x7b   :  { %6645 = dma.done.wait [#allocation9], 8256  }
  0x7c   :  { %6646 = vsyncadd [#allocation9], 4294959040 }
  0x7d   :  { %6647 = dma.done.wait [#allocation12], 3072  }
  0x7e   :  { %6648 = vsyncadd [#allocation12], 4294964224  ;;  %v5531_v0 = vld [vmem:[#allocation5 + $0x4] ss:$8 sps:$4 sm:$0xff]   ;;  %v5535_v2 = vld [vmem:[#allocation5] ss:$8 sps:$4 sm:$0xff]  }
  0x7f   :  { %v5533_v1 = vld [vmem:[#allocation5 + $0x704] ss:$8 sps:$4 sm:$0xff]   ;;  %3301 = vmatprep.subr.bf16.mxu1 %v5531_v0  ;;  %v5536_v3 = vld [vmem:[#allocation5 + $0x700] ss:$8 sps:$4 sm:$0xff]   ;;  %v5537_v4 = vld [vmem:[#allocation5 + $0x14] ss:$8 sps:$4 sm:$0xff]  }
  0x80   :  { %3602 = vmatprep.subr.bf16.mxu0 %v5533_v1  ;;  %3302 = vmatpush1.bf16.msra.mxu1 %v5535_v2  ;;  %v5539_v5 = vld [vmem:[#allocation5 + $0x714] ss:$8 sps:$4 sm:$0xff]   ;;  %v5541_v6 = vld [vmem:[#allocation5 + $0x10] ss:$8 sps:$4 sm:$0xff]   ;;  %v5543_v8 = vld [vmem:[#allocation5 + $0x24] ss:$8 sps:$4 sm:$0xff]  }
  0x81   :  { %3603 = vmatpush1.bf16.msra.mxu0 %v5536_v3  ;;  %3303 = vmatprep.subr.bf16.mxu1 %v5537_v4  ;;  %v5542_v7 = vld [vmem:[#allocation5 + $0x710] ss:$8 sps:$4 sm:$0xff]   ;;  %v5545_v9 = vld [vmem:[#allocation5 + $0x724] ss:$8 sps:$4 sm:$0xff]   ;;  %v5547_v10 = vld [vmem:[#allocation5 + $0x20] ss:$8 sps:$4 sm:$0xff]  }
  0x82   :  { %3604 = vmatprep.subr.bf16.mxu0 %v5539_v5  ;;  %v5548_v11 = vld [vmem:[#allocation5 + $0x720] ss:$8 sps:$4 sm:$0xff]   ;;  %v5549_v12 = vld [vmem:[#allocation5 + $0x34] ss:$8 sps:$4 sm:$0xff]   ;;  %v5553_v14 = vld [vmem:[#allocation5 + $0x30] ss:$8 sps:$4 sm:$0xff]  }
  0x83   :  { %v5551_v13 = vld [vmem:[#allocation5 + $0x734] ss:$8 sps:$4 sm:$0xff]   ;;  %v5554_v15 = vld [vmem:[#allocation5 + $0x730] ss:$8 sps:$4 sm:$0xff]   ;;  %v5555_v16 = vld [vmem:[#allocation5 + $0x44] ss:$8 sps:$4 sm:$0xff]  }
  0x84   :  { %3304 = vmatpush1.bf16.msra.mxu1 %v5541_v6  ;;  %v5557_v17 = vld [vmem:[#allocation5 + $0x744] ss:$8 sps:$4 sm:$0xff]   ;;  %v5559_v18 = vld [vmem:[#allocation5 + $0x40] ss:$8 sps:$4 sm:$0xff]   ;;  %v5561_v20 = vld [vmem:[#allocation5 + $0x54] ss:$8 sps:$4 sm:$0xff]  }
  0x85   :  { %3605 = vmatpush1.bf16.msra.mxu0 %v5542_v7  ;;  %3305 = vmatprep.subr.bf16.mxu1 %v5543_v8  ;;  %v5560_v19 = vld [vmem:[#allocation5 + $0x740] ss:$8 sps:$4 sm:$0xff]   ;;  %v5563_v21 = vld [vmem:[#allocation5 + $0x754] ss:$8 sps:$4 sm:$0xff]   ;;  %v5565_v22 = vld [vmem:[#allocation5 + $0x50] ss:$8 sps:$4 sm:$0xff]  }
  0x86   :  { %3606 = vmatprep.subr.bf16.mxu0 %v5545_v9  ;;  %v5566_v23 = vld [vmem:[#allocation5 + $0x750] ss:$8 sps:$4 sm:$0xff]   ;;  %v5567_v24 = vld [vmem:[#allocation5 + $0x64] ss:$8 sps:$4 sm:$0xff]   ;;  %v5571_v26 = vld [vmem:[#allocation5 + $0x60] ss:$8 sps:$4 sm:$0xff]  }
  0x87   :  { %v5569_v25 = vld [vmem:[#allocation5 + $0x764] ss:$8 sps:$4 sm:$0xff]   ;;  %v5572_v27 = vld [vmem:[#allocation5 + $0x760] ss:$8 sps:$4 sm:$0xff]   ;;  %v5573_v28 = vld [vmem:[#allocation5 + $0x74] ss:$8 sps:$4 sm:$0xff]  }
  0x88   :  { %3306 = vmatpush1.bf16.msra.mxu1 %v5547_v10  ;;  %v5575_v29 = vld [vmem:[#allocation5 + $0x774] ss:$8 sps:$4 sm:$0xff]   ;;  %v5577_v30 = vld [vmem:[#allocation5 + $0x70] ss:$8 sps:$4 sm:$0xff]   ;;  %v5579_v32 = vld [vmem:[#allocation5 + $0x84] ss:$8 sps:$4 sm:$0xff]  }
  0x89   :  { %3607 = vmatpush1.bf16.msra.mxu0 %v5548_v11  ;;  %3307 = vmatprep.subr.bf16.mxu1 %v5549_v12  ;;  %v5578_v31 = vld [vmem:[#allocation5 + $0x770] ss:$8 sps:$4 sm:$0xff]   ;;  %v5581_v33 = vld [vmem:[#allocation5 + $0x784] ss:$8 sps:$4 sm:$0xff]   ;;  %v5583_v34 = vld [vmem:[#allocation5 + $0x80] ss:$8 sps:$4 sm:$0xff]  }
  0x8a   :  { %3608 = vmatprep.subr.bf16.mxu0 %v5551_v13  ;;  %v5584_v35 = vld [vmem:[#allocation5 + $0x780] ss:$8 sps:$4 sm:$0xff]   ;;  %v5585_v36 = vld [vmem:[#allocation5 + $0x94] ss:$8 sps:$4 sm:$0xff]   ;;  %v5589_v38 = vld [vmem:[#allocation5 + $0x90] ss:$8 sps:$4 sm:$0xff]  }
  0x8b   :  { %v5587_v37 = vld [vmem:[#allocation5 + $0x794] ss:$8 sps:$4 sm:$0xff]   ;;  %v5590_v39 = vld [vmem:[#allocation5 + $0x790] ss:$8 sps:$4 sm:$0xff]   ;;  %v5591_v40 = vld [vmem:[#allocation5 + $0xa4] ss:$8 sps:$4 sm:$0xff]  }
  0x8c   :  { %3308 = vmatpush1.bf16.msra.mxu1 %v5553_v14  ;;  %v5593_v41 = vld [vmem:[#allocation5 + $0x7a4] ss:$8 sps:$4 sm:$0xff]   ;;  %v5595_v42 = vld [vmem:[#allocation5 + $0xa0] ss:$8 sps:$4 sm:$0xff]   ;;  %v5597_v44 = vld [vmem:[#allocation5 + $0xb4] ss:$8 sps:$4 sm:$0xff]  }
  0x8d   :  { %3609 = vmatpush1.bf16.msra.mxu0 %v5554_v15  ;;  %3309 = vmatprep.subr.bf16.mxu1 %v5555_v16  ;;  %v5596_v43 = vld [vmem:[#allocation5 + $0x7a0] ss:$8 sps:$4 sm:$0xff]   ;;  %v5599_v45 = vld [vmem:[#allocation5 + $0x7b4] ss:$8 sps:$4 sm:$0xff]   ;;  %v5601_v46 = vld [vmem:[#allocation5 + $0xb0] ss:$8 sps:$4 sm:$0xff]  }
  0x8e   :  { %3610 = vmatprep.subr.bf16.mxu0 %v5557_v17  ;;  %v5602_v47 = vld [vmem:[#allocation5 + $0x7b0] ss:$8 sps:$4 sm:$0xff]   ;;  %v122_v48 = vld [vmem:[#allocation2 + $0x8] sm:$0xff]  ;;  %v5609_v58 = vld [vmem:[#allocation5 + $0xd4] ss:$8 sps:$4 sm:$0xff]   ;;  %s6666_s6 = smov 64  }
  0x8f   :  { %v154_v49 = vld [vmem:[#allocation2 + $0x108] sm:$0xff]  ;;  %v136_v53 = vld [vmem:[#allocation2 + $0x78] sm:$0xff]  ;;  %v121_v6 = vld [vmem:[#allocation2] sm:$0xff]  ;;  %vm4539_vm0 = vcmask 523264   ;;  %s6667_s15 = smov [#allocation14]  }
  0x90   :  { %3310 = vmatpush1.bf16.msra.mxu1 %v5559_v18  ;;  %v5603_v50 = vld [vmem:[#allocation5 + $0xc4] ss:$8 sps:$4 sm:$0xff]   ;;  %v186_v52 = vpack.c.bf16 %v154_v49, %v122_v48  ;;  %v168_v54 = vld [vmem:[#allocation2 + $0x178] sm:$0xff]  ;;  %v5607_v56 = vld [vmem:[#allocation5 + $0xc0] ss:$8 sps:$4 sm:$0xff]   ;;  %s4769_s16 = sshll.u32 %s6667_s15, 4  ;;  %s4770_s16 = int_to_ptr.vmem [resolvable:$true] %s4769_s16 }
  0x91   :  { %3611 = vmatpush1.bf16.msra.mxu0 %v5560_v19  ;;  %3311 = vmatprep.subr.bf16.mxu1 %v5561_v20  ;;  %v5605_v51 = vld [vmem:[#allocation5 + $0x7c4] ss:$8 sps:$4 sm:$0xff]   ;;  %v200_v55 = vpack.c.bf16 %v168_v54, %v136_v53  ;;  %v5608_v57 = vld [vmem:[#allocation5 + $0x7c0] ss:$8 sps:$4 sm:$0xff]   ;;  %v5611_v59 = vld [vmem:[#allocation5 + $0x7d4] ss:$8 sps:$4 sm:$0xff]   ;;  %p6602_p1 = scmp.lt.s32.totalorder %s4770_s16, %s4770_s16 }
  0x92   :  { %3612 = vmatprep.subr.bf16.mxu0 %v5563_v21  ;;  %3333 = vmatprep.mubr.bf16.mxu1 %v186_v52  ;;  %v5613_v60 = vld [vmem:[#allocation5 + $0xd0] ss:$8 sps:$4 sm:$0xff]   ;;  %v5615_v62 = vld [vmem:[#allocation5 + $0xe4] ss:$8 sps:$4 sm:$0xff]   ;;  %v5619_v0 = vld [vmem:[#allocation5 + $0xe0] ss:$8 sps:$4 sm:$0xff]  }
  0x93   :  { %3634 = vmatprep.mubr.bf16.mxu0 %v200_v55  ;;  %v5614_v61 = vld [vmem:[#allocation5 + $0x7d0] ss:$8 sps:$4 sm:$0xff]   ;;  %v5617_v63 = vld [vmem:[#allocation5 + $0x7e4] ss:$8 sps:$4 sm:$0xff]   ;;  %v5620_v1 = vld [vmem:[#allocation5 + $0x7e0] ss:$8 sps:$4 sm:$0xff]  }
  0x94   :  { %3312 = vmatpush1.bf16.msra.mxu1 %v5565_v22  ;;  %v5621_v2 = vld [vmem:[#allocation5 + $0xf4] ss:$8 sps:$4 sm:$0xff]   ;;  %v5625_v4 = vld [vmem:[#allocation5 + $0xf0] ss:$8 sps:$4 sm:$0xff]   ;;  %v5629_v7 = vld [vmem:[#allocation5 + $0x104] ss:$8 sps:$4 sm:$0xff]  }
  0x95   :  { %3613 = vmatpush1.bf16.msra.mxu0 %v5566_v23  ;;  %3313 = vmatprep.subr.bf16.mxu1 %v5567_v24  ;;  %v5623_v3 = vld [vmem:[#allocation5 + $0x7f4] ss:$8 sps:$4 sm:$0xff]   ;;  %v5626_v5 = vld [vmem:[#allocation5 + $0x7f0] ss:$8 sps:$4 sm:$0xff]   ;;  %v153_v8 = vld [vmem:[#allocation2 + $0x100] sm:$0xff]  ;;  %s6597_s26 = scalar_lea.vmem %s4770_s16, 768 }
  0x96   :  { %3614 = vmatprep.subr.bf16.mxu0 %v5569_v25  ;;  %v135_v9 = vld [vmem:[#allocation2 + $0x70] sm:$0xff]  ;;  %v5632_v11 = vld [vmem:[#allocation5 + $0x804] ss:$8 sps:$4 sm:$0xff]   ;;  %v5627_v12 = vld [vmem:[#allocation5 + $0x100] ss:$8 sps:$4 sm:$0xff]   ;;  %v185_v14 = vpack.c.bf16 %v153_v8, %v121_v6  ;;  %p6598_p0 = scmp.ne.s32.totalorder %s4770_s16, %s6597_s26  ;;  %p6603_p2 = scmp.lt.s32.totalorder %s6597_s26, %s6597_s26 }
  0x97   :  { %v167_v10 = vld [vmem:[#allocation2 + $0x170] sm:$0xff]  ;;  %v5630_v13 = vld [vmem:[#allocation5 + $0x800] ss:$8 sps:$4 sm:$0xff]   ;;  %v5641_v20 = vld [vmem:[#allocation5 + $0x124] ss:$8 sps:$4 sm:$0xff]  }
  0x98   :  { %3314 = vmatpush1.bf16.msra.mxu1 %v5571_v26  ;;  %v199_v15 = vpack.c.bf16 %v167_v10, %v135_v9  ;;  %v5635_v16 = vld [vmem:[#allocation5 + $0x114] ss:$8 sps:$4 sm:$0xff]   ;;  %v5633_v18 = vld [vmem:[#allocation5 + $0x110] ss:$8 sps:$4 sm:$0xff]   ;;  %v5644_v21 = vld [vmem:[#allocation5 + $0x824] ss:$8 sps:$4 sm:$0xff]   ;;  %p6604_p3 = por %p6603_p2, %p6602_p1 }
  0x99   :  { %3615 = vmatpush1.bf16.msra.mxu0 %v5572_v27  ;;  %3315 = vmatprep.subr.bf16.mxu1 %v5573_v28  ;;  %v5638_v17 = vld [vmem:[#allocation5 + $0x814] ss:$8 sps:$4 sm:$0xff]   ;;  %v5636_v19 = vld [vmem:[#allocation5 + $0x810] ss:$8 sps:$4 sm:$0xff]   ;;  %v5639_v22 = vld [vmem:[#allocation5 + $0x120] ss:$8 sps:$4 sm:$0xff]  }
  0x9a   :  { %3616 = vmatprep.subr.bf16.mxu0 %v5575_v29  ;;  %v5642_v23 = vld [vmem:[#allocation5 + $0x820] ss:$8 sps:$4 sm:$0xff]   ;;  %v5647_v24 = vld [vmem:[#allocation5 + $0x134] ss:$8 sps:$4 sm:$0xff]   ;;  %v5645_v26 = vld [vmem:[#allocation5 + $0x130] ss:$8 sps:$4 sm:$0xff]   ;;  %p6605_p4 = pnand %p6604_p3, %p6598_p0 }
  0x9b   :  { %v5650_v25 = vld [vmem:[#allocation5 + $0x834] ss:$8 sps:$4 sm:$0xff]   ;;  %v5648_v27 = vld [vmem:[#allocation5 + $0x830] ss:$8 sps:$4 sm:$0xff]   ;;  %v5653_v28 = vld [vmem:[#allocation5 + $0x144] ss:$8 sps:$4 sm:$0xff]  }
  0x9c   :  { %3316 = vmatpush1.bf16.msra.mxu1 %v5577_v30  ;;  %v5656_v29 = vld [vmem:[#allocation5 + $0x844] ss:$8 sps:$4 sm:$0xff]   ;;  %v5651_v30 = vld [vmem:[#allocation5 + $0x140] ss:$8 sps:$4 sm:$0xff]   ;;  %v5669_v48 = vld [vmem:[#allocation5 + $0x170] ss:$8 sps:$4 sm:$0xff]  }
  0x9d   :  { %3617 = vmatpush1.bf16.msra.mxu0 %v5578_v31  ;;  %3317 = vmatprep.subr.bf16.mxu1 %v5579_v32  ;;  %v5654_v31 = vld [vmem:[#allocation5 + $0x840] ss:$8 sps:$4 sm:$0xff]   ;;  %v5659_v32 = vld [vmem:[#allocation5 + $0x154] ss:$8 sps:$4 sm:$0xff]   ;;  %v5672_v49 = vld [vmem:[#allocation5 + $0x870] ss:$8 sps:$4 sm:$0xff]  }
  0x9e   :  { %3618 = vmatprep.subr.bf16.mxu0 %v5581_v33  ;;  %v5662_v33 = vld [vmem:[#allocation5 + $0x854] ss:$8 sps:$4 sm:$0xff]   ;;  %v5675_v52 = vld [vmem:[#allocation5 + $0x180] ss:$8 sps:$4 sm:$0xff]   ;;  %v5705_v8 = vld [vmem:[#allocation5 + $0x1d0] ss:$8 sps:$4 sm:$0xff]  }
  0x9f   :  { %v5678_v53 = vld [vmem:[#allocation5 + $0x880] ss:$8 sps:$4 sm:$0xff]   ;;  %v5683_v54 = vld [vmem:[#allocation5 + $0x194] ss:$8 sps:$4 sm:$0xff]   ;;  %v5708_v9 = vld [vmem:[#allocation5 + $0x8d0] ss:$8 sps:$4 sm:$0xff]  }
  0xa0   :  { %3318 = vmatpush1.bf16.msra.mxu1 %v5583_v34  ;;  %v5657_v34 = vld [vmem:[#allocation5 + $0x150] ss:$8 sps:$4 sm:$0xff]   ;;  %v5686_v55 = vld [vmem:[#allocation5 + $0x894] ss:$8 sps:$4 sm:$0xff]   ;;  %v5713_v10 = vld [vmem:[#allocation5 + $0x1e4] ss:$8 sps:$4 sm:$0xff]  }
  0xa1   :  { %3619 = vmatpush1.bf16.msra.mxu0 %v5584_v35  ;;  %3319 = vmatprep.subr.bf16.mxu1 %v5585_v36  ;;  %v5660_v35 = vld [vmem:[#allocation5 + $0x850] ss:$8 sps:$4 sm:$0xff]   ;;  %v5665_v36 = vld [vmem:[#allocation5 + $0x164] ss:$8 sps:$4 sm:$0xff]   ;;  %v5707_v6 = vld [vmem:[#allocation5 + $0x1d4] ss:$8 sps:$4 sm:$0xff]  }
  0xa2   :  { %3620 = vmatprep.subr.bf16.mxu0 %v5587_v37  ;;  %v5668_v37 = vld [vmem:[#allocation5 + $0x864] ss:$8 sps:$4 sm:$0xff]  }
  0xa4   :  { %3320 = vmatpush1.bf16.msra.mxu1 %v5589_v38  ;;  %v5663_v38 = vld [vmem:[#allocation5 + $0x160] ss:$8 sps:$4 sm:$0xff]  }
  0xa5   :  { %3621 = vmatpush1.bf16.msra.mxu0 %v5590_v39  ;;  %3321 = vmatprep.subr.bf16.mxu1 %v5591_v40  ;;  %v5666_v39 = vld [vmem:[#allocation5 + $0x860] ss:$8 sps:$4 sm:$0xff]   ;;  %v124_v40 = vld [vmem:[#allocation2 + $0x18] sm:$0xff] }
  0xa6   :  { %3622 = vmatprep.subr.bf16.mxu0 %v5593_v41  ;;  %v156_v41 = vld [vmem:[#allocation2 + $0x118] sm:$0xff] }
  0xa8   :  { %3322 = vmatpush1.bf16.msra.mxu1 %v5595_v42  ;;  %v5671_v42 = vld [vmem:[#allocation5 + $0x174] ss:$8 sps:$4 sm:$0xff]  }
  0xa9   :  { %3623 = vmatpush1.bf16.msra.mxu0 %v5596_v43  ;;  %3323 = vmatprep.subr.bf16.mxu1 %v5597_v44  ;;  %v5674_v43 = vld [vmem:[#allocation5 + $0x874] ss:$8 sps:$4 sm:$0xff]   ;;  %v188_v44 = vpack.c.bf16 %v156_v41, %v124_v40  ;;  %v5738_v40 = vld [vmem:[#allocation5 + $0x920] ss:$8 sps:$4 sm:$0xff]  }
  0xaa   :  { %3624 = vmatprep.subr.bf16.mxu0 %v5599_v45  ;;  %v138_v45 = vld [vmem:[#allocation2 + $0x88] sm:$0xff] }
  0xac   :  { %3324 = vmatpush1.bf16.msra.mxu1 %v5601_v46  ;;  %v170_v46 = vld [vmem:[#allocation2 + $0x188] sm:$0xff] }
  0xad   :  { %3625 = vmatpush1.bf16.msra.mxu0 %v5602_v47  ;;  %3325 = vmatprep.subr.bf16.mxu1 %v5603_v50  ;;  %v202_v47 = vpack.c.bf16 %v170_v46, %v138_v45  ;;  %v5677_v50 = vld [vmem:[#allocation5 + $0x184] ss:$8 sps:$4 sm:$0xff]   ;;  %v5744_v45 = vld [vmem:[#allocation5 + $0x930] ss:$8 sps:$4 sm:$0xff]  }
  0xae   :  { %3626 = vmatprep.subr.bf16.mxu0 %v5605_v51  ;;  %v5680_v51 = vld [vmem:[#allocation5 + $0x884] ss:$8 sps:$4 sm:$0xff]  }
  0xaf   :  { %v5749_v46 = vld [vmem:[#allocation5 + $0x244] ss:$8 sps:$4 sm:$0xff]  }
  0xb0   :  { %3326 = vmatpush1.bf16.msra.mxu1 %v5607_v56  ;;  %v5681_v56 = vld [vmem:[#allocation5 + $0x190] ss:$8 sps:$4 sm:$0xff]  }
  0xb1   :  { %3627 = vmatpush1.bf16.msra.mxu0 %v5608_v57  ;;  %3327 = vmatprep.subr.bf16.mxu1 %v5609_v58  ;;  %v5684_v57 = vld [vmem:[#allocation5 + $0x890] ss:$8 sps:$4 sm:$0xff]   ;;  %v5689_v58 = vld [vmem:[#allocation5 + $0x1a4] ss:$8 sps:$4 sm:$0xff]  }
  0xb2   :  { %3628 = vmatprep.subr.bf16.mxu0 %v5611_v59  ;;  %v5692_v59 = vld [vmem:[#allocation5 + $0x8a4] ss:$8 sps:$4 sm:$0xff]  }
  0xb4   :  { %3328 = vmatpush1.bf16.msra.mxu1 %v5613_v60  ;;  %v5687_v60 = vld [vmem:[#allocation5 + $0x1a0] ss:$8 sps:$4 sm:$0xff]  }
  0xb5   :  { %3629 = vmatpush1.bf16.msra.mxu0 %v5614_v61  ;;  %3329 = vmatprep.subr.bf16.mxu1 %v5615_v62  ;;  %v5690_v61 = vld [vmem:[#allocation5 + $0x8a0] ss:$8 sps:$4 sm:$0xff]   ;;  %v5695_v62 = vld [vmem:[#allocation5 + $0x1b4] ss:$8 sps:$4 sm:$0xff]  }
  0xb6   :  { %3630 = vmatprep.subr.bf16.mxu0 %v5617_v63  ;;  %v5698_v63 = vld [vmem:[#allocation5 + $0x8b4] ss:$8 sps:$4 sm:$0xff]  }
  0xb8   :  { %3330 = vmatpush1.bf16.msra.mxu1 %v5619_v0  ;;  %v5693_v0 = vld [vmem:[#allocation5 + $0x1b0] ss:$8 sps:$4 sm:$0xff]  }
  0xb9   :  { %3631 = vmatpush1.bf16.msra.mxu0 %v5620_v1  ;;  %3331 = vmatprep.subr.bf16.mxu1 %v5621_v2  ;;  %v5696_v1 = vld [vmem:[#allocation5 + $0x8b0] ss:$8 sps:$4 sm:$0xff]   ;;  %v5701_v2 = vld [vmem:[#allocation5 + $0x1c4] ss:$8 sps:$4 sm:$0xff]  }
  0xba   :  { %3632 = vmatprep.subr.bf16.mxu0 %v5623_v3  ;;  %v5704_v3 = vld [vmem:[#allocation5 + $0x8c4] ss:$8 sps:$4 sm:$0xff]  }
  0xbc   :  { %3332 = vmatpush1.bf16.msra.mxu1 %v5625_v4  ;;  %v5699_v4 = vld [vmem:[#allocation5 + $0x1c0] ss:$8 sps:$4 sm:$0xff]  }
  0xbd   :  { %3633 = vmatpush1.bf16.msra.mxu0 %v5626_v5  ;;  %3344 = vmatprep.subr.bf16.mxu1 %v5629_v7  ;;  %v5702_v5 = vld [vmem:[#allocation5 + $0x8c0] ss:$8 sps:$4 sm:$0xff]   ;;  %v5710_v7 = vld [vmem:[#allocation5 + $0x8d4] ss:$8 sps:$4 sm:$0xff]  }
  0xbe   :  { %3645 = vmatprep.subr.bf16.mxu0 %v5632_v11  ;;  %v5716_v11 = vld [vmem:[#allocation5 + $0x8e4] ss:$8 sps:$4 sm:$0xff]  }
  0xbf   :  { %3334 = vmatmul.mubr.bf16.vlgmr.msra.gmra.mrb[0].mxu1 %v185_v14  ;;  %v5719_v14 = vld [vmem:[#allocation5 + $0x1f4] ss:$8 sps:$4 sm:$0xff]  }
  0xc0   :  { %3635 = vmatmul.mubr.bf16.vlgmr.msra.gmra.mrb[0].mxu0 %v199_v15  ;;  %3345 = vmatpush1.bf16.msra.mxu1 %v5627_v12  ;;  %v5711_v12 = vld [vmem:[#allocation5 + $0x1e0] ss:$8 sps:$4 sm:$0xff]   ;;  %v5722_v15 = vld [vmem:[#allocation5 + $0x8f4] ss:$8 sps:$4 sm:$0xff]  }
  0xc1   :  { %3646 = vmatpush1.bf16.msra.mxu0 %v5630_v13  ;;  %3346 = vmatprep.subr.bf16.mxu1 %v5635_v16  ;;  %v5714_v13 = vld [vmem:[#allocation5 + $0x8e0] ss:$8 sps:$4 sm:$0xff]   ;;  %v5717_v16 = vld [vmem:[#allocation5 + $0x1f0] ss:$8 sps:$4 sm:$0xff]  }
  0xc2   :  { %3647 = vmatprep.subr.bf16.mxu0 %v5638_v17  ;;  %3376 = vmatprep.mubr.bf16.mxu1 %v188_v44  ;;  %v5720_v17 = vld [vmem:[#allocation5 + $0x8f0] ss:$8 sps:$4 sm:$0xff]  }
  0xc3   :  { %3677 = vmatprep.mubr.bf16.mxu0 %v202_v47  ;;  %v5741_v44 = vld [vmem:[#allocation5 + $0x230] ss:$8 sps:$4 sm:$0xff]   ;;  %v5752_v47 = vld [vmem:[#allocation5 + $0x944] ss:$8 sps:$4 sm:$0xff]  }
  0xc4   :  { %3347 = vmatpush1.bf16.msra.mxu1 %v5633_v18  ;;  %v123_v18 = vld [vmem:[#allocation2 + $0x10] sm:$0xff] }
  0xc5   :  { %3648 = vmatpush1.bf16.msra.mxu0 %v5636_v19  ;;  %3348 = vmatprep.subr.bf16.mxu1 %v5641_v20  ;;  %v5725_v19 = vld [vmem:[#allocation5 + $0x204] ss:$8 sps:$4 sm:$0xff]   ;;  %v155_v20 = vld [vmem:[#allocation2 + $0x110] sm:$0xff] }
  0xc6   :  { %3649 = vmatprep.subr.bf16.mxu0 %v5644_v21  ;;  %v137_v21 = vld [vmem:[#allocation2 + $0x80] sm:$0xff] }
  0xc8   :  { %3349 = vmatpush1.bf16.msra.mxu1 %v5639_v22  ;;  %v169_v22 = vld [vmem:[#allocation2 + $0x180] sm:$0xff] }
  0xc9   :  { %3650 = vmatpush1.bf16.msra.mxu0 %v5642_v23  ;;  %3350 = vmatprep.subr.bf16.mxu1 %v5647_v24  ;;  %v5728_v23 = vld [vmem:[#allocation5 + $0x904] ss:$8 sps:$4 sm:$0xff]   ;;  %v5723_v24 = vld [vmem:[#allocation5 + $0x200] ss:$8 sps:$4 sm:$0xff]  }
  0xca   :  { %3651 = vmatprep.subr.bf16.mxu0 %v5650_v25  ;;  %v5726_v25 = vld [vmem:[#allocation5 + $0x900] ss:$8 sps:$4 sm:$0xff]  }
  0xcc   :  { %3351 = vmatpush1.bf16.msra.mxu1 %v5645_v26  ;;  %v187_v26 = vpack.c.bf16 %v155_v20, %v123_v18  ;;  %v5803_v18 = vld [vmem:[#allocation5 + $0x2d4] ss:$8 sps:$4 sm:$0xff]   ;;  %v5801_v20 = vld [vmem:[#allocation5 + $0x2d0] ss:$8 sps:$4 sm:$0xff]  }
  0xcd   :  { %3652 = vmatpush1.bf16.msra.mxu0 %v5648_v27  ;;  %3352 = vmatprep.subr.bf16.mxu1 %v5653_v28  ;;  %v201_v27 = vpack.c.bf16 %v169_v22, %v137_v21  ;;  %v5731_v28 = vld [vmem:[#allocation5 + $0x214] ss:$8 sps:$4 sm:$0xff]   ;;  %v5804_v21 = vld [vmem:[#allocation5 + $0x9d0] ss:$8 sps:$4 sm:$0xff]   ;;  %v5809_v22 = vld [vmem:[#allocation5 + $0x2e4] ss:$8 sps:$4 sm:$0xff]  }
  0xce   :  { %3653 = vmatprep.subr.bf16.mxu0 %v5656_v29  ;;  %v5734_v29 = vld [vmem:[#allocation5 + $0x914] ss:$8 sps:$4 sm:$0xff]  }
  0xd0   :  { %3353 = vmatpush1.bf16.msra.mxu1 %v5651_v30  ;;  %v5729_v30 = vld [vmem:[#allocation5 + $0x210] ss:$8 sps:$4 sm:$0xff]  }
  0xd1   :  { %3654 = vmatpush1.bf16.msra.mxu0 %v5654_v31  ;;  %3354 = vmatprep.subr.bf16.mxu1 %v5659_v32  ;;  %v5732_v31 = vld [vmem:[#allocation5 + $0x910] ss:$8 sps:$4 sm:$0xff]   ;;  %v5737_v32 = vld [vmem:[#allocation5 + $0x224] ss:$8 sps:$4 sm:$0xff]  }
  0xd2   :  { %3655 = vmatprep.subr.bf16.mxu0 %v5662_v33  ;;  %v5740_v33 = vld [vmem:[#allocation5 + $0x924] ss:$8 sps:$4 sm:$0xff]  }
  0xd4   :  { %3355 = vmatpush1.bf16.msra.mxu1 %v5657_v34  ;;  %v126_v34 = vld [vmem:[#allocation2 + $0x28] sm:$0xff] }
  0xd5   :  { %3656 = vmatpush1.bf16.msra.mxu0 %v5660_v35  ;;  %3356 = vmatprep.subr.bf16.mxu1 %v5665_v36  ;;  %v158_v35 = vld [vmem:[#allocation2 + $0x128] sm:$0xff] }
  0xd6   :  { %3657 = vmatprep.subr.bf16.mxu0 %v5668_v37  ;;  %v190_v36 = vpack.c.bf16 %v158_v35, %v126_v34  ;;  %v5735_v37 = vld [vmem:[#allocation5 + $0x220] ss:$8 sps:$4 sm:$0xff]   ;;  %v171_v34 = vld [vmem:[#allocation2 + $0x190] sm:$0xff]  ;;  %v5824_v35 = vld [vmem:[#allocation5 + $0xa04] ss:$8 sps:$4 sm:$0xff]  }
  0xd8   :  { %3357 = vmatpush1.bf16.msra.mxu1 %v5663_v38  ;;  %v140_v38 = vld [vmem:[#allocation2 + $0x98] sm:$0xff] }
  0xd9   :  { %3658 = vmatpush1.bf16.msra.mxu0 %v5666_v39  ;;  %3358 = vmatprep.subr.bf16.mxu1 %v5671_v42  ;;  %v172_v39 = vld [vmem:[#allocation2 + $0x198] sm:$0xff] }
  0xda   :  { %3659 = vmatprep.subr.bf16.mxu0 %v5674_v43  ;;  %v204_v41 = vpack.c.bf16 %v172_v39, %v140_v38  ;;  %v5743_v42 = vld [vmem:[#allocation5 + $0x234] ss:$8 sps:$4 sm:$0xff]  }
  0xdb   :  { %v5746_v43 = vld [vmem:[#allocation5 + $0x934] ss:$8 sps:$4 sm:$0xff]  }
  0xdc   :  { %3359 = vmatpush1.bf16.msra.mxu1 %v5669_v48  ;;  %v5747_v48 = vld [vmem:[#allocation5 + $0x240] ss:$8 sps:$4 sm:$0xff]   ;;  %v128_v38 = vld [vmem:[#allocation2 + $0x38] sm:$0xff] }
  0xdd   :  { %3660 = vmatpush1.bf16.msra.mxu0 %v5672_v49  ;;  %3360 = vmatprep.subr.bf16.mxu1 %v5677_v50  ;;  %v5750_v49 = vld [vmem:[#allocation5 + $0x940] ss:$8 sps:$4 sm:$0xff]   ;;  %v5755_v50 = vld [vmem:[#allocation5 + $0x254] ss:$8 sps:$4 sm:$0xff]  }
  0xde   :  { %3661 = vmatprep.subr.bf16.mxu0 %v5680_v51  ;;  %v5758_v51 = vld [vmem:[#allocation5 + $0x954] ss:$8 sps:$4 sm:$0xff]  }
  0xdf   :  { %v160_v39 = vld [vmem:[#allocation2 + $0x138] sm:$0xff] }
  0xe0   :  { %3361 = vmatpush1.bf16.msra.mxu1 %v5675_v52  ;;  %v5753_v52 = vld [vmem:[#allocation5 + $0x250] ss:$8 sps:$4 sm:$0xff]  }
  0xe1   :  { %3662 = vmatpush1.bf16.msra.mxu0 %v5678_v53  ;;  %3362 = vmatprep.subr.bf16.mxu1 %v5683_v54  ;;  %v5756_v53 = vld [vmem:[#allocation5 + $0x950] ss:$8 sps:$4 sm:$0xff]   ;;  %v5761_v54 = vld [vmem:[#allocation5 + $0x264] ss:$8 sps:$4 sm:$0xff]  }
  0xe2   :  { %3663 = vmatprep.subr.bf16.mxu0 %v5686_v55  ;;  %v5764_v55 = vld [vmem:[#allocation5 + $0x964] ss:$8 sps:$4 sm:$0xff]  }
  0xe4   :  { %3363 = vmatpush1.bf16.msra.mxu1 %v5681_v56  ;;  %v5759_v56 = vld [vmem:[#allocation5 + $0x260] ss:$8 sps:$4 sm:$0xff]  }
  0xe5   :  { %3664 = vmatpush1.bf16.msra.mxu0 %v5684_v57  ;;  %3364 = vmatprep.subr.bf16.mxu1 %v5689_v58  ;;  %v5762_v57 = vld [vmem:[#allocation5 + $0x960] ss:$8 sps:$4 sm:$0xff]   ;;  %v5767_v58 = vld [vmem:[#allocation5 + $0x274] ss:$8 sps:$4 sm:$0xff]  }
  0xe6   :  { %3665 = vmatprep.subr.bf16.mxu0 %v5692_v59  ;;  %v5770_v59 = vld [vmem:[#allocation5 + $0x974] ss:$8 sps:$4 sm:$0xff]  }
  0xe8   :  { %3365 = vmatpush1.bf16.msra.mxu1 %v5687_v60  ;;  %v5765_v60 = vld [vmem:[#allocation5 + $0x270] ss:$8 sps:$4 sm:$0xff]  }
  0xe9   :  { %3666 = vmatpush1.bf16.msra.mxu0 %v5690_v61  ;;  %3366 = vmatprep.subr.bf16.mxu1 %v5695_v62  ;;  %v5768_v61 = vld [vmem:[#allocation5 + $0x970] ss:$8 sps:$4 sm:$0xff]   ;;  %v5773_v62 = vld [vmem:[#allocation5 + $0x284] ss:$8 sps:$4 sm:$0xff]  }
  0xea   :  { %3667 = vmatprep.subr.bf16.mxu0 %v5698_v63  ;;  %v5776_v63 = vld [vmem:[#allocation5 + $0x984] ss:$8 sps:$4 sm:$0xff]  }
  0xec   :  { %3367 = vmatpush1.bf16.msra.mxu1 %v5693_v0  ;;  %v5771_v0 = vld [vmem:[#allocation5 + $0x280] ss:$8 sps:$4 sm:$0xff]  }
  0xed   :  { %3668 = vmatpush1.bf16.msra.mxu0 %v5696_v1  ;;  %3368 = vmatprep.subr.bf16.mxu1 %v5701_v2  ;;  %v5774_v1 = vld [vmem:[#allocation5 + $0x980] ss:$8 sps:$4 sm:$0xff]   ;;  %v5779_v2 = vld [vmem:[#allocation5 + $0x294] ss:$8 sps:$4 sm:$0xff]  }
  0xee   :  { %3669 = vmatprep.subr.bf16.mxu0 %v5704_v3  ;;  %v5782_v3 = vld [vmem:[#allocation5 + $0x994] ss:$8 sps:$4 sm:$0xff]  }
  0xf0   :  { %3369 = vmatpush1.bf16.msra.mxu1 %v5699_v4  ;;  %v5777_v4 = vld [vmem:[#allocation5 + $0x290] ss:$8 sps:$4 sm:$0xff]  }
  0xf1   :  { %3670 = vmatpush1.bf16.msra.mxu0 %v5702_v5  ;;  %3370 = vmatprep.subr.bf16.mxu1 %v5707_v6  ;;  %v5780_v5 = vld [vmem:[#allocation5 + $0x990] ss:$8 sps:$4 sm:$0xff]   ;;  %v5785_v6 = vld [vmem:[#allocation5 + $0x2a4] ss:$8 sps:$4 sm:$0xff]  }
  0xf2   :  { %3671 = vmatprep.subr.bf16.mxu0 %v5710_v7  ;;  %v5788_v7 = vld [vmem:[#allocation5 + $0x9a4] ss:$8 sps:$4 sm:$0xff]  }
  0xf4   :  { %3371 = vmatpush1.bf16.msra.mxu1 %v5705_v8  ;;  %v5783_v8 = vld [vmem:[#allocation5 + $0x2a0] ss:$8 sps:$4 sm:$0xff]  }
  0xf5   :  { %3672 = vmatpush1.bf16.msra.mxu0 %v5708_v9  ;;  %3372 = vmatprep.subr.bf16.mxu1 %v5713_v10  ;;  %v5786_v9 = vld [vmem:[#allocation5 + $0x9a0] ss:$8 sps:$4 sm:$0xff]   ;;  %v5791_v10 = vld [vmem:[#allocation5 + $0x2b4] ss:$8 sps:$4 sm:$0xff]  }
  0xf6   :  { %3673 = vmatprep.subr.bf16.mxu0 %v5716_v11  ;;  %v5794_v11 = vld [vmem:[#allocation5 + $0x9b4] ss:$8 sps:$4 sm:$0xff]  }
  0xf8   :  { %3373 = vmatpush1.bf16.msra.mxu1 %v5711_v12  ;;  %v5789_v12 = vld [vmem:[#allocation5 + $0x2b0] ss:$8 sps:$4 sm:$0xff]  }
  0xf9   :  { %3674 = vmatpush1.bf16.msra.mxu0 %v5714_v13  ;;  %3374 = vmatprep.subr.bf16.mxu1 %v5719_v14  ;;  %v5792_v13 = vld [vmem:[#allocation5 + $0x9b0] ss:$8 sps:$4 sm:$0xff]   ;;  %v5797_v14 = vld [vmem:[#allocation5 + $0x2c4] ss:$8 sps:$4 sm:$0xff]  }
  0xfa   :  { %3675 = vmatprep.subr.bf16.mxu0 %v5722_v15  ;;  %v5800_v15 = vld [vmem:[#allocation5 + $0x9c4] ss:$8 sps:$4 sm:$0xff]  }
  0xfc   :  { %3375 = vmatpush1.bf16.msra.mxu1 %v5717_v16  ;;  %v5795_v16 = vld [vmem:[#allocation5 + $0x2c0] ss:$8 sps:$4 sm:$0xff]  }
  0xfd   :  { %3676 = vmatpush1.bf16.msra.mxu0 %v5720_v17  ;;  %3387 = vmatprep.subr.bf16.mxu1 %v5725_v19  ;;  %v5798_v17 = vld [vmem:[#allocation5 + $0x9c0] ss:$8 sps:$4 sm:$0xff]   ;;  %v5806_v19 = vld [vmem:[#allocation5 + $0x9d4] ss:$8 sps:$4 sm:$0xff]  }
  0xfe   :  { %3688 = vmatprep.subr.bf16.mxu0 %v5728_v23  ;;  %v5812_v23 = vld [vmem:[#allocation5 + $0x9e4] ss:$8 sps:$4 sm:$0xff]  }
  0xff   :  { %3377 = vmatmul.mubr.bf16.vlgmr.msra.gmra.mrb[0].mxu1 %v187_v26  ;;  %v5815_v26 = vld [vmem:[#allocation5 + $0x2f4] ss:$8 sps:$4 sm:$0xff]  }
 0x100   :  { %3678 = vmatmul.mubr.bf16.vlgmr.msra.gmra.mrb[0].mxu0 %v201_v27  ;;  %3388 = vmatpush1.bf16.msra.mxu1 %v5723_v24  ;;  %v5807_v24 = vld [vmem:[#allocation5 + $0x2e0] ss:$8 sps:$4 sm:$0xff]   ;;  %v5818_v27 = vld [vmem:[#allocation5 + $0x9f4] ss:$8 sps:$4 sm:$0xff]  }
 0x101   :  { %3689 = vmatpush1.bf16.msra.mxu0 %v5726_v25  ;;  %3389 = vmatprep.subr.bf16.mxu1 %v5731_v28  ;;  %v5810_v25 = vld [vmem:[#allocation5 + $0x9e0] ss:$8 sps:$4 sm:$0xff]   ;;  %v5813_v28 = vld [vmem:[#allocation5 + $0x2f0] ss:$8 sps:$4 sm:$0xff]  }
 0x102   :  { %3690 = vmatprep.subr.bf16.mxu0 %v5734_v29  ;;  %3419 = vmatprep.mubr.bf16.mxu1 %v190_v36  ;;  %v5816_v29 = vld [vmem:[#allocation5 + $0x9f0] ss:$8 sps:$4 sm:$0xff]   ;;  %v5819_v36 = vld [vmem:[#allocation5 + $0x300] ss:$8 sps:$4 sm:$0xff]  }
 0x103   :  { %3720 = vmatprep.mubr.bf16.mxu0 %v204_v41 }
 0x104   :  { %3390 = vmatpush1.bf16.msra.mxu1 %v5729_v30  ;;  %v125_v30 = vld [vmem:[#allocation2 + $0x20] sm:$0xff] }
 0x105   :  { %3691 = vmatpush1.bf16.msra.mxu0 %v5732_v31  ;;  %3391 = vmatprep.subr.bf16.mxu1 %v5737_v32  ;;  %v5821_v31 = vld [vmem:[#allocation5 + $0x304] ss:$8 sps:$4 sm:$0xff]  }
 0x106   :  { %3692 = vmatprep.subr.bf16.mxu0 %v5740_v33  ;;  %v157_v32 = vld [vmem:[#allocation2 + $0x120] sm:$0xff]  ;;  %v139_v33 = vld [vmem:[#allocation2 + $0x90] sm:$0xff] }
 0x107   :  { %v203_v41 = vpack.c.bf16 %v171_v34, %v139_v33  ;;  %v5900_v33 = vld [vmem:[#allocation5 + $0xad0] ss:$8 sps:$4 sm:$0xff]   ;;  %v5905_v34 = vld [vmem:[#allocation5 + $0x3e4] ss:$8 sps:$4 sm:$0xff]  }
 0x108   :  { %3392 = vmatpush1.bf16.msra.mxu1 %v5735_v37  ;;  %v5822_v37 = vld [vmem:[#allocation5 + $0xa00] ss:$8 sps:$4 sm:$0xff]  }
 0x109   :  { %3693 = vmatpush1.bf16.msra.mxu0 %v5738_v40  ;;  %3393 = vmatprep.subr.bf16.mxu1 %v5743_v42  ;;  %v189_v40 = vpack.c.bf16 %v157_v32, %v125_v30  ;;  %v142_v42 = vld [vmem:[#allocation2 + $0xa8] sm:$0xff]  ;;  %v5899_v30 = vld [vmem:[#allocation5 + $0x3d4] ss:$8 sps:$4 sm:$0xff]   ;;  %v5897_v32 = vld [vmem:[#allocation5 + $0x3d0] ss:$8 sps:$4 sm:$0xff]  }
 0x10a   :  { %3694 = vmatprep.subr.bf16.mxu0 %v5746_v43  ;;  %v174_v43 = vld [vmem:[#allocation2 + $0x1a8] sm:$0xff] }
 0x10c   :  { %3394 = vmatpush1.bf16.msra.mxu1 %v5741_v44  ;;  %v5827_v44 = vld [vmem:[#allocation5 + $0x314] ss:$8 sps:$4 sm:$0xff]  }
 0x10d   :  { %3695 = vmatpush1.bf16.msra.mxu0 %v5744_v45  ;;  %3395 = vmatprep.subr.bf16.mxu1 %v5749_v46  ;;  %v5830_v45 = vld [vmem:[#allocation5 + $0xa14] ss:$8 sps:$4 sm:$0xff]   ;;  %v192_v46 = vpack.c.bf16 %v160_v39, %v128_v38 }
 0x10e   :  { %3696 = vmatprep.subr.bf16.mxu0 %v5752_v47  ;;  %v206_v47 = vpack.c.bf16 %v174_v43, %v142_v42  ;;  %v5911_v38 = vld [vmem:[#allocation5 + $0x3f4] ss:$8 sps:$4 sm:$0xff]   ;;  %v5917_v43 = vld [vmem:[#allocation5 + $0x404] ss:$8 sps:$4 sm:$0xff]  }
 0x10f   :  { %v5914_v39 = vld [vmem:[#allocation5 + $0xaf4] ss:$8 sps:$4 sm:$0xff]  }
 0x110   :  { %3396 = vmatpush1.bf16.msra.mxu1 %v5747_v48  ;;  %v5825_v48 = vld [vmem:[#allocation5 + $0x310] ss:$8 sps:$4 sm:$0xff]  }
 0x111   :  { %3697 = vmatpush1.bf16.msra.mxu0 %v5750_v49  ;;  %3397 = vmatprep.subr.bf16.mxu1 %v5755_v50  ;;  %v5828_v49 = vld [vmem:[#allocation5 + $0xa10] ss:$8 sps:$4 sm:$0xff]   ;;  %v5833_v50 = vld [vmem:[#allocation5 + $0x324] ss:$8 sps:$4 sm:$0xff]  }
 0x112   :  { %3698 = vmatprep.subr.bf16.mxu0 %v5758_v51  ;;  %v5836_v51 = vld [vmem:[#allocation5 + $0xa24] ss:$8 sps:$4 sm:$0xff]   ;;  %v127_v42 = vld [vmem:[#allocation2 + $0x30] sm:$0xff] }
 0x114   :  { %3398 = vmatpush1.bf16.msra.mxu1 %v5753_v52  ;;  %v5831_v52 = vld [vmem:[#allocation5 + $0x320] ss:$8 sps:$4 sm:$0xff]  }
 0x115   :  { %3699 = vmatpush1.bf16.msra.mxu0 %v5756_v53  ;;  %3399 = vmatprep.subr.bf16.mxu1 %v5761_v54  ;;  %v5834_v53 = vld [vmem:[#allocation5 + $0xa20] ss:$8 sps:$4 sm:$0xff]   ;;  %v5839_v54 = vld [vmem:[#allocation5 + $0x334] ss:$8 sps:$4 sm:$0xff]  }
 0x116   :  { %3700 = vmatprep.subr.bf16.mxu0 %v5764_v55  ;;  %v5842_v55 = vld [vmem:[#allocation5 + $0xa34] ss:$8 sps:$4 sm:$0xff]  }
 0x118   :  { %3400 = vmatpush1.bf16.msra.mxu1 %v5759_v56  ;;  %v5837_v56 = vld [vmem:[#allocation5 + $0x330] ss:$8 sps:$4 sm:$0xff]  }
 0x119   :  { %3701 = vmatpush1.bf16.msra.mxu0 %v5762_v57  ;;  %3401 = vmatprep.subr.bf16.mxu1 %v5767_v58  ;;  %v5840_v57 = vld [vmem:[#allocation5 + $0xa30] ss:$8 sps:$4 sm:$0xff]   ;;  %v5845_v58 = vld [vmem:[#allocation5 + $0x344] ss:$8 sps:$4 sm:$0xff]  }
 0x11a   :  { %3702 = vmatprep.subr.bf16.mxu0 %v5770_v59  ;;  %v5848_v59 = vld [vmem:[#allocation5 + $0xa44] ss:$8 sps:$4 sm:$0xff]  }
 0x11c   :  { %3402 = vmatpush1.bf16.msra.mxu1 %v5765_v60  ;;  %v5843_v60 = vld [vmem:[#allocation5 + $0x340] ss:$8 sps:$4 sm:$0xff]  }
 0x11d   :  { %3703 = vmatpush1.bf16.msra.mxu0 %v5768_v61  ;;  %3403 = vmatprep.subr.bf16.mxu1 %v5773_v62  ;;  %v5846_v61 = vld [vmem:[#allocation5 + $0xa40] ss:$8 sps:$4 sm:$0xff]   ;;  %v5851_v62 = vld [vmem:[#allocation5 + $0x354] ss:$8 sps:$4 sm:$0xff]  }
 0x11e   :  { %3704 = vmatprep.subr.bf16.mxu0 %v5776_v63  ;;  %v5854_v63 = vld [vmem:[#allocation5 + $0xa54] ss:$8 sps:$4 sm:$0xff]  }
 0x120   :  { %3404 = vmatpush1.bf16.msra.mxu1 %v5771_v0  ;;  %v5849_v0 = vld [vmem:[#allocation5 + $0x350] ss:$8 sps:$4 sm:$0xff]  }
 0x121   :  { %3705 = vmatpush1.bf16.msra.mxu0 %v5774_v1  ;;  %3405 = vmatprep.subr.bf16.mxu1 %v5779_v2  ;;  %v5852_v1 = vld [vmem:[#allocation5 + $0xa50] ss:$8 sps:$4 sm:$0xff]   ;;  %v5857_v2 = vld [vmem:[#allocation5 + $0x364] ss:$8 sps:$4 sm:$0xff]  }
 0x122   :  { %3706 = vmatprep.subr.bf16.mxu0 %v5782_v3  ;;  %v5860_v3 = vld [vmem:[#allocation5 + $0xa64] ss:$8 sps:$4 sm:$0xff]  }
 0x124   :  { %3406 = vmatpush1.bf16.msra.mxu1 %v5777_v4  ;;  %v5855_v4 = vld [vmem:[#allocation5 + $0x360] ss:$8 sps:$4 sm:$0xff]  }
 0x125   :  { %3707 = vmatpush1.bf16.msra.mxu0 %v5780_v5  ;;  %3407 = vmatprep.subr.bf16.mxu1 %v5785_v6  ;;  %v5858_v5 = vld [vmem:[#allocation5 + $0xa60] ss:$8 sps:$4 sm:$0xff]   ;;  %v5863_v6 = vld [vmem:[#allocation5 + $0x374] ss:$8 sps:$4 sm:$0xff]  }
 0x126   :  { %3708 = vmatprep.subr.bf16.mxu0 %v5788_v7  ;;  %v5866_v7 = vld [vmem:[#allocation5 + $0xa74] ss:$8 sps:$4 sm:$0xff]  }
 0x128   :  { %3408 = vmatpush1.bf16.msra.mxu1 %v5783_v8  ;;  %v5861_v8 = vld [vmem:[#allocation5 + $0x370] ss:$8 sps:$4 sm:$0xff]  }
 0x129   :  { %3709 = vmatpush1.bf16.msra.mxu0 %v5786_v9  ;;  %3409 = vmatprep.subr.bf16.mxu1 %v5791_v10  ;;  %v5864_v9 = vld [vmem:[#allocation5 + $0xa70] ss:$8 sps:$4 sm:$0xff]   ;;  %v5869_v10 = vld [vmem:[#allocation5 + $0x384] ss:$8 sps:$4 sm:$0xff]  }
 0x12a   :  { %3710 = vmatprep.subr.bf16.mxu0 %v5794_v11  ;;  %v5872_v11 = vld [vmem:[#allocation5 + $0xa84] ss:$8 sps:$4 sm:$0xff]  }
 0x12c   :  { %3410 = vmatpush1.bf16.msra.mxu1 %v5789_v12  ;;  %v5867_v12 = vld [vmem:[#allocation5 + $0x380] ss:$8 sps:$4 sm:$0xff]  }
 0x12d   :  { %3711 = vmatpush1.bf16.msra.mxu0 %v5792_v13  ;;  %3411 = vmatprep.subr.bf16.mxu1 %v5797_v14  ;;  %v5870_v13 = vld [vmem:[#allocation5 + $0xa80] ss:$8 sps:$4 sm:$0xff]   ;;  %v5875_v14 = vld [vmem:[#allocation5 + $0x394] ss:$8 sps:$4 sm:$0xff]  }
 0x12e   :  { %3712 = vmatprep.subr.bf16.mxu0 %v5800_v15  ;;  %v5878_v15 = vld [vmem:[#allocation5 + $0xa94] ss:$8 sps:$4 sm:$0xff]  }
 0x130   :  { %3412 = vmatpush1.bf16.msra.mxu1 %v5795_v16  ;;  %v5873_v16 = vld [vmem:[#allocation5 + $0x390] ss:$8 sps:$4 sm:$0xff]  }
 0x131   :  { %3713 = vmatpush1.bf16.msra.mxu0 %v5798_v17  ;;  %3413 = vmatprep.subr.bf16.mxu1 %v5803_v18  ;;  %v5876_v17 = vld [vmem:[#allocation5 + $0xa90] ss:$8 sps:$4 sm:$0xff]   ;;  %v5881_v18 = vld [vmem:[#allocation5 + $0x3a4] ss:$8 sps:$4 sm:$0xff]  }
 0x132   :  { %3714 = vmatprep.subr.bf16.mxu0 %v5806_v19  ;;  %v5884_v19 = vld [vmem:[#allocation5 + $0xaa4] ss:$8 sps:$4 sm:$0xff]  }
 0x134   :  { %3414 = vmatpush1.bf16.msra.mxu1 %v5801_v20  ;;  %v5879_v20 = vld [vmem:[#allocation5 + $0x3a0] ss:$8 sps:$4 sm:$0xff]  }
 0x135   :  { %3715 = vmatpush1.bf16.msra.mxu0 %v5804_v21  ;;  %3415 = vmatprep.subr.bf16.mxu1 %v5809_v22  ;;  %v5882_v21 = vld [vmem:[#allocation5 + $0xaa0] ss:$8 sps:$4 sm:$0xff]   ;;  %v5887_v22 = vld [vmem:[#allocation5 + $0x3b4] ss:$8 sps:$4 sm:$0xff]  }
 0x136   :  { %3716 = vmatprep.subr.bf16.mxu0 %v5812_v23  ;;  %v5890_v23 = vld [vmem:[#allocation5 + $0xab4] ss:$8 sps:$4 sm:$0xff]  }
 0x138   :  { %3416 = vmatpush1.bf16.msra.mxu1 %v5807_v24  ;;  %v5885_v24 = vld [vmem:[#allocation5 + $0x3b0] ss:$8 sps:$4 sm:$0xff]  }
 0x139   :  { %3717 = vmatpush1.bf16.msra.mxu0 %v5810_v25  ;;  %3417 = vmatprep.subr.bf16.mxu1 %v5815_v26  ;;  %v5888_v25 = vld [vmem:[#allocation5 + $0xab0] ss:$8 sps:$4 sm:$0xff]   ;;  %v5893_v26 = vld [vmem:[#allocation5 + $0x3c4] ss:$8 sps:$4 sm:$0xff]  }
 0x13a   :  { %3718 = vmatprep.subr.bf16.mxu0 %v5818_v27  ;;  %v5896_v27 = vld [vmem:[#allocation5 + $0xac4] ss:$8 sps:$4 sm:$0xff]  }
 0x13c   :  { %3418 = vmatpush1.bf16.msra.mxu1 %v5813_v28  ;;  %v5891_v28 = vld [vmem:[#allocation5 + $0x3c0] ss:$8 sps:$4 sm:$0xff]  }
 0x13d   :  { %3719 = vmatpush1.bf16.msra.mxu0 %v5816_v29  ;;  %3430 = vmatprep.subr.bf16.mxu1 %v5821_v31  ;;  %v5894_v29 = vld [vmem:[#allocation5 + $0xac0] ss:$8 sps:$4 sm:$0xff]   ;;  %v5902_v31 = vld [vmem:[#allocation5 + $0xad4] ss:$8 sps:$4 sm:$0xff]  }
 0x13e   :  { %3731 = vmatprep.subr.bf16.mxu0 %v5824_v35  ;;  %v5908_v35 = vld [vmem:[#allocation5 + $0xae4] ss:$8 sps:$4 sm:$0xff]  }
 0x13f   :  { %3420 = vmatmul.mubr.bf16.vlgmr.msra.gmra.mrb[0].mxu1 %v189_v40  ;;  %v5909_v40 = vld [vmem:[#allocation5 + $0x3f0] ss:$8 sps:$4 sm:$0xff]  }
 0x140   :  { %3721 = vmatmul.mubr.bf16.vlgmr.msra.gmra.mrb[0].mxu0 %v203_v41  ;;  %3431 = vmatpush1.bf16.msra.mxu1 %v5819_v36  ;;  %v5903_v36 = vld [vmem:[#allocation5 + $0x3e0] ss:$8 sps:$4 sm:$0xff]   ;;  %v5912_v41 = vld [vmem:[#allocation5 + $0xaf0] ss:$8 sps:$4 sm:$0xff]  }
 0x141   :  { %3732 = vmatpush1.bf16.msra.mxu0 %v5822_v37  ;;  %3432 = vmatprep.subr.bf16.mxu1 %v5827_v44  ;;  %v5906_v37 = vld [vmem:[#allocation5 + $0xae0] ss:$8 sps:$4 sm:$0xff]   ;;  %v159_v44 = vld [vmem:[#allocation2 + $0x130] sm:$0xff] }
 0x142   :  { %3733 = vmatprep.subr.bf16.mxu0 %v5830_v45  ;;  %3462 = vmatprep.mubr.bf16.mxu1 %v192_v46  ;;  %v141_v45 = vld [vmem:[#allocation2 + $0xa0] sm:$0xff] }
 0x143   :  { %3763 = vmatprep.mubr.bf16.mxu0 %v206_v47  ;;  %v173_v46 = vld [vmem:[#allocation2 + $0x1a0] sm:$0xff] }
 0x144   :  { %3433 = vmatpush1.bf16.msra.mxu1 %v5825_v48  ;;  %v5920_v47 = vld [vmem:[#allocation5 + $0xb04] ss:$8 sps:$4 sm:$0xff]   ;;  %v5915_v48 = vld [vmem:[#allocation5 + $0x400] ss:$8 sps:$4 sm:$0xff]  }
 0x145   :  { %3734 = vmatpush1.bf16.msra.mxu0 %v5828_v49  ;;  %3434 = vmatprep.subr.bf16.mxu1 %v5833_v50  ;;  %v5918_v49 = vld [vmem:[#allocation5 + $0xb00] ss:$8 sps:$4 sm:$0xff]  }
 0x146   :  { %3735 = vmatprep.subr.bf16.mxu0 %v5836_v51  ;;  %v130_v50 = vld [vmem:[#allocation2 + $0x48] sm:$0xff] }
 0x147   :  { %v162_v51 = vld [vmem:[#allocation2 + $0x148] sm:$0xff] }
 0x148   :  { %3435 = vmatpush1.bf16.msra.mxu1 %v5831_v52  ;;  %v191_v52 = vpack.c.bf16 %v159_v44, %v127_v42  ;;  %v5995_v42 = vld [vmem:[#allocation5 + $0x4d4] ss:$8 sps:$4 sm:$0xff]   ;;  %v5993_v44 = vld [vmem:[#allocation5 + $0x4d0] ss:$8 sps:$4 sm:$0xff]  }
 0x149   :  { %3736 = vmatpush1.bf16.msra.mxu0 %v5834_v53  ;;  %3436 = vmatprep.subr.bf16.mxu1 %v5839_v54  ;;  %v205_v53 = vpack.c.bf16 %v173_v46, %v141_v45  ;;  %v144_v54 = vld [vmem:[#allocation2 + $0xb8] sm:$0xff]  ;;  %v6001_v46 = vld [vmem:[#allocation5 + $0x4e4] ss:$8 sps:$4 sm:$0xff]  }
 0x14a   :  { %3737 = vmatprep.subr.bf16.mxu0 %v5842_v55  ;;  %v176_v55 = vld [vmem:[#allocation2 + $0x1b8] sm:$0xff] }
 0x14b   :  { %v5996_v45 = vld [vmem:[#allocation5 + $0xbd0] ss:$8 sps:$4 sm:$0xff]  }
 0x14c   :  { %3437 = vmatpush1.bf16.msra.mxu1 %v5837_v56  ;;  %v5923_v56 = vld [vmem:[#allocation5 + $0x414] ss:$8 sps:$4 sm:$0xff]  }
 0x14d   :  { %3738 = vmatpush1.bf16.msra.mxu0 %v5840_v57  ;;  %3438 = vmatprep.subr.bf16.mxu1 %v5845_v58  ;;  %v5926_v57 = vld [vmem:[#allocation5 + $0xb14] ss:$8 sps:$4 sm:$0xff]   ;;  %v194_v58 = vpack.c.bf16 %v162_v51, %v130_v50 }
 0x14e   :  { %3739 = vmatprep.subr.bf16.mxu0 %v5848_v59  ;;  %v208_v59 = vpack.c.bf16 %v176_v55, %v144_v54  ;;  %v6007_v50 = vld [vmem:[#allocation5 + $0x4f4] ss:$8 sps:$4 sm:$0xff]   ;;  %v129_v54 = vld [vmem:[#allocation2 + $0x40] sm:$0xff] }
 0x14f   :  { %v6010_v51 = vld [vmem:[#allocation5 + $0xbf4] ss:$8 sps:$4 sm:$0xff]   ;;  %v161_v55 = vld [vmem:[#allocation2 + $0x140] sm:$0xff] }
 0x150   :  { %3439 = vmatpush1.bf16.msra.mxu1 %v5843_v60  ;;  %v5921_v60 = vld [vmem:[#allocation5 + $0x410] ss:$8 sps:$4 sm:$0xff]  }
 0x151   :  { %3740 = vmatpush1.bf16.msra.mxu0 %v5846_v61  ;;  %3440 = vmatprep.subr.bf16.mxu1 %v5851_v62  ;;  %v5924_v61 = vld [vmem:[#allocation5 + $0xb10] ss:$8 sps:$4 sm:$0xff]   ;;  %v5929_v62 = vld [vmem:[#allocation5 + $0x424] ss:$8 sps:$4 sm:$0xff]  }
 0x152   :  { %3741 = vmatprep.subr.bf16.mxu0 %v5854_v63  ;;  %v5932_v63 = vld [vmem:[#allocation5 + $0xb24] ss:$8 sps:$4 sm:$0xff]  }
 0x154   :  { %3441 = vmatpush1.bf16.msra.mxu1 %v5849_v0  ;;  %v5927_v0 = vld [vmem:[#allocation5 + $0x420] ss:$8 sps:$4 sm:$0xff]  }
 0x155   :  { %3742 = vmatpush1.bf16.msra.mxu0 %v5852_v1  ;;  %3442 = vmatprep.subr.bf16.mxu1 %v5857_v2  ;;  %v5930_v1 = vld [vmem:[#allocation5 + $0xb20] ss:$8 sps:$4 sm:$0xff]   ;;  %v5935_v2 = vld [vmem:[#allocation5 + $0x434] ss:$8 sps:$4 sm:$0xff]  }
 0x156   :  { %3743 = vmatprep.subr.bf16.mxu0 %v5860_v3  ;;  %v5938_v3 = vld [vmem:[#allocation5 + $0xb34] ss:$8 sps:$4 sm:$0xff]  }
 0x158   :  { %3443 = vmatpush1.bf16.msra.mxu1 %v5855_v4  ;;  %v5933_v4 = vld [vmem:[#allocation5 + $0x430] ss:$8 sps:$4 sm:$0xff]  }
 0x159   :  { %3744 = vmatpush1.bf16.msra.mxu0 %v5858_v5  ;;  %3444 = vmatprep.subr.bf16.mxu1 %v5863_v6  ;;  %v5936_v5 = vld [vmem:[#allocation5 + $0xb30] ss:$8 sps:$4 sm:$0xff]   ;;  %v5941_v6 = vld [vmem:[#allocation5 + $0x444] ss:$8 sps:$4 sm:$0xff]  }
 0x15a   :  { %3745 = vmatprep.subr.bf16.mxu0 %v5866_v7  ;;  %v5944_v7 = vld [vmem:[#allocation5 + $0xb44] ss:$8 sps:$4 sm:$0xff]  }
 0x15c   :  { %3445 = vmatpush1.bf16.msra.mxu1 %v5861_v8  ;;  %v5939_v8 = vld [vmem:[#allocation5 + $0x440] ss:$8 sps:$4 sm:$0xff]  }
 0x15d   :  { %3746 = vmatpush1.bf16.msra.mxu0 %v5864_v9  ;;  %3446 = vmatprep.subr.bf16.mxu1 %v5869_v10  ;;  %v5942_v9 = vld [vmem:[#allocation5 + $0xb40] ss:$8 sps:$4 sm:$0xff]   ;;  %v5947_v10 = vld [vmem:[#allocation5 + $0x454] ss:$8 sps:$4 sm:$0xff]  }
 0x15e   :  { %3747 = vmatprep.subr.bf16.mxu0 %v5872_v11  ;;  %v5950_v11 = vld [vmem:[#allocation5 + $0xb54] ss:$8 sps:$4 sm:$0xff]  }
 0x160   :  { %3447 = vmatpush1.bf16.msra.mxu1 %v5867_v12  ;;  %v5945_v12 = vld [vmem:[#allocation5 + $0x450] ss:$8 sps:$4 sm:$0xff]  }
 0x161   :  { %3748 = vmatpush1.bf16.msra.mxu0 %v5870_v13  ;;  %3448 = vmatprep.subr.bf16.mxu1 %v5875_v14  ;;  %v5948_v13 = vld [vmem:[#allocation5 + $0xb50] ss:$8 sps:$4 sm:$0xff]   ;;  %v5953_v14 = vld [vmem:[#allocation5 + $0x464] ss:$8 sps:$4 sm:$0xff]  }
 0x162   :  { %3749 = vmatprep.subr.bf16.mxu0 %v5878_v15  ;;  %v5956_v15 = vld [vmem:[#allocation5 + $0xb64] ss:$8 sps:$4 sm:$0xff]  }
 0x164   :  { %3449 = vmatpush1.bf16.msra.mxu1 %v5873_v16  ;;  %v5951_v16 = vld [vmem:[#allocation5 + $0x460] ss:$8 sps:$4 sm:$0xff]  }
 0x165   :  { %3750 = vmatpush1.bf16.msra.mxu0 %v5876_v17  ;;  %3450 = vmatprep.subr.bf16.mxu1 %v5881_v18  ;;  %v5954_v17 = vld [vmem:[#allocation5 + $0xb60] ss:$8 sps:$4 sm:$0xff]   ;;  %v5959_v18 = vld [vmem:[#allocation5 + $0x474] ss:$8 sps:$4 sm:$0xff]  }
 0x166   :  { %3751 = vmatprep.subr.bf16.mxu0 %v5884_v19  ;;  %v5962_v19 = vld [vmem:[#allocation5 + $0xb74] ss:$8 sps:$4 sm:$0xff]  }
 0x168   :  { %3451 = vmatpush1.bf16.msra.mxu1 %v5879_v20  ;;  %v5957_v20 = vld [vmem:[#allocation5 + $0x470] ss:$8 sps:$4 sm:$0xff]  }
 0x169   :  { %3752 = vmatpush1.bf16.msra.mxu0 %v5882_v21  ;;  %3452 = vmatprep.subr.bf16.mxu1 %v5887_v22  ;;  %v5960_v21 = vld [vmem:[#allocation5 + $0xb70] ss:$8 sps:$4 sm:$0xff]   ;;  %v5965_v22 = vld [vmem:[#allocation5 + $0x484] ss:$8 sps:$4 sm:$0xff]  }
 0x16a   :  { %3753 = vmatprep.subr.bf16.mxu0 %v5890_v23  ;;  %v5968_v23 = vld [vmem:[#allocation5 + $0xb84] ss:$8 sps:$4 sm:$0xff]  }
 0x16c   :  { %3453 = vmatpush1.bf16.msra.mxu1 %v5885_v24  ;;  %v5963_v24 = vld [vmem:[#allocation5 + $0x480] ss:$8 sps:$4 sm:$0xff]  }
 0x16d   :  { %3754 = vmatpush1.bf16.msra.mxu0 %v5888_v25  ;;  %3454 = vmatprep.subr.bf16.mxu1 %v5893_v26  ;;  %v5966_v25 = vld [vmem:[#allocation5 + $0xb80] ss:$8 sps:$4 sm:$0xff]   ;;  %v5971_v26 = vld [vmem:[#allocation5 + $0x494] ss:$8 sps:$4 sm:$0xff]  }
 0x16e   :  { %3755 = vmatprep.subr.bf16.mxu0 %v5896_v27  ;;  %v5974_v27 = vld [vmem:[#allocation5 + $0xb94] ss:$8 sps:$4 sm:$0xff]  }
 0x170   :  { %3455 = vmatpush1.bf16.msra.mxu1 %v5891_v28  ;;  %v5969_v28 = vld [vmem:[#allocation5 + $0x490] ss:$8 sps:$4 sm:$0xff]  }
 0x171   :  { %3756 = vmatpush1.bf16.msra.mxu0 %v5894_v29  ;;  %3456 = vmatprep.subr.bf16.mxu1 %v5899_v30  ;;  %v5972_v29 = vld [vmem:[#allocation5 + $0xb90] ss:$8 sps:$4 sm:$0xff]   ;;  %v5977_v30 = vld [vmem:[#allocation5 + $0x4a4] ss:$8 sps:$4 sm:$0xff]  }
 0x172   :  { %3757 = vmatprep.subr.bf16.mxu0 %v5902_v31  ;;  %v5980_v31 = vld [vmem:[#allocation5 + $0xba4] ss:$8 sps:$4 sm:$0xff]  }
 0x174   :  { %3457 = vmatpush1.bf16.msra.mxu1 %v5897_v32  ;;  %v5975_v32 = vld [vmem:[#allocation5 + $0x4a0] ss:$8 sps:$4 sm:$0xff]  }
 0x175   :  { %3758 = vmatpush1.bf16.msra.mxu0 %v5900_v33  ;;  %3458 = vmatprep.subr.bf16.mxu1 %v5905_v34  ;;  %v5978_v33 = vld [vmem:[#allocation5 + $0xba0] ss:$8 sps:$4 sm:$0xff]   ;;  %v5983_v34 = vld [vmem:[#allocation5 + $0x4b4] ss:$8 sps:$4 sm:$0xff]  }
 0x176   :  { %3759 = vmatprep.subr.bf16.mxu0 %v5908_v35  ;;  %v5986_v35 = vld [vmem:[#allocation5 + $0xbb4] ss:$8 sps:$4 sm:$0xff]  }
 0x178   :  { %3459 = vmatpush1.bf16.msra.mxu1 %v5903_v36  ;;  %v5981_v36 = vld [vmem:[#allocation5 + $0x4b0] ss:$8 sps:$4 sm:$0xff]  }
 0x179   :  { %3760 = vmatpush1.bf16.msra.mxu0 %v5906_v37  ;;  %3460 = vmatprep.subr.bf16.mxu1 %v5911_v38  ;;  %v5984_v37 = vld [vmem:[#allocation5 + $0xbb0] ss:$8 sps:$4 sm:$0xff]   ;;  %v5989_v38 = vld [vmem:[#allocation5 + $0x4c4] ss:$8 sps:$4 sm:$0xff]  }
 0x17a   :  { %3761 = vmatprep.subr.bf16.mxu0 %v5914_v39  ;;  %v5992_v39 = vld [vmem:[#allocation5 + $0xbc4] ss:$8 sps:$4 sm:$0xff]  }
 0x17c   :  { %3461 = vmatpush1.bf16.msra.mxu1 %v5909_v40  ;;  %v5987_v40 = vld [vmem:[#allocation5 + $0x4c0] ss:$8 sps:$4 sm:$0xff]  }
 0x17d   :  { %3762 = vmatpush1.bf16.msra.mxu0 %v5912_v41  ;;  %3473 = vmatprep.subr.bf16.mxu1 %v5917_v43  ;;  %v5990_v41 = vld [vmem:[#allocation5 + $0xbc0] ss:$8 sps:$4 sm:$0xff]   ;;  %v5998_v43 = vld [vmem:[#allocation5 + $0xbd4] ss:$8 sps:$4 sm:$0xff]  }
 0x17e   :  { %3774 = vmatprep.subr.bf16.mxu0 %v5920_v47  ;;  %v6004_v47 = vld [vmem:[#allocation5 + $0xbe4] ss:$8 sps:$4 sm:$0xff]  }
 0x17f   :  { %3463 = vmatmul.mubr.bf16.vlgmr.msra.gmra.mrb[0].mxu1 %v191_v52  ;;  %v6005_v52 = vld [vmem:[#allocation5 + $0x4f0] ss:$8 sps:$4 sm:$0xff]  }
 0x180   :  { %3764 = vmatmul.mubr.bf16.vlgmr.msra.gmra.mrb[0].mxu0 %v205_v53  ;;  %3474 = vmatpush1.bf16.msra.mxu1 %v5915_v48  ;;  %v5999_v48 = vld [vmem:[#allocation5 + $0x4e0] ss:$8 sps:$4 sm:$0xff]   ;;  %v6008_v53 = vld [vmem:[#allocation5 + $0xbf0] ss:$8 sps:$4 sm:$0xff]  }
 0x181   :  { %3775 = vmatpush1.bf16.msra.mxu0 %v5918_v49  ;;  %3475 = vmatprep.subr.bf16.mxu1 %v5923_v56  ;;  %v6002_v49 = vld [vmem:[#allocation5 + $0xbe0] ss:$8 sps:$4 sm:$0xff]   ;;  %v6013_v56 = vld [vmem:[#allocation5 + $0x504] ss:$8 sps:$4 sm:$0xff]  }
 0x182   :  { %3776 = vmatprep.subr.bf16.mxu0 %v5926_v57  ;;  %3505 = vmatprep.mubr.bf16.mxu1 %v194_v58  ;;  %v6016_v57 = vld [vmem:[#allocation5 + $0xc04] ss:$8 sps:$4 sm:$0xff]   ;;  %v143_v58 = vld [vmem:[#allocation2 + $0xb0] sm:$0xff] }
 0x183   :  { %3806 = vmatprep.mubr.bf16.mxu0 %v208_v59  ;;  %v175_v59 = vld [vmem:[#allocation2 + $0x1b0] sm:$0xff] }
 0x184   :  { %3476 = vmatpush1.bf16.msra.mxu1 %v5921_v60  ;;  %v132_v60 = vld [vmem:[#allocation2 + $0x58] sm:$0xff] }
 0x185   :  { %3777 = vmatpush1.bf16.msra.mxu0 %v5924_v61  ;;  %3477 = vmatprep.subr.bf16.mxu1 %v5929_v62  ;;  %v164_v61 = vld [vmem:[#allocation2 + $0x158] sm:$0xff]  ;;  %v193_v62 = vpack.c.bf16 %v161_v55, %v129_v54 }
 0x186   :  { %3778 = vmatprep.subr.bf16.mxu0 %v5932_v63  ;;  %v207_v63 = vpack.c.bf16 %v175_v59, %v143_v58  ;;  %v6091_v54 = vld [vmem:[#allocation5 + $0x5d4] ss:$8 sps:$4 sm:$0xff]   ;;  %v6097_v58 = vld [vmem:[#allocation5 + $0x5e4] ss:$8 sps:$4 sm:$0xff]  }
 0x187   :  { %v6094_v55 = vld [vmem:[#allocation5 + $0xcd4] ss:$8 sps:$4 sm:$0xff]   ;;  %v6100_v59 = vld [vmem:[#allocation5 + $0xce4] ss:$8 sps:$4 sm:$0xff]  }
 0x188   :  { %3478 = vmatpush1.bf16.msra.mxu1 %v5927_v0  ;;  %v146_v0 = vld [vmem:[#allocation2 + $0xc8] sm:$0xff] }
 0x189   :  { %3779 = vmatpush1.bf16.msra.mxu0 %v5930_v1  ;;  %3479 = vmatprep.subr.bf16.mxu1 %v5935_v2  ;;  %v178_v1 = vld [vmem:[#allocation2 + $0x1c8] sm:$0xff] }
 0x18a   :  { %3780 = vmatprep.subr.bf16.mxu0 %v5938_v3  ;;  %v6011_v2 = vld [vmem:[#allocation5 + $0x500] ss:$8 sps:$4 sm:$0xff]  }
 0x18b   :  { %v6014_v3 = vld [vmem:[#allocation5 + $0xc00] ss:$8 sps:$4 sm:$0xff]  }
 0x18c   :  { %3480 = vmatpush1.bf16.msra.mxu1 %v5933_v4  ;;  %v6019_v4 = vld [vmem:[#allocation5 + $0x514] ss:$8 sps:$4 sm:$0xff]  }
 0x18d   :  { %3781 = vmatpush1.bf16.msra.mxu0 %v5936_v5  ;;  %3481 = vmatprep.subr.bf16.mxu1 %v5941_v6  ;;  %v6022_v5 = vld [vmem:[#allocation5 + $0xc14] ss:$8 sps:$4 sm:$0xff]   ;;  %v6017_v6 = vld [vmem:[#allocation5 + $0x510] ss:$8 sps:$4 sm:$0xff]  }
 0x18e   :  { %3782 = vmatprep.subr.bf16.mxu0 %v5944_v7  ;;  %v6020_v7 = vld [vmem:[#allocation5 + $0xc10] ss:$8 sps:$4 sm:$0xff]  }
 0x190   :  { %3482 = vmatpush1.bf16.msra.mxu1 %v5939_v8  ;;  %v196_v8 = vpack.c.bf16 %v164_v61, %v132_v60  ;;  %v6095_v60 = vld [vmem:[#allocation5 + $0x5e0] ss:$8 sps:$4 sm:$0xff]  }
 0x191   :  { %3783 = vmatpush1.bf16.msra.mxu0 %v5942_v9  ;;  %3483 = vmatprep.subr.bf16.mxu1 %v5947_v10  ;;  %v210_v9 = vpack.c.bf16 %v178_v1, %v146_v0  ;;  %v6025_v10 = vld [vmem:[#allocation5 + $0x524] ss:$8 sps:$4 sm:$0xff]   ;;  %v6098_v61 = vld [vmem:[#allocation5 + $0xce0] ss:$8 sps:$4 sm:$0xff]   ;;  %v6101_v0 = vld [vmem:[#allocation5 + $0x5f0] ss:$8 sps:$4 sm:$0xff]  }
 0x192   :  { %3784 = vmatprep.subr.bf16.mxu0 %v5950_v11  ;;  %v6028_v11 = vld [vmem:[#allocation5 + $0xc24] ss:$8 sps:$4 sm:$0xff]   ;;  %v6104_v1 = vld [vmem:[#allocation5 + $0xcf0] ss:$8 sps:$4 sm:$0xff]  }
 0x194   :  { %3484 = vmatpush1.bf16.msra.mxu1 %v5945_v12  ;;  %v6023_v12 = vld [vmem:[#allocation5 + $0x520] ss:$8 sps:$4 sm:$0xff]  }
 0x195   :  { %3785 = vmatpush1.bf16.msra.mxu0 %v5948_v13  ;;  %3485 = vmatprep.subr.bf16.mxu1 %v5953_v14  ;;  %v6026_v13 = vld [vmem:[#allocation5 + $0xc20] ss:$8 sps:$4 sm:$0xff]   ;;  %v6031_v14 = vld [vmem:[#allocation5 + $0x534] ss:$8 sps:$4 sm:$0xff]  }
 0x196   :  { %3786 = vmatprep.subr.bf16.mxu0 %v5956_v15  ;;  %v6034_v15 = vld [vmem:[#allocation5 + $0xc34] ss:$8 sps:$4 sm:$0xff]  }
 0x198   :  { %3486 = vmatpush1.bf16.msra.mxu1 %v5951_v16  ;;  %v6029_v16 = vld [vmem:[#allocation5 + $0x530] ss:$8 sps:$4 sm:$0xff]  }
 0x199   :  { %3787 = vmatpush1.bf16.msra.mxu0 %v5954_v17  ;;  %3487 = vmatprep.subr.bf16.mxu1 %v5959_v18  ;;  %v6032_v17 = vld [vmem:[#allocation5 + $0xc30] ss:$8 sps:$4 sm:$0xff]   ;;  %v6037_v18 = vld [vmem:[#allocation5 + $0x544] ss:$8 sps:$4 sm:$0xff]  }
 0x19a   :  { %3788 = vmatprep.subr.bf16.mxu0 %v5962_v19  ;;  %v6040_v19 = vld [vmem:[#allocation5 + $0xc44] ss:$8 sps:$4 sm:$0xff]  }
 0x19c   :  { %3488 = vmatpush1.bf16.msra.mxu1 %v5957_v20  ;;  %v6035_v20 = vld [vmem:[#allocation5 + $0x540] ss:$8 sps:$4 sm:$0xff]  }
 0x19d   :  { %3789 = vmatpush1.bf16.msra.mxu0 %v5960_v21  ;;  %3489 = vmatprep.subr.bf16.mxu1 %v5965_v22  ;;  %v6038_v21 = vld [vmem:[#allocation5 + $0xc40] ss:$8 sps:$4 sm:$0xff]   ;;  %v6043_v22 = vld [vmem:[#allocation5 + $0x554] ss:$8 sps:$4 sm:$0xff]  }
 0x19e   :  { %3790 = vmatprep.subr.bf16.mxu0 %v5968_v23  ;;  %v6046_v23 = vld [vmem:[#allocation5 + $0xc54] ss:$8 sps:$4 sm:$0xff]  }
 0x1a0   :  { %3490 = vmatpush1.bf16.msra.mxu1 %v5963_v24  ;;  %v6041_v24 = vld [vmem:[#allocation5 + $0x550] ss:$8 sps:$4 sm:$0xff]  }
 0x1a1   :  { %3791 = vmatpush1.bf16.msra.mxu0 %v5966_v25  ;;  %3491 = vmatprep.subr.bf16.mxu1 %v5971_v26  ;;  %v6044_v25 = vld [vmem:[#allocation5 + $0xc50] ss:$8 sps:$4 sm:$0xff]   ;;  %v6049_v26 = vld [vmem:[#allocation5 + $0x564] ss:$8 sps:$4 sm:$0xff]  }
 0x1a2   :  { %3792 = vmatprep.subr.bf16.mxu0 %v5974_v27  ;;  %v6052_v27 = vld [vmem:[#allocation5 + $0xc64] ss:$8 sps:$4 sm:$0xff]  }
 0x1a4   :  { %3492 = vmatpush1.bf16.msra.mxu1 %v5969_v28  ;;  %v6047_v28 = vld [vmem:[#allocation5 + $0x560] ss:$8 sps:$4 sm:$0xff]  }
 0x1a5   :  { %3793 = vmatpush1.bf16.msra.mxu0 %v5972_v29  ;;  %3493 = vmatprep.subr.bf16.mxu1 %v5977_v30  ;;  %v6050_v29 = vld [vmem:[#allocation5 + $0xc60] ss:$8 sps:$4 sm:$0xff]   ;;  %v6055_v30 = vld [vmem:[#allocation5 + $0x574] ss:$8 sps:$4 sm:$0xff]  }
 0x1a6   :  { %3794 = vmatprep.subr.bf16.mxu0 %v5980_v31  ;;  %v6058_v31 = vld [vmem:[#allocation5 + $0xc74] ss:$8 sps:$4 sm:$0xff]  }
 0x1a8   :  { %3494 = vmatpush1.bf16.msra.mxu1 %v5975_v32  ;;  %v6053_v32 = vld [vmem:[#allocation5 + $0x570] ss:$8 sps:$4 sm:$0xff]  }
 0x1a9   :  { %3795 = vmatpush1.bf16.msra.mxu0 %v5978_v33  ;;  %3495 = vmatprep.subr.bf16.mxu1 %v5983_v34  ;;  %v6056_v33 = vld [vmem:[#allocation5 + $0xc70] ss:$8 sps:$4 sm:$0xff]   ;;  %v6061_v34 = vld [vmem:[#allocation5 + $0x584] ss:$8 sps:$4 sm:$0xff]  }
 0x1aa   :  { %3796 = vmatprep.subr.bf16.mxu0 %v5986_v35  ;;  %v6064_v35 = vld [vmem:[#allocation5 + $0xc84] ss:$8 sps:$4 sm:$0xff]  }
 0x1ac   :  { %3496 = vmatpush1.bf16.msra.mxu1 %v5981_v36  ;;  %v6059_v36 = vld [vmem:[#allocation5 + $0x580] ss:$8 sps:$4 sm:$0xff]  }
 0x1ad   :  { %3797 = vmatpush1.bf16.msra.mxu0 %v5984_v37  ;;  %3497 = vmatprep.subr.bf16.mxu1 %v5989_v38  ;;  %v6062_v37 = vld [vmem:[#allocation5 + $0xc80] ss:$8 sps:$4 sm:$0xff]   ;;  %v6067_v38 = vld [vmem:[#allocation5 + $0x594] ss:$8 sps:$4 sm:$0xff]  }
 0x1ae   :  { %3798 = vmatprep.subr.bf16.mxu0 %v5992_v39  ;;  %v6070_v39 = vld [vmem:[#allocation5 + $0xc94] ss:$8 sps:$4 sm:$0xff]  }
 0x1b0   :  { %3498 = vmatpush1.bf16.msra.mxu1 %v5987_v40  ;;  %v6065_v40 = vld [vmem:[#allocation5 + $0x590] ss:$8 sps:$4 sm:$0xff]  }
 0x1b1   :  { %3799 = vmatpush1.bf16.msra.mxu0 %v5990_v41  ;;  %3499 = vmatprep.subr.bf16.mxu1 %v5995_v42  ;;  %v6068_v41 = vld [vmem:[#allocation5 + $0xc90] ss:$8 sps:$4 sm:$0xff]   ;;  %v6073_v42 = vld [vmem:[#allocation5 + $0x5a4] ss:$8 sps:$4 sm:$0xff]  }
 0x1b2   :  { %3800 = vmatprep.subr.bf16.mxu0 %v5998_v43  ;;  %v6076_v43 = vld [vmem:[#allocation5 + $0xca4] ss:$8 sps:$4 sm:$0xff]  }
 0x1b4   :  { %3500 = vmatpush1.bf16.msra.mxu1 %v5993_v44  ;;  %v6071_v44 = vld [vmem:[#allocation5 + $0x5a0] ss:$8 sps:$4 sm:$0xff]  }
 0x1b5   :  { %3801 = vmatpush1.bf16.msra.mxu0 %v5996_v45  ;;  %3501 = vmatprep.subr.bf16.mxu1 %v6001_v46  ;;  %v6074_v45 = vld [vmem:[#allocation5 + $0xca0] ss:$8 sps:$4 sm:$0xff]   ;;  %v6079_v46 = vld [vmem:[#allocation5 + $0x5b4] ss:$8 sps:$4 sm:$0xff]  }
 0x1b6   :  { %3802 = vmatprep.subr.bf16.mxu0 %v6004_v47  ;;  %v6082_v47 = vld [vmem:[#allocation5 + $0xcb4] ss:$8 sps:$4 sm:$0xff]  }
 0x1b8   :  { %3502 = vmatpush1.bf16.msra.mxu1 %v5999_v48  ;;  %v6077_v48 = vld [vmem:[#allocation5 + $0x5b0] ss:$8 sps:$4 sm:$0xff]  }
 0x1b9   :  { %3803 = vmatpush1.bf16.msra.mxu0 %v6002_v49  ;;  %3503 = vmatprep.subr.bf16.mxu1 %v6007_v50  ;;  %v6080_v49 = vld [vmem:[#allocation5 + $0xcb0] ss:$8 sps:$4 sm:$0xff]   ;;  %v6085_v50 = vld [vmem:[#allocation5 + $0x5c4] ss:$8 sps:$4 sm:$0xff]  }
 0x1ba   :  { %3804 = vmatprep.subr.bf16.mxu0 %v6010_v51  ;;  %v6088_v51 = vld [vmem:[#allocation5 + $0xcc4] ss:$8 sps:$4 sm:$0xff]  }
 0x1bc   :  { %3504 = vmatpush1.bf16.msra.mxu1 %v6005_v52  ;;  %v6083_v52 = vld [vmem:[#allocation5 + $0x5c0] ss:$8 sps:$4 sm:$0xff]  }
 0x1bd   :  { %3805 = vmatpush1.bf16.msra.mxu0 %v6008_v53  ;;  %3516 = vmatprep.subr.bf16.mxu1 %v6013_v56  ;;  %v6086_v53 = vld [vmem:[#allocation5 + $0xcc0] ss:$8 sps:$4 sm:$0xff]   ;;  %v6089_v56 = vld [vmem:[#allocation5 + $0x5d0] ss:$8 sps:$4 sm:$0xff]  }
 0x1be   :  { %3817 = vmatprep.subr.bf16.mxu0 %v6016_v57  ;;  %v6092_v57 = vld [vmem:[#allocation5 + $0xcd0] ss:$8 sps:$4 sm:$0xff]  }
 0x1bf   :  { %3506 = vmatmul.mubr.bf16.vlgmr.msra.gmra.mrb[0].mxu1 %v193_v62  ;;  %v6103_v62 = vld [vmem:[#allocation5 + $0x5f4] ss:$8 sps:$4 sm:$0xff]  }
 0x1c0   :  { %3807 = vmatmul.mubr.bf16.vlgmr.msra.gmra.mrb[0].mxu0 %v207_v63  ;;  %3517 = vmatpush1.bf16.msra.mxu1 %v6011_v2  ;;  %v6106_v63 = vld [vmem:[#allocation5 + $0xcf4] ss:$8 sps:$4 sm:$0xff]  }
 0x1c1   :  { %3818 = vmatpush1.bf16.msra.mxu0 %v6014_v3  ;;  %3518 = vmatprep.subr.bf16.mxu1 %v6019_v4  ;;  %v131_v2 = vld [vmem:[#allocation2 + $0x50] sm:$0xff]  ;;  %v145_v4 = vld [vmem:[#allocation2 + $0xc0] sm:$0xff] }
 0x1c2   :  { %3819 = vmatprep.subr.bf16.mxu0 %v6022_v5  ;;  %3548 = vmatprep.mubr.bf16.mxu1 %v196_v8  ;;  %v163_v3 = vld [vmem:[#allocation2 + $0x150] sm:$0xff]  ;;  %v177_v5 = vld [vmem:[#allocation2 + $0x1c0] sm:$0xff]  ;;  %v134_v8 = vld [vmem:[#allocation2 + $0x68] sm:$0xff] }
 0x1c3   :  { %3849 = vmatprep.mubr.bf16.mxu0 %v210_v9  ;;  %v195_v9 = vpack.c.bf16 %v163_v3, %v131_v2  ;;  %v6187_v2 = vld [vmem:[#allocation5 + $0x6d4] ss:$8 sps:$4 sm:$0xff]  }
 0x1c4   :  { %3519 = vmatpush1.bf16.msra.mxu1 %v6017_v6  ;;  %v6109_v6 = vld [vmem:[#allocation5 + $0x604] ss:$8 sps:$4 sm:$0xff]   ;;  %v6190_v3 = vld [vmem:[#allocation5 + $0xdd4] ss:$8 sps:$4 sm:$0xff]  }
 0x1c5   :  { %3820 = vmatpush1.bf16.msra.mxu0 %v6020_v7  ;;  %3520 = vmatprep.subr.bf16.mxu1 %v6025_v10  ;;  %v6112_v7 = vld [vmem:[#allocation5 + $0xd04] ss:$8 sps:$4 sm:$0xff]   ;;  %v209_v10 = vpack.c.bf16 %v177_v5, %v145_v4  ;;  %v6185_v4 = vld [vmem:[#allocation5 + $0x6d0] ss:$8 sps:$4 sm:$0xff]  }
 0x1c6   :  { %3821 = vmatprep.subr.bf16.mxu0 %v6028_v11  ;;  %v166_v11 = vld [vmem:[#allocation2 + $0x168] sm:$0xff]  ;;  %v6188_v5 = vld [vmem:[#allocation5 + $0xdd0] ss:$8 sps:$4 sm:$0xff]  }
 0x1c8   :  { %3521 = vmatpush1.bf16.msra.mxu1 %v6023_v12  ;;  %v148_v12 = vld [vmem:[#allocation2 + $0xd8] sm:$0xff] }
 0x1c9   :  { %3822 = vmatpush1.bf16.msra.mxu0 %v6026_v13  ;;  %3522 = vmatprep.subr.bf16.mxu1 %v6031_v14  ;;  %v180_v13 = vld [vmem:[#allocation2 + $0x1d8] sm:$0xff]  ;;  %v6107_v14 = vld [vmem:[#allocation5 + $0x600] ss:$8 sps:$4 sm:$0xff]  }
 0x1ca   :  { %3823 = vmatprep.subr.bf16.mxu0 %v6034_v15  ;;  %v6110_v15 = vld [vmem:[#allocation5 + $0xd00] ss:$8 sps:$4 sm:$0xff]  }
 0x1cc   :  { %3523 = vmatpush1.bf16.msra.mxu1 %v6029_v16  ;;  %v6115_v16 = vld [vmem:[#allocation5 + $0x614] ss:$8 sps:$4 sm:$0xff]  }
 0x1cd   :  { %3824 = vmatpush1.bf16.msra.mxu0 %v6032_v17  ;;  %3524 = vmatprep.subr.bf16.mxu1 %v6037_v18  ;;  %v6118_v17 = vld [vmem:[#allocation5 + $0xd14] ss:$8 sps:$4 sm:$0xff]   ;;  %v198_v18 = vpack.c.bf16 %v166_v11, %v134_v8  ;;  %v6191_v8 = vld [vmem:[#allocation5 + $0x6e0] ss:$8 sps:$4 sm:$0xff]  }
 0x1ce   :  { %3825 = vmatprep.subr.bf16.mxu0 %v6040_v19  ;;  %v212_v19 = vpack.c.bf16 %v180_v13, %v148_v12  ;;  %v6202_v11 = vld [vmem:[#allocation5 + $0xdf4] ss:$8 sps:$4 sm:$0xff]   ;;  %v6197_v12 = vld [vmem:[#allocation5 + $0x6f0] ss:$8 sps:$4 sm:$0xff]  }
 0x1cf   :  { %v6200_v13 = vld [vmem:[#allocation5 + $0xdf0] ss:$8 sps:$4 sm:$0xff]  }
 0x1d0   :  { %3525 = vmatpush1.bf16.msra.mxu1 %v6035_v20  ;;  %v6113_v20 = vld [vmem:[#allocation5 + $0x610] ss:$8 sps:$4 sm:$0xff]  }
 0x1d1   :  { %3826 = vmatpush1.bf16.msra.mxu0 %v6038_v21  ;;  %3526 = vmatprep.subr.bf16.mxu1 %v6043_v22  ;;  %v6116_v21 = vld [vmem:[#allocation5 + $0xd10] ss:$8 sps:$4 sm:$0xff]   ;;  %v6121_v22 = vld [vmem:[#allocation5 + $0x624] ss:$8 sps:$4 sm:$0xff]  }
 0x1d2   :  { %3827 = vmatprep.subr.bf16.mxu0 %v6046_v23  ;;  %v6124_v23 = vld [vmem:[#allocation5 + $0xd24] ss:$8 sps:$4 sm:$0xff]  }
 0x1d4   :  { %3527 = vmatpush1.bf16.msra.mxu1 %v6041_v24  ;;  %v6119_v24 = vld [vmem:[#allocation5 + $0x620] ss:$8 sps:$4 sm:$0xff]  }
 0x1d5   :  { %3828 = vmatpush1.bf16.msra.mxu0 %v6044_v25  ;;  %3528 = vmatprep.subr.bf16.mxu1 %v6049_v26  ;;  %v6122_v25 = vld [vmem:[#allocation5 + $0xd20] ss:$8 sps:$4 sm:$0xff]   ;;  %v6127_v26 = vld [vmem:[#allocation5 + $0x634] ss:$8 sps:$4 sm:$0xff]  }
 0x1d6   :  { %3829 = vmatprep.subr.bf16.mxu0 %v6052_v27  ;;  %v6130_v27 = vld [vmem:[#allocation5 + $0xd34] ss:$8 sps:$4 sm:$0xff]  }
 0x1d8   :  { %3529 = vmatpush1.bf16.msra.mxu1 %v6047_v28  ;;  %v6125_v28 = vld [vmem:[#allocation5 + $0x630] ss:$8 sps:$4 sm:$0xff]  }
 0x1d9   :  { %3830 = vmatpush1.bf16.msra.mxu0 %v6050_v29  ;;  %3530 = vmatprep.subr.bf16.mxu1 %v6055_v30  ;;  %v6128_v29 = vld [vmem:[#allocation5 + $0xd30] ss:$8 sps:$4 sm:$0xff]   ;;  %v6133_v30 = vld [vmem:[#allocation5 + $0x644] ss:$8 sps:$4 sm:$0xff]  }
 0x1da   :  { %3831 = vmatprep.subr.bf16.mxu0 %v6058_v31  ;;  %v6136_v31 = vld [vmem:[#allocation5 + $0xd44] ss:$8 sps:$4 sm:$0xff]  }
 0x1dc   :  { %3531 = vmatpush1.bf16.msra.mxu1 %v6053_v32  ;;  %v6131_v32 = vld [vmem:[#allocation5 + $0x640] ss:$8 sps:$4 sm:$0xff]  }
 0x1dd   :  { %3832 = vmatpush1.bf16.msra.mxu0 %v6056_v33  ;;  %3532 = vmatprep.subr.bf16.mxu1 %v6061_v34  ;;  %v6134_v33 = vld [vmem:[#allocation5 + $0xd40] ss:$8 sps:$4 sm:$0xff]   ;;  %v6139_v34 = vld [vmem:[#allocation5 + $0x654] ss:$8 sps:$4 sm:$0xff]  }
 0x1de   :  { %3833 = vmatprep.subr.bf16.mxu0 %v6064_v35  ;;  %v6142_v35 = vld [vmem:[#allocation5 + $0xd54] ss:$8 sps:$4 sm:$0xff]  }
 0x1e0   :  { %3533 = vmatpush1.bf16.msra.mxu1 %v6059_v36  ;;  %v6137_v36 = vld [vmem:[#allocation5 + $0x650] ss:$8 sps:$4 sm:$0xff]  }
 0x1e1   :  { %3834 = vmatpush1.bf16.msra.mxu0 %v6062_v37  ;;  %3534 = vmatprep.subr.bf16.mxu1 %v6067_v38  ;;  %v6140_v37 = vld [vmem:[#allocation5 + $0xd50] ss:$8 sps:$4 sm:$0xff]   ;;  %v6145_v38 = vld [vmem:[#allocation5 + $0x664] ss:$8 sps:$4 sm:$0xff]  }
 0x1e2   :  { %3835 = vmatprep.subr.bf16.mxu0 %v6070_v39  ;;  %v6148_v39 = vld [vmem:[#allocation5 + $0xd64] ss:$8 sps:$4 sm:$0xff]  }
 0x1e4   :  { %3535 = vmatpush1.bf16.msra.mxu1 %v6065_v40  ;;  %v6143_v40 = vld [vmem:[#allocation5 + $0x660] ss:$8 sps:$4 sm:$0xff]  }
 0x1e5   :  { %3836 = vmatpush1.bf16.msra.mxu0 %v6068_v41  ;;  %3536 = vmatprep.subr.bf16.mxu1 %v6073_v42  ;;  %v6146_v41 = vld [vmem:[#allocation5 + $0xd60] ss:$8 sps:$4 sm:$0xff]   ;;  %v6151_v42 = vld [vmem:[#allocation5 + $0x674] ss:$8 sps:$4 sm:$0xff]  }
 0x1e6   :  { %3837 = vmatprep.subr.bf16.mxu0 %v6076_v43  ;;  %v6154_v43 = vld [vmem:[#allocation5 + $0xd74] ss:$8 sps:$4 sm:$0xff]  }
 0x1e8   :  { %3537 = vmatpush1.bf16.msra.mxu1 %v6071_v44  ;;  %v6149_v44 = vld [vmem:[#allocation5 + $0x670] ss:$8 sps:$4 sm:$0xff]  }
 0x1e9   :  { %3838 = vmatpush1.bf16.msra.mxu0 %v6074_v45  ;;  %3538 = vmatprep.subr.bf16.mxu1 %v6079_v46  ;;  %v6152_v45 = vld [vmem:[#allocation5 + $0xd70] ss:$8 sps:$4 sm:$0xff]   ;;  %v6157_v46 = vld [vmem:[#allocation5 + $0x684] ss:$8 sps:$4 sm:$0xff]  }
 0x1ea   :  { %3839 = vmatprep.subr.bf16.mxu0 %v6082_v47  ;;  %v6160_v47 = vld [vmem:[#allocation5 + $0xd84] ss:$8 sps:$4 sm:$0xff]  }
 0x1ec   :  { %3539 = vmatpush1.bf16.msra.mxu1 %v6077_v48  ;;  %v6155_v48 = vld [vmem:[#allocation5 + $0x680] ss:$8 sps:$4 sm:$0xff]  }
 0x1ed   :  { %3840 = vmatpush1.bf16.msra.mxu0 %v6080_v49  ;;  %3540 = vmatprep.subr.bf16.mxu1 %v6085_v50  ;;  %v6158_v49 = vld [vmem:[#allocation5 + $0xd80] ss:$8 sps:$4 sm:$0xff]   ;;  %v6163_v50 = vld [vmem:[#allocation5 + $0x694] ss:$8 sps:$4 sm:$0xff]  }
 0x1ee   :  { %3841 = vmatprep.subr.bf16.mxu0 %v6088_v51  ;;  %v6166_v51 = vld [vmem:[#allocation5 + $0xd94] ss:$8 sps:$4 sm:$0xff]  }
 0x1f0   :  { %3541 = vmatpush1.bf16.msra.mxu1 %v6083_v52  ;;  %v6161_v52 = vld [vmem:[#allocation5 + $0x690] ss:$8 sps:$4 sm:$0xff]  }
 0x1f1   :  { %3842 = vmatpush1.bf16.msra.mxu0 %v6086_v53  ;;  %3542 = vmatprep.subr.bf16.mxu1 %v6091_v54  ;;  %v6164_v53 = vld [vmem:[#allocation5 + $0xd90] ss:$8 sps:$4 sm:$0xff]   ;;  %v6169_v54 = vld [vmem:[#allocation5 + $0x6a4] ss:$8 sps:$4 sm:$0xff]  }
 0x1f2   :  { %3843 = vmatprep.subr.bf16.mxu0 %v6094_v55  ;;  %v6172_v55 = vld [vmem:[#allocation5 + $0xda4] ss:$8 sps:$4 sm:$0xff]  }
 0x1f4   :  { %3543 = vmatpush1.bf16.msra.mxu1 %v6089_v56  ;;  %v6167_v56 = vld [vmem:[#allocation5 + $0x6a0] ss:$8 sps:$4 sm:$0xff]  }
 0x1f5   :  { %3844 = vmatpush1.bf16.msra.mxu0 %v6092_v57  ;;  %3544 = vmatprep.subr.bf16.mxu1 %v6097_v58  ;;  %v6170_v57 = vld [vmem:[#allocation5 + $0xda0] ss:$8 sps:$4 sm:$0xff]   ;;  %v6175_v58 = vld [vmem:[#allocation5 + $0x6b4] ss:$8 sps:$4 sm:$0xff]  }
 0x1f6   :  { %3845 = vmatprep.subr.bf16.mxu0 %v6100_v59  ;;  %v6178_v59 = vld [vmem:[#allocation5 + $0xdb4] ss:$8 sps:$4 sm:$0xff]  }
 0x1f8   :  { %3545 = vmatpush1.bf16.msra.mxu1 %v6095_v60  ;;  %v6173_v60 = vld [vmem:[#allocation5 + $0x6b0] ss:$8 sps:$4 sm:$0xff]  }
 0x1f9   :  { %3846 = vmatpush1.bf16.msra.mxu0 %v6098_v61  ;;  %3546 = vmatprep.subr.bf16.mxu1 %v6103_v62  ;;  %v6176_v61 = vld [vmem:[#allocation5 + $0xdb0] ss:$8 sps:$4 sm:$0xff]   ;;  %v6181_v62 = vld [vmem:[#allocation5 + $0x6c4] ss:$8 sps:$4 sm:$0xff]  }
 0x1fa   :  { %3847 = vmatprep.subr.bf16.mxu0 %v6106_v63  ;;  %v6184_v63 = vld [vmem:[#allocation5 + $0xdc4] ss:$8 sps:$4 sm:$0xff]  }
 0x1fc   :  { %3547 = vmatpush1.bf16.msra.mxu1 %v6101_v0  ;;  %v6179_v0 = vld [vmem:[#allocation5 + $0x6c0] ss:$8 sps:$4 sm:$0xff]  }
 0x1fd   :  { %3848 = vmatpush1.bf16.msra.mxu0 %v6104_v1  ;;  %3559 = vmatprep.subr.bf16.mxu1 %v6109_v6  ;;  %v6182_v1 = vld [vmem:[#allocation5 + $0xdc0] ss:$8 sps:$4 sm:$0xff]   ;;  %v6193_v6 = vld [vmem:[#allocation5 + $0x6e4] ss:$8 sps:$4 sm:$0xff]  }
 0x1fe   :  { %3860 = vmatprep.subr.bf16.mxu0 %v6112_v7  ;;  %v6196_v7 = vld [vmem:[#allocation5 + $0xde4] ss:$8 sps:$4 sm:$0xff]  }
 0x1ff   :  { %3549 = vmatmul.mubr.bf16.vlgmr.msra.gmra.mrb[0].mxu1 %v195_v9  ;;  %v6194_v9 = vld [vmem:[#allocation5 + $0xde0] ss:$8 sps:$4 sm:$0xff]  }
 0x200   :  { %3850 = vmatmul.mubr.bf16.vlgmr.msra.gmra.mrb[0].mxu0 %v209_v10  ;;  %3560 = vmatpush1.bf16.msra.mxu1 %v6107_v14  ;;  %v6199_v10 = vld [vmem:[#allocation5 + $0x6f4] ss:$8 sps:$4 sm:$0xff]   ;;  %v133_v14 = vld [vmem:[#allocation2 + $0x60] sm:$0xff] }
 0x201   :  { %3861 = vmatpush1.bf16.msra.mxu0 %v6110_v15  ;;  %3561 = vmatprep.subr.bf16.mxu1 %v6115_v16  ;;  %v165_v15 = vld [vmem:[#allocation2 + $0x160] sm:$0xff]  ;;  %v147_v16 = vld [vmem:[#allocation2 + $0xd0] sm:$0xff] }
 0x202   :  { %3862 = vmatprep.subr.bf16.mxu0 %v6118_v17  ;;  %3591 = vmatprep.mubr.bf16.mxu1 %v198_v18  ;;  %v179_v17 = vld [vmem:[#allocation2 + $0x1d0] sm:$0xff]  ;;  %v6205_v18 = vld [vmem:[#allocation5 + $0xe04] ss:$8 sps:$4 sm:$0xff]  }
 0x203   :  { %3892 = vmatprep.mubr.bf16.mxu0 %v212_v19  ;;  %v150_v19 = vld [vmem:[#allocation2 + $0xe8] sm:$0xff] }
 0x204   :  { %3562 = vmatpush1.bf16.msra.mxu1 %v6113_v20  ;;  %v182_v20 = vld [vmem:[#allocation2 + $0x1e8] sm:$0xff] }
 0x205   :  { %3863 = vmatpush1.bf16.msra.mxu0 %v6116_v21  ;;  %3563 = vmatprep.subr.bf16.mxu1 %v6121_v22  ;;  %v197_v21 = vpack.c.bf16 %v165_v15, %v133_v14  ;;  %v211_v22 = vpack.c.bf16 %v179_v17, %v147_v16  ;;  %v6304_v14 = vld [vmem:[#allocation8 + $0x24] ss:$16 sps:$4 sm:$0xff]   ;;  %v6302_v17 = vld [vmem:[#allocation8 + $0x20] ss:$16 sps:$4 sm:$0xff]  }
 0x206   :  { %3864 = vmatprep.subr.bf16.mxu0 %v6124_v23  ;;  %v6203_v23 = vld [vmem:[#allocation5 + $0xe00] ss:$8 sps:$4 sm:$0xff]   ;;  %v6272_v15 = vld [vmem:[#allocation5 + $0xf70] ss:$8 sps:$4 sm:$0xff]   ;;  %v6277_v16 = vld [vmem:[#allocation5 + $0xf84] ss:$8 sps:$4 sm:$0xff]  }
 0x208   :  { %3564 = vmatpush1.bf16.msra.mxu1 %v6119_v24  ;;  %v214_v24 = vpack.c.bf16 %v182_v20, %v150_v19  ;;  %v6275_v19 = vld [vmem:[#allocation5 + $0xf80] ss:$8 sps:$4 sm:$0xff]   ;;  %v6280_v20 = vld [vmem:[#allocation5 + $0xf94] ss:$8 sps:$4 sm:$0xff]  }
 0x209   :  { %3865 = vmatpush1.bf16.msra.mxu0 %v6122_v25  ;;  %3565 = vmatprep.subr.bf16.mxu1 %v6127_v26  ;;  %v6208_v25 = vld [vmem:[#allocation5 + $0xe14] ss:$8 sps:$4 sm:$0xff]   ;;  %v6206_v26 = vld [vmem:[#allocation5 + $0xe10] ss:$8 sps:$4 sm:$0xff]  }
 0x20a   :  { %3866 = vmatprep.subr.bf16.mxu0 %v6130_v27  ;;  %v6211_v27 = vld [vmem:[#allocation5 + $0xe24] ss:$8 sps:$4 sm:$0xff]  }
 0x20c   :  { %3566 = vmatpush1.bf16.msra.mxu1 %v6125_v28  ;;  %v6209_v28 = vld [vmem:[#allocation5 + $0xe20] ss:$8 sps:$4 sm:$0xff]  }
 0x20d   :  { %3867 = vmatpush1.bf16.msra.mxu0 %v6128_v29  ;;  %3567 = vmatprep.subr.bf16.mxu1 %v6133_v30  ;;  %v6214_v29 = vld [vmem:[#allocation5 + $0xe34] ss:$8 sps:$4 sm:$0xff]   ;;  %v6212_v30 = vld [vmem:[#allocation5 + $0xe30] ss:$8 sps:$4 sm:$0xff]  }
 0x20e   :  { %3868 = vmatprep.subr.bf16.mxu0 %v6136_v31  ;;  %v6217_v31 = vld [vmem:[#allocation5 + $0xe44] ss:$8 sps:$4 sm:$0xff]  }
 0x210   :  { %3568 = vmatpush1.bf16.msra.mxu1 %v6131_v32  ;;  %v6215_v32 = vld [vmem:[#allocation5 + $0xe40] ss:$8 sps:$4 sm:$0xff]  }
 0x211   :  { %3869 = vmatpush1.bf16.msra.mxu0 %v6134_v33  ;;  %3569 = vmatprep.subr.bf16.mxu1 %v6139_v34  ;;  %v6220_v33 = vld [vmem:[#allocation5 + $0xe54] ss:$8 sps:$4 sm:$0xff]   ;;  %v6218_v34 = vld [vmem:[#allocation5 + $0xe50] ss:$8 sps:$4 sm:$0xff]  }
 0x212   :  { %3870 = vmatprep.subr.bf16.mxu0 %v6142_v35  ;;  %v6223_v35 = vld [vmem:[#allocation5 + $0xe64] ss:$8 sps:$4 sm:$0xff]  }
 0x214   :  { %3570 = vmatpush1.bf16.msra.mxu1 %v6137_v36  ;;  %v6221_v36 = vld [vmem:[#allocation5 + $0xe60] ss:$8 sps:$4 sm:$0xff]  }
 0x215   :  { %3871 = vmatpush1.bf16.msra.mxu0 %v6140_v37  ;;  %3571 = vmatprep.subr.bf16.mxu1 %v6145_v38  ;;  %v6226_v37 = vld [vmem:[#allocation5 + $0xe74] ss:$8 sps:$4 sm:$0xff]   ;;  %v6224_v38 = vld [vmem:[#allocation5 + $0xe70] ss:$8 sps:$4 sm:$0xff]  }
 0x216   :  { %3872 = vmatprep.subr.bf16.mxu0 %v6148_v39  ;;  %v6229_v39 = vld [vmem:[#allocation5 + $0xe84] ss:$8 sps:$4 sm:$0xff]  }
 0x218   :  { %3572 = vmatpush1.bf16.msra.mxu1 %v6143_v40  ;;  %v6227_v40 = vld [vmem:[#allocation5 + $0xe80] ss:$8 sps:$4 sm:$0xff]  }
 0x219   :  { %3873 = vmatpush1.bf16.msra.mxu0 %v6146_v41  ;;  %3573 = vmatprep.subr.bf16.mxu1 %v6151_v42  ;;  %v6232_v41 = vld [vmem:[#allocation5 + $0xe94] ss:$8 sps:$4 sm:$0xff]   ;;  %v6230_v42 = vld [vmem:[#allocation5 + $0xe90] ss:$8 sps:$4 sm:$0xff]  }
 0x21a   :  { %3874 = vmatprep.subr.bf16.mxu0 %v6154_v43  ;;  %v6235_v43 = vld [vmem:[#allocation5 + $0xea4] ss:$8 sps:$4 sm:$0xff]  }
 0x21c   :  { %3574 = vmatpush1.bf16.msra.mxu1 %v6149_v44  ;;  %v6233_v44 = vld [vmem:[#allocation5 + $0xea0] ss:$8 sps:$4 sm:$0xff]  }
 0x21d   :  { %3875 = vmatpush1.bf16.msra.mxu0 %v6152_v45  ;;  %3575 = vmatprep.subr.bf16.mxu1 %v6157_v46  ;;  %v6238_v45 = vld [vmem:[#allocation5 + $0xeb4] ss:$8 sps:$4 sm:$0xff]   ;;  %v6236_v46 = vld [vmem:[#allocation5 + $0xeb0] ss:$8 sps:$4 sm:$0xff]  }
 0x21e   :  { %3876 = vmatprep.subr.bf16.mxu0 %v6160_v47  ;;  %v6241_v47 = vld [vmem:[#allocation5 + $0xec4] ss:$8 sps:$4 sm:$0xff]  }
 0x220   :  { %3576 = vmatpush1.bf16.msra.mxu1 %v6155_v48  ;;  %v6239_v48 = vld [vmem:[#allocation5 + $0xec0] ss:$8 sps:$4 sm:$0xff]  }
 0x221   :  { %3877 = vmatpush1.bf16.msra.mxu0 %v6158_v49  ;;  %3577 = vmatprep.subr.bf16.mxu1 %v6163_v50  ;;  %v6244_v49 = vld [vmem:[#allocation5 + $0xed4] ss:$8 sps:$4 sm:$0xff]   ;;  %v6242_v50 = vld [vmem:[#allocation5 + $0xed0] ss:$8 sps:$4 sm:$0xff]  }
 0x222   :  { %3878 = vmatprep.subr.bf16.mxu0 %v6166_v51  ;;  %v6247_v51 = vld [vmem:[#allocation5 + $0xee4] ss:$8 sps:$4 sm:$0xff]  }
 0x224   :  { %3578 = vmatpush1.bf16.msra.mxu1 %v6161_v52  ;;  %v6245_v52 = vld [vmem:[#allocation5 + $0xee0] ss:$8 sps:$4 sm:$0xff]  }
 0x225   :  { %3879 = vmatpush1.bf16.msra.mxu0 %v6164_v53  ;;  %3579 = vmatprep.subr.bf16.mxu1 %v6169_v54  ;;  %v6250_v53 = vld [vmem:[#allocation5 + $0xef4] ss:$8 sps:$4 sm:$0xff]   ;;  %v6248_v54 = vld [vmem:[#allocation5 + $0xef0] ss:$8 sps:$4 sm:$0xff]  }
 0x226   :  { %3880 = vmatprep.subr.bf16.mxu0 %v6172_v55  ;;  %v149_v55 = vld [vmem:[#allocation2 + $0xe0] sm:$0xff] }
 0x228   :  { %3580 = vmatpush1.bf16.msra.mxu1 %v6167_v56  ;;  %v181_v56 = vld [vmem:[#allocation2 + $0x1e0] sm:$0xff] }
 0x229   :  { %3881 = vmatpush1.bf16.msra.mxu0 %v6170_v57  ;;  %3581 = vmatprep.subr.bf16.mxu1 %v6175_v58  ;;  %v6253_v57 = vld [vmem:[#allocation5 + $0xf04] ss:$8 sps:$4 sm:$0xff]   ;;  %v152_v58 = vld [vmem:[#allocation2 + $0xf8] sm:$0xff] }
 0x22a   :  { %3882 = vmatprep.subr.bf16.mxu0 %v6178_v59  ;;  %v184_v59 = vld [vmem:[#allocation2 + $0x1f8] sm:$0xff] }
 0x22c   :  { %3582 = vmatpush1.bf16.msra.mxu1 %v6173_v60  ;;  %v213_v60 = vpack.c.bf16 %v181_v56, %v149_v55  ;;  %v6332_v55 = vld [vmem:[#allocation8 + $0x160] ss:$16 sps:$4 sm:$0xff]   ;;  %v6337_v56 = vld [vmem:[#allocation8 + $0x184] ss:$16 sps:$4 sm:$0xff]  }
 0x22d   :  { %3883 = vmatpush1.bf16.msra.mxu0 %v6176_v61  ;;  %3583 = vmatprep.subr.bf16.mxu1 %v6181_v62  ;;  %v6251_v61 = vld [vmem:[#allocation5 + $0xf00] ss:$8 sps:$4 sm:$0xff]   ;;  %v216_v62 = vpack.c.bf16 %v184_v59, %v152_v58 }
 0x22e   :  { %3884 = vmatprep.subr.bf16.mxu0 %v6184_v63  ;;  %v6256_v63 = vld [vmem:[#allocation5 + $0xf14] ss:$8 sps:$4 sm:$0xff]  }
 0x22f   :  { %v6340_v58 = vld [vmem:[#allocation8 + $0x1a4] ss:$16 sps:$4 sm:$0xff]   ;;  %v6338_v59 = vld [vmem:[#allocation8 + $0x1a0] ss:$16 sps:$4 sm:$0xff]  }
 0x230   :  { %3584 = vmatpush1.bf16.msra.mxu1 %v6179_v0  ;;  %v6254_v0 = vld [vmem:[#allocation5 + $0xf10] ss:$8 sps:$4 sm:$0xff]  }
 0x231   :  { %3885 = vmatpush1.bf16.msra.mxu0 %v6182_v1  ;;  %3585 = vmatprep.subr.bf16.mxu1 %v6187_v2  ;;  %v6259_v1 = vld [vmem:[#allocation5 + $0xf24] ss:$8 sps:$4 sm:$0xff]   ;;  %v6257_v2 = vld [vmem:[#allocation5 + $0xf20] ss:$8 sps:$4 sm:$0xff]  }
 0x232   :  { %3886 = vmatprep.subr.bf16.mxu0 %v6190_v3  ;;  %v6262_v3 = vld [vmem:[#allocation5 + $0xf34] ss:$8 sps:$4 sm:$0xff]  }
 0x234   :  { %3586 = vmatpush1.bf16.msra.mxu1 %v6185_v4  ;;  %v6260_v4 = vld [vmem:[#allocation5 + $0xf30] ss:$8 sps:$4 sm:$0xff]  }
 0x235   :  { %3887 = vmatpush1.bf16.msra.mxu0 %v6188_v5  ;;  %3587 = vmatprep.subr.bf16.mxu1 %v6193_v6  ;;  %v6265_v5 = vld [vmem:[#allocation5 + $0xf44] ss:$8 sps:$4 sm:$0xff]   ;;  %v6263_v6 = vld [vmem:[#allocation5 + $0xf40] ss:$8 sps:$4 sm:$0xff]  }
 0x236   :  { %3888 = vmatprep.subr.bf16.mxu0 %v6196_v7  ;;  %v6268_v7 = vld [vmem:[#allocation5 + $0xf54] ss:$8 sps:$4 sm:$0xff]  }
 0x238   :  { %3588 = vmatpush1.bf16.msra.mxu1 %v6191_v8  ;;  %v6266_v8 = vld [vmem:[#allocation5 + $0xf50] ss:$8 sps:$4 sm:$0xff]  }
 0x239   :  { %3889 = vmatpush1.bf16.msra.mxu0 %v6194_v9  ;;  %3589 = vmatprep.subr.bf16.mxu1 %v6199_v10  ;;  %v6271_v9 = vld [vmem:[#allocation5 + $0xf64] ss:$8 sps:$4 sm:$0xff]   ;;  %v6269_v10 = vld [vmem:[#allocation5 + $0xf60] ss:$8 sps:$4 sm:$0xff]  }
 0x23a   :  { %3890 = vmatprep.subr.bf16.mxu0 %v6202_v11  ;;  %v6274_v11 = vld [vmem:[#allocation5 + $0xf74] ss:$8 sps:$4 sm:$0xff]  }
 0x23c   :  { %3590 = vmatpush1.bf16.msra.mxu1 %v6197_v12  ;;  %v6299_v12 = vld [vmem:[#allocation8] ss:$16 sps:$4 sm:$0xff]  }
 0x23d   :  { %3891 = vmatpush1.bf16.msra.mxu0 %v6200_v13  ;;  %v6301_v13 = vld [vmem:[#allocation8 + $0x4] ss:$16 sps:$4 sm:$0xff]  }
 0x23e   :  { %3903 = vmatprep.subr.bf16.mxu0 %v6205_v18  ;;  %4397 = vmatprep.subr.bf16.mxu1 %v6301_v13  ;;  %v6307_v18 = vld [vmem:[#allocation8 + $0x44] ss:$16 sps:$4 sm:$0xff]  }
 0x23f   :  { %3592 = vmatmul.mubr.bf16.vlgmr.msra.gmra.mrb[0].mxu1 %v197_v21  ;;  %v6305_v21 = vld [vmem:[#allocation8 + $0x40] ss:$16 sps:$4 sm:$0xff]  }
 0x240   :  { %3893 = vmatmul.mubr.bf16.vlgmr.msra.gmra.mrb[0].mxu0 %v211_v22  ;;  %4398 = vmatpush1.bf16.msra.mxu1 %v6299_v12  ;;  %v6310_v22 = vld [vmem:[#allocation8 + $0x64] ss:$16 sps:$4 sm:$0xff]  }
 0x241   :  { %3904 = vmatpush1.bf16.msra.mxu0 %v6203_v23  ;;  %3935 = vmatprep.mubr.bf16.mxu0 %v214_v24  ;;  %v6278_v23 = vld [vmem:[#allocation5 + $0xf90] ss:$8 sps:$4 sm:$0xff]   ;;  %v6283_v24 = vld [vmem:[#allocation5 + $0xfa4] ss:$8 sps:$4 sm:$0xff]  }
 0x242   :  { %3905 = vmatprep.subr.bf16.mxu0 %v6208_v25  ;;  %4399 = vmatprep.subr.bf16.mxu1 %v6304_v14  ;;  %v6308_v25 = vld [vmem:[#allocation8 + $0x60] ss:$16 sps:$4 sm:$0xff]  }
 0x244   :  { %4400 = vmatpush1.bf16.msra.mxu1 %v6302_v17 }
 0x245   :  { %3906 = vmatpush1.bf16.msra.mxu0 %v6206_v26  ;;  %4401 = vmatprep.subr.bf16.mxu1 %v6307_v18  ;;  %v6313_v26 = vld [vmem:[#allocation8 + $0x84] ss:$16 sps:$4 sm:$0xff]  }
 0x246   :  { %3907 = vmatprep.subr.bf16.mxu0 %v6211_v27  ;;  %v6281_v27 = vld [vmem:[#allocation5 + $0xfa0] ss:$8 sps:$4 sm:$0xff]  }
 0x248   :  { %4402 = vmatpush1.bf16.msra.mxu1 %v6305_v21 }
 0x249   :  { %3908 = vmatpush1.bf16.msra.mxu0 %v6209_v28  ;;  %4403 = vmatprep.subr.bf16.mxu1 %v6310_v22  ;;  %v6286_v28 = vld [vmem:[#allocation5 + $0xfb4] ss:$8 sps:$4 sm:$0xff]  }
 0x24a   :  { %3909 = vmatprep.subr.bf16.mxu0 %v6214_v29  ;;  %v6311_v29 = vld [vmem:[#allocation8 + $0x80] ss:$16 sps:$4 sm:$0xff]  }
 0x24c   :  { %4404 = vmatpush1.bf16.msra.mxu1 %v6308_v25 }
 0x24d   :  { %3910 = vmatpush1.bf16.msra.mxu0 %v6212_v30  ;;  %4405 = vmatprep.subr.bf16.mxu1 %v6313_v26  ;;  %v6316_v30 = vld [vmem:[#allocation8 + $0xa4] ss:$16 sps:$4 sm:$0xff]   ;;  %v6347_v26 = vld [vmem:[#allocation8 + $0x8] ss:$16 sps:$4 sm:$0xff]  }
 0x24e   :  { %3911 = vmatprep.subr.bf16.mxu0 %v6217_v31  ;;  %v6284_v31 = vld [vmem:[#allocation5 + $0xfb0] ss:$8 sps:$4 sm:$0xff]  }
 0x250   :  { %4406 = vmatpush1.bf16.msra.mxu1 %v6311_v29  ;;  %v6355_v29 = vld [vmem:[#allocation8 + $0x4c] ss:$16 sps:$4 sm:$0xff]  }
 0x251   :  { %3912 = vmatpush1.bf16.msra.mxu0 %v6215_v32  ;;  %v6289_v32 = vld [vmem:[#allocation5 + $0xfc4] ss:$8 sps:$4 sm:$0xff]   ;;  %4407 = vmatprep.subr.bf16.mxu1 %v6316_v30 }
 0x252   :  { %3913 = vmatprep.subr.bf16.mxu0 %v6220_v33  ;;  %v6314_v33 = vld [vmem:[#allocation8 + $0xa0] ss:$16 sps:$4 sm:$0xff]   ;;  %v6353_v30 = vld [vmem:[#allocation8 + $0x48] ss:$16 sps:$4 sm:$0xff]  }
 0x254   :  { %4408 = vmatpush1.bf16.msra.mxu1 %v6314_v33  ;;  %v6361_v33 = vld [vmem:[#allocation8 + $0x8c] ss:$16 sps:$4 sm:$0xff]  }
 0x255   :  { %3914 = vmatpush1.bf16.msra.mxu0 %v6218_v34  ;;  %v6319_v34 = vld [vmem:[#allocation8 + $0xc4] ss:$16 sps:$4 sm:$0xff]  }
 0x256   :  { %3915 = vmatprep.subr.bf16.mxu0 %v6223_v35  ;;  %v6287_v35 = vld [vmem:[#allocation5 + $0xfc0] ss:$8 sps:$4 sm:$0xff]   ;;  %4409 = vmatprep.subr.bf16.mxu1 %v6319_v34 }
 0x257   :  { %v6359_v34 = vld [vmem:[#allocation8 + $0x88] ss:$16 sps:$4 sm:$0xff]  }
 0x259   :  { %3916 = vmatpush1.bf16.msra.mxu0 %v6221_v36  ;;  %v6292_v36 = vld [vmem:[#allocation5 + $0xfd4] ss:$8 sps:$4 sm:$0xff]  }
 0x25a   :  { %3917 = vmatprep.subr.bf16.mxu0 %v6226_v37  ;;  %v6317_v37 = vld [vmem:[#allocation8 + $0xc0] ss:$16 sps:$4 sm:$0xff]  }
 0x25b   :  { %4410 = vmatpush1.bf16.msra.mxu1 %v6317_v37  ;;  %v6367_v37 = vld [vmem:[#allocation8 + $0xcc] ss:$16 sps:$4 sm:$0xff]  }
 0x25d   :  { %3918 = vmatpush1.bf16.msra.mxu0 %v6224_v38  ;;  %v6322_v38 = vld [vmem:[#allocation8 + $0xe4] ss:$16 sps:$4 sm:$0xff]  }
 0x25e   :  { %3919 = vmatprep.subr.bf16.mxu0 %v6229_v39  ;;  %v6290_v39 = vld [vmem:[#allocation5 + $0xfd0] ss:$8 sps:$4 sm:$0xff]   ;;  %4411 = vmatprep.subr.bf16.mxu1 %v6322_v38 }
 0x25f   :  { %v6365_v38 = vld [vmem:[#allocation8 + $0xc8] ss:$16 sps:$4 sm:$0xff]  }
 0x261   :  { %3920 = vmatpush1.bf16.msra.mxu0 %v6227_v40  ;;  %v6295_v40 = vld [vmem:[#allocation5 + $0xfe4] ss:$8 sps:$4 sm:$0xff]  }
 0x262   :  { %3921 = vmatprep.subr.bf16.mxu0 %v6232_v41  ;;  %v6320_v41 = vld [vmem:[#allocation8 + $0xe0] ss:$16 sps:$4 sm:$0xff]  }
 0x263   :  { %4412 = vmatpush1.bf16.msra.mxu1 %v6320_v41  ;;  %v6373_v41 = vld [vmem:[#allocation8 + $0x10c] ss:$16 sps:$4 sm:$0xff]  }
 0x265   :  { %3922 = vmatpush1.bf16.msra.mxu0 %v6230_v42  ;;  %v6325_v42 = vld [vmem:[#allocation8 + $0x104] ss:$16 sps:$4 sm:$0xff]  }
 0x266   :  { %3923 = vmatprep.subr.bf16.mxu0 %v6235_v43  ;;  %v6293_v43 = vld [vmem:[#allocation5 + $0xfe0] ss:$8 sps:$4 sm:$0xff]   ;;  %4413 = vmatprep.subr.bf16.mxu1 %v6325_v42 }
 0x267   :  { %v6371_v42 = vld [vmem:[#allocation8 + $0x108] ss:$16 sps:$4 sm:$0xff]  }
 0x269   :  { %3924 = vmatpush1.bf16.msra.mxu0 %v6233_v44  ;;  %v6298_v44 = vld [vmem:[#allocation5 + $0xff4] ss:$8 sps:$4 sm:$0xff]  }
 0x26a   :  { %3925 = vmatprep.subr.bf16.mxu0 %v6238_v45  ;;  %v6323_v45 = vld [vmem:[#allocation8 + $0x100] ss:$16 sps:$4 sm:$0xff]  }
 0x26b   :  { %4414 = vmatpush1.bf16.msra.mxu1 %v6323_v45  ;;  %v6379_v45 = vld [vmem:[#allocation8 + $0x14c] ss:$16 sps:$4 sm:$0xff]  }
 0x26d   :  { %3926 = vmatpush1.bf16.msra.mxu0 %v6236_v46  ;;  %v6328_v46 = vld [vmem:[#allocation8 + $0x124] ss:$16 sps:$4 sm:$0xff]  }
 0x26e   :  { %3927 = vmatprep.subr.bf16.mxu0 %v6241_v47  ;;  %v6296_v47 = vld [vmem:[#allocation5 + $0xff0] ss:$8 sps:$4 sm:$0xff]   ;;  %4415 = vmatprep.subr.bf16.mxu1 %v6328_v46 }
 0x26f   :  { %v6377_v46 = vld [vmem:[#allocation8 + $0x148] ss:$16 sps:$4 sm:$0xff]  }
 0x271   :  { %3928 = vmatpush1.bf16.msra.mxu0 %v6239_v48  ;;  %v151_v48 = vld [vmem:[#allocation2 + $0xf0] sm:$0xff] }
 0x272   :  { %3929 = vmatprep.subr.bf16.mxu0 %v6244_v49  ;;  %v183_v49 = vld [vmem:[#allocation2 + $0x1f0] sm:$0xff] }
 0x275   :  { %3930 = vmatpush1.bf16.msra.mxu0 %v6242_v50  ;;  %v6326_v50 = vld [vmem:[#allocation8 + $0x120] ss:$16 sps:$4 sm:$0xff]  }
 0x276   :  { %3931 = vmatprep.subr.bf16.mxu0 %v6247_v51  ;;  %v6331_v51 = vld [vmem:[#allocation8 + $0x144] ss:$16 sps:$4 sm:$0xff]   ;;  %4416 = vmatpush1.bf16.msra.mxu1 %v6326_v50  ;;  %v6383_v50 = vld [vmem:[#allocation8 + $0x188] ss:$16 sps:$4 sm:$0xff]  }
 0x277   :  { %4417 = vmatprep.subr.bf16.mxu1 %v6331_v51  ;;  %v6388_v51 = vld [vmem:[#allocation8 + $0x1ac] ss:$16 sps:$4 sm:$0xff]  }
 0x279   :  { %3932 = vmatpush1.bf16.msra.mxu0 %v6245_v52  ;;  %v215_v52 = vpack.c.bf16 %v183_v49, %v151_v48  ;;  %v6380_v48 = vld [vmem:[#allocation8 + $0x168] ss:$16 sps:$4 sm:$0xff]   ;;  %v6385_v49 = vld [vmem:[#allocation8 + $0x18c] ss:$16 sps:$4 sm:$0xff]  }
 0x27a   :  { %3933 = vmatprep.subr.bf16.mxu0 %v6250_v53  ;;  %v6329_v53 = vld [vmem:[#allocation8 + $0x140] ss:$16 sps:$4 sm:$0xff]  }
 0x27b   :  { %4418 = vmatpush1.bf16.msra.mxu1 %v6329_v53  ;;  %v6391_v53 = vld [vmem:[#allocation8 + $0x1cc] ss:$16 sps:$4 sm:$0xff]  }
 0x27d   :  { %3934 = vmatpush1.bf16.msra.mxu0 %v6248_v54  ;;  %v6334_v54 = vld [vmem:[#allocation8 + $0x164] ss:$16 sps:$4 sm:$0xff]  }
 0x27e   :  { %3946 = vmatprep.subr.bf16.mxu0 %v6253_v57  ;;  %4419 = vmatprep.subr.bf16.mxu1 %v6334_v54  ;;  %v6335_v57 = vld [vmem:[#allocation8 + $0x180] ss:$16 sps:$4 sm:$0xff]   ;;  %v6389_v54 = vld [vmem:[#allocation8 + $0x1c8] ss:$16 sps:$4 sm:$0xff]  }
 0x27f   :  { %4420 = vmatpush1.bf16.msra.mxu1 %v6332_v55  ;;  %v6394_v55 = vld [vmem:[#allocation8 + $0x1ec] ss:$16 sps:$4 sm:$0xff]  }
 0x280   :  { %3936 = vmatmul.mubr.bf16.vlgmr.msra.gmra.mrb[0].mxu0 %v213_v60  ;;  %4421 = vmatprep.subr.bf16.mxu1 %v6337_v56  ;;  %v6343_v60 = vld [vmem:[#allocation8 + $0x1c4] ss:$16 sps:$4 sm:$0xff]   ;;  %v6392_v56 = vld [vmem:[#allocation8 + $0x1e8] ss:$16 sps:$4 sm:$0xff]  }
 0x281   :  { %3947 = vmatpush1.bf16.msra.mxu0 %v6251_v61  ;;  %3978 = vmatprep.mubr.bf16.mxu0 %v216_v62  ;;  %v6341_v61 = vld [vmem:[#allocation8 + $0x1c0] ss:$16 sps:$4 sm:$0xff]  }
 0x282   :  { %3948 = vmatprep.subr.bf16.mxu0 %v6256_v63 }
 0x283   :  { %4422 = vmatpush1.bf16.msra.mxu1 %v6335_v57  ;;  %v4524_v57 = vld [vmem:[#allocation11 + $0x8] sm:$0xff] }
 0x284   :  { %4423 = vmatprep.subr.bf16.mxu1 %v6340_v58  ;;  %v4526_v58 = vld [vmem:[#allocation11 + $0x18] sm:$0xff] }
 0x285   :  { %3949 = vmatpush1.bf16.msra.mxu0 %v6254_v0 }
 0x286   :  { %3950 = vmatprep.subr.bf16.mxu0 %v6259_v1  ;;  %v6346_v1 = vld [vmem:[#allocation8 + $0x1e4] ss:$16 sps:$4 sm:$0xff]  }
 0x287   :  { %4424 = vmatpush1.bf16.msra.mxu1 %v6338_v59  ;;  %v5417_v59 = vpack.c.bf16 %v4526_v58, %v4524_v57 }
 0x288   :  { %4425 = vmatprep.subr.bf16.mxu1 %v6343_v60  ;;  %v6823_v60 = vld [vmem:[#allocation10] sm:$0xf] }
 0x289   :  { %3951 = vmatpush1.bf16.msra.mxu0 %v6257_v2 }
 0x28a   :  { %3952 = vmatprep.subr.bf16.mxu0 %v6262_v3  ;;  %v6344_v3 = vld [vmem:[#allocation8 + $0x1e0] ss:$16 sps:$4 sm:$0xff]  }
 0x28b   :  { %4426 = vmatpush1.bf16.msra.mxu1 %v6341_v61 }
 0x28c   :  { %4427 = vmatprep.subr.bf16.mxu1 %v6346_v1 }
 0x28d   :  { %3953 = vmatpush1.bf16.msra.mxu0 %v6260_v4  ;;  %v6349_v4 = vld [vmem:[#allocation8 + $0xc] ss:$16 sps:$4 sm:$0xff]  }
 0x28e   :  { %3954 = vmatprep.subr.bf16.mxu0 %v6265_v5  ;;  %v731_v5 = vlaneseq }
 0x28f   :  { %4428 = vmatpush1.bf16.msra.mxu1 %v6344_v3 }
 0x290   :  { %4440 = vmatprep.subr.bf16.mxu1 %v6349_v4 }
 0x291   :  { %3955 = vmatpush1.bf16.msra.mxu0 %v6263_v6  ;;  %v6811_v6 = vshrl.u32 %v731_v5, 7 }
 0x292   :  { %3956 = vmatprep.subr.bf16.mxu0 %v6268_v7 }
 0x293   :  { %v733_v7 = vsub.s32 0, %v6811_v6 }
 0x295   :  { %3957 = vmatpush1.bf16.msra.mxu0 %v6266_v8  ;;  %v729_v8 = vld [vmem:[#allocation7] sm:$0x3]  ;;  %v4060_v61 = vrot.slane %v6823_v60, %v733_v7 }
 0x296   :  { %3958 = vmatprep.subr.bf16.mxu0 %v6271_v9  ;;  %v737_v9 = vsub.s32 1, %v6811_v6 }
 0x299   :  { %3959 = vmatpush1.bf16.msra.mxu0 %v6269_v10  ;;  %v734_v10 = vrot.slane %v729_v8, %v733_v7 }
 0x29a   :  { %3960 = vmatprep.subr.bf16.mxu0 %v6274_v11  ;;  %v738_v11 = vrot.slane %v729_v8, %v737_v9  ;;  %v4523_v8 = vld [vmem:[#allocation11] sm:$0xff] }
 0x29d   :  { %3961 = vmatpush1.bf16.msra.mxu0 %v6272_v15 }
 0x29e   :  { %3962 = vmatprep.subr.bf16.mxu0 %v6277_v16 }
 0x2a1   :  { %3963 = vmatpush1.bf16.msra.mxu0 %v6275_v19 }
 0x2a2   :  { %3964 = vmatprep.subr.bf16.mxu0 %v6280_v20 }
 0x2a5   :  { %3965 = vmatpush1.bf16.msra.mxu0 %v6278_v23 }
 0x2a6   :  { %3966 = vmatprep.subr.bf16.mxu0 %v6283_v24 }
 0x2a9   :  { %3967 = vmatpush1.bf16.msra.mxu0 %v6281_v27  ;;  %v6352_v27 = vld [vmem:[#allocation8 + $0x2c] ss:$16 sps:$4 sm:$0xff]  }
 0x2aa   :  { %3968 = vmatprep.subr.bf16.mxu0 %v6286_v28  ;;  %v6350_v28 = vld [vmem:[#allocation8 + $0x28] ss:$16 sps:$4 sm:$0xff]  }
 0x2ad   :  { %3969 = vmatpush1.bf16.msra.mxu0 %v6284_v31  ;;  %v6358_v31 = vld [vmem:[#allocation8 + $0x6c] ss:$16 sps:$4 sm:$0xff]  }
 0x2ae   :  { %3970 = vmatprep.subr.bf16.mxu0 %v6289_v32  ;;  %v6356_v32 = vld [vmem:[#allocation8 + $0x68] ss:$16 sps:$4 sm:$0xff]  }
 0x2b1   :  { %3971 = vmatpush1.bf16.msra.mxu0 %v6287_v35  ;;  %v6364_v35 = vld [vmem:[#allocation8 + $0xac] ss:$16 sps:$4 sm:$0xff]  }
 0x2b2   :  { %3972 = vmatprep.subr.bf16.mxu0 %v6292_v36  ;;  %v6362_v36 = vld [vmem:[#allocation8 + $0xa8] ss:$16 sps:$4 sm:$0xff]  }
 0x2b5   :  { %3973 = vmatpush1.bf16.msra.mxu0 %v6290_v39  ;;  %v6370_v39 = vld [vmem:[#allocation8 + $0xec] ss:$16 sps:$4 sm:$0xff]  }
 0x2b6   :  { %3974 = vmatprep.subr.bf16.mxu0 %v6295_v40  ;;  %v6368_v40 = vld [vmem:[#allocation8 + $0xe8] ss:$16 sps:$4 sm:$0xff]  }
 0x2b9   :  { %3975 = vmatpush1.bf16.msra.mxu0 %v6293_v43  ;;  %v6376_v43 = vld [vmem:[#allocation8 + $0x12c] ss:$16 sps:$4 sm:$0xff]  }
 0x2ba   :  { %3976 = vmatprep.subr.bf16.mxu0 %v6298_v44  ;;  %v6374_v44 = vld [vmem:[#allocation8 + $0x128] ss:$16 sps:$4 sm:$0xff]  }
 0x2bd   :  { %3977 = vmatpush1.bf16.msra.mxu0 %v6296_v47  ;;  %v6382_v47 = vld [vmem:[#allocation8 + $0x16c] ss:$16 sps:$4 sm:$0xff]  }
 0x2be   :  { %5418 = vmatprep.subr.bf16.mxu0 %v5417_v59 }
 0x2c0   :  { %3979 = vmatmul.mubr.bf16.vlgmr.msra.gmra.mrb[0].mxu0 %v215_v52  ;;  %v6386_v52 = vld [vmem:[#allocation8 + $0x1a8] ss:$16 sps:$4 sm:$0xff]  }
 0x312   :  { %v3593_v62 = vpop.f32.mrb[0].mxu1 }
 0x313   :  { %v3595_v63 = vpop.f32.mrb[1].mxu1  ;;  %v5449_v12 = vadd.f32 %v3593_v62, %v734_v10  ;;  %v4064_v62 = vrot.slane %v6823_v60, %v737_v9 }
 0x314   :  { %v3597_v0 = vpop.f32.mrb[2].mxu1  ;;  %v5451_v13 = vadd.f32 %v3595_v63, %v738_v11 }
 0x315   :  { %v3599_v2 = vpop.f32.mrb[3].mxu1  ;;  %v5453_v15 = vadd.f32 %v3597_v0, %v734_v10  ;;  %v4525_v10 = vld [vmem:[#allocation11 + $0x10] sm:$0xff] }
 0x316   :  { %v5455_v18 = vadd.f32 %v3599_v2, %v738_v11  ;;  %v5419_v9 = vpack.c.bf16 %v4525_v10, %v4523_v8  ;;  %v4528_v11 = vld [vmem:[#allocation11 + $0x28] sm:$0xff] }
 0x318   :  { %5420 = vmatpush1.bf16.msra.mxu0 %v5419_v9 }
 0x393   :  { %v3980_v14 = vpop.f32.mrb[0].mxu0 }
 0x394   :  { %v5450_v16 = vadd.f32 %v5449_v12, %v3980_v14  ;;  %v3982_v17 = vpop.f32.mrb[1].mxu0  ;;  %v4530_v12 = vld [vmem:[#allocation11 + $0x38] sm:$0xff]  ;;  %v4527_v14 = vld [vmem:[#allocation11 + $0x20] sm:$0xff] }
 0x395   :  { %v5452_v19 = vadd.f32 %v5451_v13, %v3982_v17  ;;  %v3984_v20 = vpop.f32.mrb[2].mxu0  ;;  %v5421_v13 = vpack.c.bf16 %v4530_v12, %v4528_v11  ;;  %v4532_v17 = vld [vmem:[#allocation11 + $0x48] sm:$0xff] }
 0x396   :  { %v5454_v21 = vadd.f32 %v5453_v15, %v3984_v20  ;;  %v3986_v22 = vpop.f32.mrb[3].mxu0  ;;  %v4529_v15 = vld [vmem:[#allocation11 + $0x30] sm:$0xff] }
 0x397   :  { %v5456_v23 = vadd.f32 %v5455_v18, %v3986_v22  ;;  %5422 = vmatprep.subr.bf16.mxu0 %v5421_v13  ;;  %v4534_v18 = vld [vmem:[#allocation11 + $0x58] sm:$0xff]  ;;  %v4536_v22 = vld [vmem:[#allocation11 + $0x68] sm:$0xff] }
 0x398   :  { %v6819_v24 = vpack.c.bf16 %v5454_v21, %v5450_v16  ;;  %v5423_v16 = vpack.c.bf16 %v4529_v15, %v4527_v14  ;;  %v5425_v20 = vpack.c.bf16 %v4534_v18, %v4532_v17  ;;  %v4533_v21 = vld [vmem:[#allocation11 + $0x50] sm:$0xff] }
 0x399   :  { %v3990_v25 = vpack.c.bf16 %v5456_v23, %v5452_v19  ;;  %v4531_v19 = vld [vmem:[#allocation11 + $0x40] sm:$0xff]  ;;  %v4538_v23 = vld [vmem:[#allocation11 + $0x78] sm:$0xff] }
 0x39a   :  { %5424 = vmatpush1.bf16.msra.mxu0 %v5423_v16  ;;  %v4067_v16 = vsub.s32 2, %v6811_v6 }
 0x39b   :  { %4429 = vmatprep.mubr.bf16.mxu1 %v3990_v25  ;;  %5426 = vmatprep.subr.bf16.mxu0 %v5425_v20 }
 0x39c   :  { %4430 = vmatmul.mubr.bf16.vlgmr.msra.gmra.mrb[4].mxu1 %v6819_v24  ;;  %v4068_v17 = vrot.slane %v6823_v60, %v4067_v16 }
 0x39d   :  { %4441 = vmatpush1.bf16.msra.mxu1 %v6347_v26  ;;  %4472 = vmatprep.mubr.bf16.mxu1 %v3990_v25  ;;  %v5427_v25 = vpack.c.bf16 %v4533_v21, %v4531_v19  ;;  %v5429_v26 = vpack.c.bf16 %v4538_v23, %v4536_v22 }
 0x39e   :  { %4442 = vmatprep.subr.bf16.mxu1 %v6352_v27  ;;  %v4535_v27 = vld [vmem:[#allocation11 + $0x60] sm:$0xff] }
 0x39f   :  { %5428 = vmatpush1.bf16.msra.mxu0 %v5427_v25 }
 0x3a0   :  { %5430 = vmatprep.subr.bf16.mxu0 %v5429_v26 }
 0x3a1   :  { %4443 = vmatpush1.bf16.msra.mxu1 %v6350_v28  ;;  %v4537_v28 = vld [vmem:[#allocation11 + $0x70] sm:$0xff] }
 0x3a2   :  { %4444 = vmatprep.subr.bf16.mxu1 %v6355_v29 }
 0x3a5   :  { %4445 = vmatpush1.bf16.msra.mxu1 %v6353_v30  ;;  %v5431_v30 = vpack.c.bf16 %v4537_v28, %v4535_v27 }
 0x3a6   :  { %4446 = vmatprep.subr.bf16.mxu1 %v6358_v31 }
 0x3a7   :  { %5432 = vmatpush1.bf16.msra.mxu0 %v5431_v30 }
 0x3a9   :  { %4447 = vmatpush1.bf16.msra.mxu1 %v6356_v32  ;;  %v4071_v32 = vsub.s32 3, %v6811_v6 }
 0x3aa   :  { %4448 = vmatprep.subr.bf16.mxu1 %v6361_v33 }
 0x3ab   :  { %v4072_v33 = vrot.slane %v6823_v60, %v4071_v32 }
 0x3ad   :  { %4449 = vmatpush1.bf16.msra.mxu1 %v6359_v34 }
 0x3ae   :  { %4450 = vmatprep.subr.bf16.mxu1 %v6364_v35 }
 0x3b1   :  { %4451 = vmatpush1.bf16.msra.mxu1 %v6362_v36 }
 0x3b2   :  { %4452 = vmatprep.subr.bf16.mxu1 %v6367_v37 }
 0x3b5   :  { %4453 = vmatpush1.bf16.msra.mxu1 %v6365_v38 }
 0x3b6   :  { %4454 = vmatprep.subr.bf16.mxu1 %v6370_v39  ;;  %v4663_v39 = vld [vmem:[#allocation13] sm:$0xff] }
 0x3b9   :  { %4455 = vmatpush1.bf16.msra.mxu1 %v6368_v40  ;;  %v4664_v40 = vld [vmem:[#allocation13 + $0x8] sm:$0xff] }
 0x3ba   :  { %4456 = vmatprep.subr.bf16.mxu1 %v6373_v41  ;;  %v5433_v41 = vpack.c.bf16 %v4664_v40, %v4663_v39 }
 0x3bd   :  { %4457 = vmatpush1.bf16.msra.mxu1 %v6371_v42 }
 0x3be   :  { %4458 = vmatprep.subr.bf16.mxu1 %v6376_v43  ;;  %v4665_v43 = vld [vmem:[#allocation13 + $0x10] sm:$0xff] }
 0x3c1   :  { %4459 = vmatpush1.bf16.msra.mxu1 %v6374_v44  ;;  %v4666_v44 = vld [vmem:[#allocation13 + $0x18] sm:$0xff] }
 0x3c2   :  { %4460 = vmatprep.subr.bf16.mxu1 %v6379_v45  ;;  %v5437_v45 = vpack.c.bf16 %v4666_v44, %v4665_v43 }
 0x3c5   :  { %4461 = vmatpush1.bf16.msra.mxu1 %v6377_v46  ;;  %v4667_v46 = vld [vmem:[#allocation13 + $0x20] sm:$0xff] }
 0x3c6   :  { %4462 = vmatprep.subr.bf16.mxu1 %v6382_v47  ;;  %v4668_v47 = vld [vmem:[#allocation13 + $0x28] sm:$0xff] }
 0x3c9   :  { %4463 = vmatpush1.bf16.msra.mxu1 %v6380_v48  ;;  %v4669_v48 = vld [vmem:[#allocation13 + $0x30] sm:$0xff] }
 0x3ca   :  { %4464 = vmatprep.subr.bf16.mxu1 %v6385_v49  ;;  %v5441_v49 = vpack.c.bf16 %v4668_v47, %v4667_v46 }
 0x3cd   :  { %4465 = vmatpush1.bf16.msra.mxu1 %v6383_v50  ;;  %v4670_v50 = vld [vmem:[#allocation13 + $0x38] sm:$0xff] }
 0x3ce   :  { %4466 = vmatprep.subr.bf16.mxu1 %v6388_v51  ;;  %v5445_v51 = vpack.c.bf16 %v4670_v50, %v4669_v48 }
 0x3d1   :  { %4467 = vmatpush1.bf16.msra.mxu1 %v6386_v52 }
 0x3d2   :  { %4468 = vmatprep.subr.bf16.mxu1 %v6391_v53 }
 0x3d5   :  { %4469 = vmatpush1.bf16.msra.mxu1 %v6389_v54 }
 0x3d6   :  { %4470 = vmatprep.subr.bf16.mxu1 %v6394_v55 }
 0x3d9   :  { %4471 = vmatpush1.bf16.msra.mxu1 %v6392_v56 }
 0x3da   :  { %5434 = vmatprep.subr.bf16.mxu1 %v5433_v41 }
 0x3dc   :  { %4473 = vmatmul.mubr.bf16.vlgmr.msra.gmra.mrb[8].mxu1 %v6819_v24  ;;  %v6665_v24 = vmov 0.0  }
 0x3dd   :  { %4610 = vmatprep.mubr.f32.mxu0 %v6665_v24  ;;  %5436 = vmatpush3.bf16.msra.mxu1 %v5433_v41 }
 0x3de   :  { %5438 = vmatprep.subr.bf16.mxu1 %v5437_v45 }
 0x3e1   :  { %5440 = vmatpush3.bf16.msra.mxu1 %v5437_v45 }
 0x3e2   :  { %5442 = vmatprep.subr.bf16.mxu1 %v5441_v49 }
 0x3e5   :  { %5444 = vmatpush3.bf16.msra.mxu1 %v5441_v49 }
 0x3e6   :  { %5446 = vmatprep.subr.bf16.mxu1 %v5445_v51 }
 0x3e9   :  { %5448 = vmatpush3.bf16.msra.mxu1 %v5445_v51 }
 0x46f   :  { %v4431_v63 = vpop.f32.mrb[4].mxu1 }
 0x470   :  { %v6831_v0 = vadd.f32 %v4431_v63, %v4060_v61  ;;  %v4433_v1 = vpop.f32.mrb[5].mxu1 }
 0x471   :  { %v6833_v2 = vadd.f32 %v4433_v1, %v4064_v62  ;;  %v4435_v3 = vpop.f32.mrb[6].mxu1 }
 0x472   :  { %4758 = vst [vmem:[#allocation15] sm:$0xff] %v6831_v0  ;;  %v6836_v4 = vadd.f32 %v4435_v3, %v4060_v61  ;;  %v4437_v5 = vpop.f32.mrb[7].mxu1  ;;  %v5376_v54 = vmul.f32 -1.442695, %v6831_v0 }
 0x473   :  { %6395 = vtanh.f32 %v6833_v2  ;;  %4759 = vst [vmem:[#allocation15 + $0x8] sm:$0xff] %v6833_v2  ;;  %v6840_v7 = vadd.f32 %v4437_v5, %v4064_v62  ;;  %v5377_v56 = vmul.f32 -1.442695, %v6833_v2 }
 0x474   :  { %4761 = vst [vmem:[#allocation15 + $0x18] sm:$0xff] %v6836_v4  ;;  %v5378_v55 = vmul.f32 -1.442695, %v6836_v4 }
 0x475   :  { %4762 = vst [vmem:[#allocation15 + $0x20] sm:$0xff] %v6840_v7  ;;  %6397 = vtanh.f32 %v6840_v7  ;;  %v5379_v58 = vmul.f32 -1.442695, %v6840_v7 }
 0x47d   :  { %v6396_v29 = vpop.eup %6395 }
 0x47e   :  { %4511 = vrot.lane.b32.xlu0 %v6396_v29, %s6666_s6 }
 0x47f   :  { %v6398_v31 = vpop.eup %6397 }
 0x480   :  { %4513 = vrot.lane.b32.xlu1 %v6398_v31, %s6666_s6 }
 0x4af   :  { %v6850_v34 = vpop.f32.mrb[8].mxu1 }
 0x4b0   :  { %v4476_v35 = vpop.f32.mrb[9].mxu1  ;;  %v4475_v18 = vadd.f32 %v6850_v34, %v4068_v17 }
 0x4b1   :  { %v6852_v36 = vadd.f32 %v4476_v35, %v4072_v33  ;;  %v6854_v37 = vpop.f32.mrb[10].mxu1 }
 0x4b2   :  { %v4480_v38 = vpop.f32.mrb[11].mxu1  ;;  %v5382_v19 = vmul.f32 -1.442695, %v4475_v18  ;;  %v4479_v20 = vadd.f32 %v6854_v37, %v4068_v17 }
 0x4b3   :  { %6399 = vtanh.f32 %v6852_v36  ;;  %v6857_v42 = vadd.f32 %v4480_v38, %v4072_v33  ;;  %v5383_v22 = vmul.f32 -1.442695, %v6852_v36 }
 0x4b4   :  { %v5384_v21 = vmul.f32 -1.442695, %v4479_v20 }
 0x4b5   :  { %6401 = vtanh.f32 %v6857_v42 }
 0x4b6   :  { %6403 = vpow2.f32 %v5376_v54 }
 0x4b7   :  { %6405 = vpow2.f32 %v5378_v55 }
 0x4b8   :  { %6407 = vpow2.f32 %v5377_v56 }
 0x4b9   :  { %6409 = vpow2.f32 %v5379_v58 }
 0x4bd   :  { %v6400_v52 = vpop.eup %6399 }
 0x4be   :  { %4651 = vrot.lane.b32.xlu0 %v6400_v52, %s6666_s6 }
 0x4bf   :  { %v6402_v53 = vpop.eup %6401 }
 0x4c0   :  { %4653 = vrot.lane.b32.xlu1 %v6402_v53, %s6666_s6  ;;  %v6404_v57 = vpop.eup %6403 }
 0x4c1   :  { %v4495_v59 = vadd.f32 1.0, %v6404_v57  ;;  %v6406_v61 = vpop.eup %6405 }
 0x4c2   :  { %v4497_v62 = vadd.f32 1.0, %v6406_v61  ;;  %v6408_v63 = vpop.eup %6407 }
 0x4c3   :  { %6411 = vrcp.f32 %v4495_v59  ;;  %v4496_v1 = vadd.f32 1.0, %v6408_v63  ;;  %v6410_v3 = vpop.eup %6409 }
 0x4c4   :  { %6413 = vrcp.f32 %v4497_v62  ;;  %v4498_v8 = vadd.f32 1.0, %v6410_v3 }
 0x4c5   :  { %6415 = vrcp.f32 %v4496_v1 }
 0x4cd   :  { %v6412_v0 = vpop.eup %6411 }
 0x4ce   :  { %v6414_v2 = vpop.eup %6413 }
 0x4cf   :  { %v6416_v9 = vpop.eup %6415 }
 0x4f0   :  { %v4512_v5 = vpop.permute.xlu0 %4511 }
 0x4f1   :  { %v4517_v4 = vmul.f32 %v6412_v0, %v4512_v5 }
 0x4f2   :  { %v4514_v10 = vpop.permute.xlu1 %4513 }
 0x4f3   :  { %6417 = vtanh.f32 %v4517_v4  ;;  %4754 = vst.msk [vmem:[#allocation14 + $0x10] sm:$0xff] %vm4539_vm0, %v4517_v4  ;;  %v4518_v7 = vmul.f32 %v6414_v2, %v4514_v10 }
 0x4f4   :  { %6419 = vrcp.f32 %v4498_v8 }
 0x4f5   :  { %6421 = vtanh.f32 %v4518_v7  ;;  %4757 = vst.msk [vmem:[#allocation14 + $0x28] sm:$0xff] %vm4539_vm0, %v4518_v7 }
 0x4f6   :  { %6423 = vpow2.f32 %v5382_v19 }
 0x4f7   :  { %6425 = vpow2.f32 %v5384_v21 }
 0x4f8   :  { %6427 = vpow2.f32 %v5383_v22 }
 0x4fd   :  { %v6418_v11 = vpop.eup %6417 }
 0x4fe   :  { %v4521_v12 = vmul.f32 %v6418_v11, %v6416_v9  ;;  %v6420_v13 = vpop.eup %6419 }
 0x4ff   :  { %v6422_v14 = vpop.eup %6421 }
 0x500   :  { %5380 = vmatmul.mubr.msk.f32.vlgmr.msra.gmra.mrb[4].mxu0 %vm4539_vm0, %v4521_v12  ;;  %v4522_v15 = vmul.f32 %v6422_v14, %v6420_v13  ;;  %v6424_v23 = vpop.eup %6423 }
 0x501   :  { %4616 = vmatprep.mubr.f32.mxu0 %v6665_v24  ;;  %v5385_v24 = vmul.f32 -1.442695, %v6857_v42  ;;  %v4635_v25 = vadd.f32 1.0, %v6424_v23  ;;  %v6426_v6 = vpop.eup %6425 }
 0x502   :  { %v4637_v26 = vadd.f32 1.0, %v6426_v6  ;;  %v6428_v60 = vpop.eup %6427 }
 0x503   :  { %6429 = vpow2.f32 %v5385_v24  ;;  %v4636_v27 = vadd.f32 1.0, %v6428_v60 }
 0x504   :  { %5381 = vmatmul.mubr.msk.f32.gmra.mrb[6].mxu0 %vm4539_vm0, %v4522_v15  ;;  %6431 = vrcp.f32 %v4635_v25 }
 0x505   :  { %6433 = vrcp.f32 %v4637_v26 }
 0x506   :  { %6435 = vrcp.f32 %v4636_v27 }
 0x50d   :  { %v6430_v28 = vpop.eup %6429 }
 0x50e   :  { %v6432_v29 = vpop.eup %6431  ;;  %v4638_v32 = vadd.f32 1.0, %v6430_v28 }
 0x50f   :  { %v6434_v33 = vpop.eup %6433 }
 0x510   :  { %v6436_v36 = vpop.eup %6435 }
 0x530   :  { %v4652_v30 = vpop.permute.xlu0 %4651 }
 0x531   :  { %v4657_v31 = vmul.f32 %v6432_v29, %v4652_v30 }
 0x532   :  { %v4654_v34 = vpop.permute.xlu1 %4653 }
 0x533   :  { %6437 = vtanh.f32 %v4657_v31  ;;  %v4658_v35 = vmul.f32 %v6434_v33, %v4654_v34 }
 0x534   :  { %6439 = vrcp.f32 %v4638_v32 }
 0x535   :  { %6441 = vtanh.f32 %v4658_v35 }
 0x53d   :  { %v6438_v37 = vpop.eup %6437 }
 0x53e   :  { %v4661_v38 = vmul.f32 %v6438_v37, %v6436_v36  ;;  %v6440_v39 = vpop.eup %6439 }
 0x53f   :  { %v6442_v40 = vpop.eup %6441 }
 0x540   :  { %5414 = vmatprep.mubr.msk.f32.mxu1 %vm4539_vm0, %v4661_v38  ;;  %v4662_v41 = vmul.f32 %v6442_v40, %v6440_v39 }
 0x542   :  { %5415 = vmatmul.mubr.msk.f32.vlgmr.msra.gmra.mrb[12].mxu1 %vm4539_vm0, %v4662_v41 }
 0x5d3   :  { %v4612_v42 = vpop.f32.mrb[4].mxu0 }
 0x5d4   :  { %4752 = vst [vmem:[#allocation14] sm:$0xff] %v4612_v42  ;;  %v4614_v43 = vpop.f32.mrb[5].mxu0 }
 0x5d5   :  { %4753 = vst [vmem:[#allocation14 + $0x8] sm:$0xff] %v4614_v43 }
 0x5d7   :  { %v4618_v44 = vpop.f32.mrb[6].mxu0 }
 0x5d8   :  { %4755 = vst [vmem:[#allocation14 + $0x18] sm:$0xff] %v4618_v44  ;;  %v4620_v45 = vpop.f32.mrb[7].mxu0 }
 0x5d9   :  { %4756 = vst [vmem:[#allocation14 + $0x20] sm:$0xff] %v4620_v45 }
 0x5da   :  { %6608 = shalt.err (!%p6605_p4)
}
 0x5db   :  { %s6609_s25 = scalar_lea.hbm %s6912_s7, 768 }
 0x5dc   :  { %p6610_p5 = scmp.ne.s32.totalorder %s6912_s7, %s6609_s25  ;;  %p6613_p6 = scmp.lt.u32.totalorder %s6609_s25, %s6912_s7 }
 0x5de   :  { %p6615_p7 = pnand %p6613_p6, %p6610_p5 }
 0x5e0   :  { %6618 = shalt.err (!%p6615_p7)
}
 0x5e1   :  { %s6668_s10 = smov 384   ;;  %s6669_s11 = smov 24  }
 0x5e2   :  { %4775 = dma.vmem_to_hbm [thread:$0]  %s4770_s16, 768, %s6912_s7, [#allocation4], %s6668_s10, %s6668_s10, %s6669_s11  }
 0x5e3   :  { %s6670_s2 = smov [#allocation15]  }
 0x5e4   :  { %s4781_s22 = sshll.u32 %s6670_s2, 4  ;;  %s4782_s22 = int_to_ptr.vmem [resolvable:$true] %s4781_s22 }
 0x5e5   :  { %s6619_s9 = scalar_lea.vmem %s4782_s22, 768  ;;  %p6624_p9 = scmp.lt.s32.totalorder %s4782_s22, %s4782_s22 }
 0x5e6   :  { %p6620_p8 = scmp.ne.s32.totalorder %s4782_s22, %s6619_s9  ;;  %p6625_p10 = scmp.lt.s32.totalorder %s6619_s9, %s6619_s9 }
 0x5e8   :  { %p6626_p11 = por %p6625_p10, %p6624_p9 }
 0x5ea   :  { %p6627_p12 = pnand %p6626_p11, %p6620_p8 }
 0x615   :  { %v5416_v46 = vpop.f32.mrb[12].mxu1 }
 0x616   :  { %4763 = vst.msk [vmem:[#allocation15 + $0x28] sm:$0xff] %vm4539_vm0, %v5416_v46  ;;  %v4743_v47 = vpop.f32.mrb[13].mxu1 }
 0x617   :  { %4760 = vst.msk [vmem:[#allocation15 + $0x10] sm:$0xff] %vm4539_vm0, %v4743_v47 }
 0x618   :  { %6630 = shalt.err (!%p6627_p12)
}
 0x619   :  { %s6631_s7 = scalar_lea.hbm %s6913_s8, 768 }
 0x61a   :  { %p6632_p13 = scmp.ne.s32.totalorder %s6913_s8, %s6631_s7  ;;  %p6635_p0 = scmp.lt.u32.totalorder %s6631_s7, %s6913_s8 }
 0x61c   :  { %p6637_p1 = pnand %p6635_p0, %p6632_p13 }
 0x61e   :  { %6640 = shalt.err (!%p6637_p1)
}
 0x61f   :  { %4787 = dma.vmem_to_hbm [thread:$0]  %s4782_s22, 768, %s6913_s8, [#allocation16], %s6668_s10, %s6668_s10, %s6669_s11  }
 0x620   :  { %6649 = dma.done.wait [#allocation4], 768  }
 0x621   :  { %6650 = vsyncadd [#allocation4], 4294966528 }
 0x622   :  { %6651 = dma.done.wait [#allocation16], 768  }
 0x623   :  { %6652 = vsyncadd [#allocation16], 4294966528 }
 0x624   :  { %4794 = vsyncpa [#allocation3], 1 }
 0x625   :  { %4795 = vsyncpa [#allocation6], 1 }
 0x626   :  { %4796 = vsyncpa [#allocation9], 1 }
 0x627   :  { %4797 = vsyncpa [#allocation12], 1 }
 0x628   :  { %4798 = vsyncpa [#allocation4], 1 }
 0x629   :  { %4799 = vsyncpa [#allocation16], 1 }

</bundles_post_ra>
